<compile_context>
chip_gen: v6e
topology: v6e:2x2x1
jax: 0.10.0
libtpu: 0.0.40
codegen_flags: <defaults>
</compile_context>

<pallas_src>
import functools
import math

import jax
import jax.numpy as jnp
from jax import lax
from jax.experimental import pallas as pl
from jax.experimental.pallas import tpu as pltpu

MIN_NORM = 1e-15
_LANE = 128
_SUBLANE = 8
_PROJ_VMEM_BUDGET = 12 * 1024 * 1024  # bytes; conservative vs 16MiB default scoped VMEM


def _round_up(n, m):
    return ((n + m - 1) // m) * m


# ----------------------------------------------------------------------------
# geoopt.manifolds.poincare.math primitives (pure jnp; shared by the kernels
# and the pure-JAX reference)
# ----------------------------------------------------------------------------
def _artanh(x):
    x = jnp.clip(x, -1.0 + 1e-7, 1.0 - 1e-7)
    return 0.5 * jnp.log((1.0 + x) / (1.0 - x))


def _mobius_add(x, y, c, x2=None, y2=None):
    if x2 is None:
        x2 = jnp.sum(x * x, axis=-1, keepdims=True)
    if y2 is None:
        y2 = jnp.sum(y * y, axis=-1, keepdims=True)
    xy = jnp.sum(x * y, axis=-1, keepdims=True)
    num = (1.0 + 2.0 * c * xy + c * y2) * x + (1.0 - c * x2) * y
    denom = 1.0 + 2.0 * c * xy + (c * c) * x2 * y2
    return num / jnp.maximum(denom, MIN_NORM)


def _logmap0(y, c):
    sqrt_c = c ** 0.5
    y_norm = jnp.maximum(
        jnp.sqrt(jnp.sum(y * y, axis=-1, keepdims=True)), MIN_NORM)
    return y / y_norm / sqrt_c * _artanh(sqrt_c * y_norm)


def _expmap0(u, c):
    sqrt_c = c ** 0.5
    u_norm = jnp.maximum(
        jnp.sqrt(jnp.sum(u * u, axis=-1, keepdims=True)), MIN_NORM)
    return jnp.tanh(sqrt_c * u_norm) * u / (sqrt_c * u_norm)


def _mobius_rescale(mx, x_ratio, c):
    """Finish a Mobius matvec / pointwise-mul.

    mx      : W @ x (already matmul'ed / elementwise-multiplied), (..., H)
    x_ratio : artanh(sqrt_c * |x|) / |x| of the source point (clamped), (..., 1)
    """
    sqrt_c = c ** 0.5
    mx_sq = jnp.sum(mx * mx, axis=-1, keepdims=True)
    mx_norm = jnp.maximum(jnp.sqrt(mx_sq), MIN_NORM)
    res = jnp.tanh(mx_norm * x_ratio) * mx / (mx_norm * sqrt_c)
    return jnp.where(mx_sq == 0.0, jnp.zeros_like(res), res)


# ----------------------------------------------------------------------------
# Kernel 1: parallel input projection  (W_i* (x) x_t for all t, all gates)
# ----------------------------------------------------------------------------
def _input_projection_kernel(x_ref, w_ref, out_ref, *, c, Hp):
    sqrt_c = c ** 0.5
    x = x_ref[...]                                    # (rows, Fp)
    x_sq = jnp.sum(x * x, axis=-1, keepdims=True)
    x_norm = jnp.maximum(jnp.sqrt(x_sq), MIN_NORM)
    x_ratio = _artanh(sqrt_c * x_norm) / x_norm
    mx = jnp.dot(x, w_ref[...], preferred_element_type=jnp.float32)  # (rows, 3Hp)
    for g in range(3):                                # gate order [r, z, h]
        out_ref[:, g * Hp:(g + 1) * Hp] = _mobius_rescale(
            mx[:, g * Hp:(g + 1) * Hp], x_ratio, c)


def _choose_proj_t(Sp, Bp, Fp, Hp, t_blk):
    """Largest time-block (multiple of t_blk dividing Sp) within VMEM budget."""
    best = t_blk
    t = t_blk
    while t <= Sp:
        if Sp % t == 0:
            rows = t * Bp
            # double-buffered input + output tiles, plus the resident weight
            footprint = rows * (Fp + 3 * Hp) * 4 * 2 + Fp * 3 * Hp * 4 * 2
            if footprint <= _PROJ_VMEM_BUDGET:
                best = t
            else:
                break
        t += t_blk
    return best


def _run_input_projection(x_pad, u_T, c, Hp, t_blk):
    Sp, Bp, Fp = x_pad.shape
    x2d = x_pad.reshape(Sp * Bp, Fp)
    t_proj = _choose_proj_t(Sp, Bp, Fp, Hp, t_blk)
    rows = t_proj * Bp
    grid = (Sp // t_proj,)
    kernel = functools.partial(_input_projection_kernel, c=c, Hp=Hp)
    out2d = pl.pallas_call(
        kernel,
        out_shape=jax.ShapeDtypeStruct((Sp * Bp, 3 * Hp), jnp.float32),
        grid_spec=pltpu.PrefetchScalarGridSpec(
            num_scalar_prefetch=0,
            grid=grid,
            in_specs=[
                pl.BlockSpec((rows, Fp), lambda s: (s, 0)),
                pl.BlockSpec((Fp, 3 * Hp), lambda s: (0, 0)),
            ],
            out_specs=pl.BlockSpec((rows, 3 * Hp), lambda s: (s, 0)),
        ),
        compiler_params=pltpu.CompilerParams(
            dimension_semantics=("parallel",)),
    )(x2d, u_T)
    return out2d.reshape(Sp, Bp, 3 * Hp)


# ----------------------------------------------------------------------------
# Kernel 2: serial recurrence over time (T_BLK timesteps per grid step)
# ----------------------------------------------------------------------------
def _gru_cell_fused(ux, hx, w_rz, w_h, b_r, b_z, b_h, b_r2, b_z2, b_h2, c, Hp):
    """One MobiusGRU cell.

    ux  : (B, 3*Hp) precomputed Mobius input projections, gate order [r, z, h]
    hx  : (B, Hp)   hyperbolic hidden state
    w_rz: (Hp, 2*Hp) pre-transposed hidden weights for [r | z]
    w_h : (Hp, Hp)   pre-transposed hidden weight for the candidate gate
    b_* : (1, Hp) biases; b_*2 their precomputed squared norms (1, 1)
    """
    sqrt_c = c ** 0.5

    hx_sq = jnp.sum(hx * hx, axis=-1, keepdims=True)
    hx_norm = jnp.maximum(jnp.sqrt(hx_sq), MIN_NORM)
    hx_ratio = _artanh(sqrt_c * hx_norm) / hx_norm

    # fused r/z hidden projections: one (B,Hp) x (Hp,2Hp) matmul
    m_rz = jnp.dot(hx, w_rz, preferred_element_type=jnp.float32)
    W_r_h = _mobius_rescale(m_rz[:, :Hp], hx_ratio, c)
    W_z_h = _mobius_rescale(m_rz[:, Hp:], hx_ratio, c)

    ux_r = ux[:, :Hp]
    ux_z = ux[:, Hp:2 * Hp]
    ux_h = ux[:, 2 * Hp:]

    r_pre = _mobius_add(_mobius_add(W_r_h, ux_r, c), b_r, c, y2=b_r2)
    z_pre = _mobius_add(_mobius_add(W_z_h, ux_z, c), b_z, c, y2=b_z2)
    r_t = jax.nn.sigmoid(_logmap0(r_pre, c))
    z_t = jax.nn.sigmoid(_logmap0(z_pre, c))

    # rh_t = r_t (Mobius pointwise) hx  -- reuses hx's norm ratio
    rh_t = _mobius_rescale(r_t * hx, hx_ratio, c)

    rh_sq = jnp.sum(rh_t * rh_t, axis=-1, keepdims=True)
    rh_norm = jnp.maximum(jnp.sqrt(rh_sq), MIN_NORM)
    rh_ratio = _artanh(sqrt_c * rh_norm) / rh_norm
    m_h = jnp.dot(rh_t, w_h, preferred_element_type=jnp.float32)
    W_h_rh = _mobius_rescale(m_h, rh_ratio, c)

    h_tilde = _mobius_add(_mobius_add(W_h_rh, ux_h, c), b_h, c, y2=b_h2)
    # nonlin is None in the reference module -> no mobius_fn_apply needed.

    delta_h = _mobius_add(-hx, h_tilde, c, x2=hx_sq)

    d_sq = jnp.sum(delta_h * delta_h, axis=-1, keepdims=True)
    d_norm = jnp.maximum(jnp.sqrt(d_sq), MIN_NORM)
    d_ratio = _artanh(sqrt_c * d_norm) / d_norm
    z_delta = _mobius_rescale(z_t * delta_h, d_ratio, c)

    h_out = _mobius_add(hx, z_delta, c, x2=hx_sq)
    return h_out


def _mobius_gru_recurrent_kernel(ux_ref, h0_ref, whh_ref, bias_ref,
                                 out_ref, hlast_ref, hx_ref,
                                 *, c, Hp, t_blk, seq_len):
    blk = pl.program_id(0)

    @pl.when(blk == 0)
    def _():
        hx_ref[...] = h0_ref[...]

    # per-grid-step invariants, hoisted out of the time loop
    bias = bias_ref[...]          # (3, Hp), rows ordered [r, z, h]
    b_r = bias[0:1]
    b_z = bias[1:2]
    b_h = bias[2:3]
    b_r2 = jnp.sum(b_r * b_r, axis=-1, keepdims=True)
    b_z2 = jnp.sum(b_z * b_z, axis=-1, keepdims=True)
    b_h2 = jnp.sum(b_h * b_h, axis=-1, keepdims=True)

    def step(tt, carry):
        hx = hx_ref[...]                       # (Bp, Hp)
        ux = ux_ref[tt]                        # (Bp, 3Hp)
        w_rz = whh_ref[:, :2 * Hp]             # (Hp, 2Hp)
        w_h = whh_ref[:, 2 * Hp:]              # (Hp, Hp)
        h_new = _gru_cell_fused(ux, hx, w_rz, w_h, b_r, b_z, b_h,
                                b_r2, b_z2, b_h2, c, Hp)
        if seq_len % t_blk != 0:
            # mask out zero-padded timesteps so h_last stays correct
            t_global = blk * t_blk + tt
            h_new = jnp.where(t_global < seq_len, h_new, hx)
        hx_ref[...] = h_new
        out_ref[tt] = h_new
        return carry

    lax.fori_loop(0, t_blk, step, 0)

    # write the running state every grid step (safe w.r.t. writeback policy)
    hlast_ref[...] = hx_ref[...]


def _run_recurrence(ux, h0_p, whh_T, bias_p, c, seq_len, t_blk, Hp):
    Sp, Bp, _ = ux.shape
    grid = (Sp // t_blk,)
    kernel = functools.partial(_mobius_gru_recurrent_kernel, c=c, Hp=Hp,
                               t_blk=t_blk, seq_len=seq_len)
    out, h_last = pl.pallas_call(
        kernel,
        out_shape=(
            jax.ShapeDtypeStruct((Sp, Bp, Hp), jnp.float32),
            jax.ShapeDtypeStruct((Bp, Hp), jnp.float32),
        ),
        grid_spec=pltpu.PrefetchScalarGridSpec(
            num_scalar_prefetch=0,
            grid=grid,
            in_specs=[
                pl.BlockSpec((t_blk, Bp, 3 * Hp), lambda s: (s, 0, 0)),  # Ux
                pl.BlockSpec((Bp, Hp), lambda s: (0, 0)),                # h0
                pl.BlockSpec((Hp, 3 * Hp), lambda s: (0, 0)),            # W_hh^T
                pl.BlockSpec((3, Hp), lambda s: (0, 0)),                 # bias
            ],
            out_specs=[
                pl.BlockSpec((t_blk, Bp, Hp), lambda s: (s, 0, 0)),      # outs
                pl.BlockSpec((Bp, Hp), lambda s: (0, 0)),                # h_last
            ],
            scratch_shapes=[pltpu.VMEM((Bp, Hp), jnp.float32)],          # carried hx
        ),
        compiler_params=pltpu.CompilerParams(
            dimension_semantics=("arbitrary",)),
    )(ux, h0_p, whh_T, bias_p)
    return out, h_last


# ----------------------------------------------------------------------------
# Weight packing (pre-transpose + zero-pad to lane-dense layout)
# ----------------------------------------------------------------------------
def _pack_input_weight(w_ih, Fp, Hp):
    """w_ih: (3H, F) rows ordered [r, h, z] -> (Fp, 3Hp) cols ordered [r, z, h]."""
    H3, F = w_ih.shape
    H = H3 // 3
    W_ir, W_ih_g, W_iz = w_ih[:H], w_ih[H:2 * H], w_ih[2 * H:]

    def pt(w):
        return jnp.pad(w.T, ((0, Fp - F), (0, Hp - H)))

    return jnp.concatenate([pt(W_ir), pt(W_iz), pt(W_ih_g)], axis=1)


def _pack_hidden_weight(w_hh, Hp):
    """w_hh: (3H, H) rows ordered [r, h, z] -> (Hp, 3Hp) cols ordered [r, z, h]."""
    H = w_hh.shape[1]
    W_hr, W_hh_g, W_hz = w_hh[:H], w_hh[H:2 * H], w_hh[2 * H:]

    def pt(w):
        return jnp.pad(w.T, ((0, Hp - H), (0, Hp - H)))

    return jnp.concatenate([pt(W_hr), pt(W_hz), pt(W_hh_g)], axis=1)


# ----------------------------------------------------------------------------
# Module wrapper (matches MobiusGRU defaults: bias=True, nonlin=None,
# hyperbolic_input=True, hyperbolic_hidden_state0=True, c=1.0)
# ----------------------------------------------------------------------------
def init_mobius_gru_params(key, input_size, hidden_size, num_layers=1, c=1.0):
    params = []
    stdv = 1.0 / math.sqrt(hidden_size)
    for i in range(num_layers):
        key, k1, k2, k3 = jax.random.split(key, 4)
        in_f = input_size if i == 0 else hidden_size
        w_ih = jax.random.uniform(k1, (3 * hidden_size, in_f),
                                  minval=-stdv, maxval=stdv, dtype=jnp.float32)
        w_hh = jax.random.uniform(k2, (3 * hidden_size, hidden_size),
                                  minval=-stdv, maxval=stdv, dtype=jnp.float32)
        b = jax.random.normal(k3, (3, hidden_size), dtype=jnp.float32) * 1e-5
        b = _expmap0(b, c)  # geoopt.ManifoldParameter init
        params.append((w_ih, w_hh, b))
    return params


def mobius_gru_forward(x, params, hidden_size, c=1.0, h0=None, t_blk=32):
    """Pallas-backed MobiusGRU forward.

    x: (seq_len, batch, input_size) hyperbolic input (hyperbolic_input=True).
    returns (out, ht) with out (seq_len, batch, H), ht (num_layers, batch, H).
    """
    S, B, F = x.shape
    num_layers = len(params)
    H = hidden_size
    Bp = _round_up(B, _SUBLANE)
    Hp = _round_up(H, _LANE)
    Fp = _round_up(F, _LANE)
    T_BLK = min(t_blk, S)
    Sp = _round_up(S, T_BLK)

    if h0 is None:
        h0 = jnp.zeros((num_layers, B, H), dtype=jnp.float32)

    # hyperbolic_input=True and hyperbolic_hidden_state0=True (module defaults),
    # i>0 inputs are always hyperbolic -> no expmap0 on inputs.
    cur = jnp.pad(x.astype(jnp.float32),
                  ((0, Sp - S), (0, Bp - B), (0, Fp - F)))

    h_lasts = []
    for i, (w_ih, w_hh, bias) in enumerate(params):
        in_p = Fp if i == 0 else Hp
        u_T = _pack_input_weight(w_ih, in_p, Hp)
        whh_T = _pack_hidden_weight(w_hh, Hp)
        # bias rows reordered [r, h, z] -> [r, z, h], zero-padded to Hp
        bias_p = jnp.pad(bias[jnp.array([0, 2, 1])], ((0, 0), (0, Hp - H)))
        h0_p = jnp.pad(h0[i].astype(jnp.float32), ((0, Bp - B), (0, Hp - H)))

        ux = _run_input_projection(cur, u_T, c, Hp, T_BLK)
        cur, h_last = _run_recurrence(ux, h0_p, whh_T, bias_p, c, S, T_BLK, Hp)
        h_lasts.append(h_last[:B, :H])

    out = cur[:S, :B, :H]
    ht = jnp.stack(h_lasts)
    return out, ht
    # TODO(synk): PackedSequence / batch_sizes path of mobius_gru_loop not implemented
    # (only the dense, unpacked forward).


# ----------------------------------------------------------------------------
# Pure-JAX reference (mirrors the PyTorch loop) for a correctness check.
# ----------------------------------------------------------------------------
def _mobius_matvec(m, x, c):
    sqrt_c = c ** 0.5
    x_norm = jnp.maximum(
        jnp.sqrt(jnp.sum(x * x, axis=-1, keepdims=True)), MIN_NORM)
    mx = jnp.dot(x, m.T, preferred_element_type=jnp.float32)
    mx_norm = jnp.maximum(
        jnp.sqrt(jnp.sum(mx * mx, axis=-1, keepdims=True)), MIN_NORM)
    res_c = (jnp.tanh(mx_norm / x_norm * _artanh(sqrt_c * x_norm))
             * mx / (mx_norm * sqrt_c))
    cond = jnp.all(mx == 0.0, axis=-1, keepdims=True)
    return jnp.where(cond, jnp.zeros_like(res_c), res_c)


def _mobius_pointwise_mul(w, x, c):
    sqrt_c = c ** 0.5
    x_norm = jnp.maximum(
        jnp.sqrt(jnp.sum(x * x, axis=-1, keepdims=True)), MIN_NORM)
    wx = w * x
    wx_norm = jnp.maximum(
        jnp.sqrt(jnp.sum(wx * wx, axis=-1, keepdims=True)), MIN_NORM)
    res_c = (jnp.tanh(wx_norm / x_norm * _artanh(sqrt_c * x_norm))
             * wx / (wx_norm * sqrt_c))
    cond = jnp.all(wx == 0.0, axis=-1, keepdims=True)
    return jnp.where(cond, jnp.zeros_like(res_c), res_c)


def _one_rnn_transform(W, h, U, x, b, c):
    W_otimes_h = _mobius_matvec(W, h, c)
    U_otimes_x = _mobius_matvec(U, x, c)
    Wh_plus_Ux = _mobius_add(W_otimes_h, U_otimes_x, c)
    return _mobius_add(Wh_plus_Ux, b, c)


def _mobius_gru_cell_ref(x, hx, weight_ih, weight_hh, bias, c, hidden_size):
    H = hidden_size
    W_ir, W_ih, W_iz = weight_ih[0:H], weight_ih[H:2 * H], weight_ih[2 * H:3 * H]
    W_hr, W_hh, W_hz = weight_hh[0:H], weight_hh[H:2 * H], weight_hh[2 * H:3 * H]
    b_r, b_h, b_z = bias[0:1], bias[1:2], bias[2:3]

    z_t = jax.nn.sigmoid(_logmap0(_one_rnn_transform(W_hz, hx, W_iz, x, b_z, c), c))
    r_t = jax.nn.sigmoid(_logmap0(_one_rnn_transform(W_hr, hx, W_ir, x, b_r, c), c))
    rh_t = _mobius_pointwise_mul(r_t, hx, c)
    h_tilde = _one_rnn_transform(W_hh, rh_t, W_ih, x, b_h, c)
    delta_h = _mobius_add(-hx, h_tilde, c)
    h_out = _mobius_add(hx, _mobius_pointwise_mul(z_t, delta_h, c), c)
    return h_out


def mobius_gru_forward_ref(x, params, hidden_size, c=1.0, h0=None):
    S, B, _ = x.shape
    num_layers = len(params)
    if h0 is None:
        h0 = jnp.zeros((num_layers, B, hidden_size), dtype=x.dtype)
    out = x
    last_states = []
    for i in range(num_layers):
        w_ih, w_hh, bias = params[i]
        hx = h0[i]
        outs = []
        for t in range(S):
            hx = _mobius_gru_cell_ref(out[t], hx, w_ih, w_hh, bias, c, hidden_size)
            outs.append(hx)
        out = jnp.stack(outs)
        last_states.append(hx)
    return out, jnp.stack(last_states)


if __name__ == "__main__":
    seq_len, batch, input_size, hidden_size, num_layers = 8, 2, 16, 32, 2
    c = 1.0

    key = jax.random.PRNGKey(0)
    key, kx = jax.random.split(key)
    # Keep input small and map it onto the Poincare ball (valid hyperbolic pts).
    x_tan = jax.random.normal(kx, (seq_len, batch, input_size),
                              dtype=jnp.float32) * 0.1
    x = _expmap0(x_tan, c)

    params = init_mobius_gru_params(key, input_size, hidden_size,
                                    num_layers=num_layers, c=c)

    fwd = jax.jit(functools.partial(mobius_gru_forward,
                                    hidden_size=hidden_size, c=c))
    out, ht = fwd(x, params)
    out = jax.block_until_ready(out)
    ht = jax.block_until_ready(ht)

    out_ref, ht_ref = mobius_gru_forward_ref(x, params, hidden_size, c=c)

    assert out.shape == (seq_len, batch, hidden_size)
    assert ht.shape == (num_layers, batch, hidden_size)
    assert bool(jnp.all(jnp.isfinite(out))) and bool(jnp.all(jnp.isfinite(ht)))
    assert jnp.allclose(out, out_ref, atol=1e-4, rtol=1e-4), \
        float(jnp.max(jnp.abs(out - out_ref)))
    assert jnp.allclose(ht, ht_ref, atol=1e-4, rtol=1e-4), \
        float(jnp.max(jnp.abs(ht - ht_ref)))

    print("KERNEL_OK")
</pallas_src>

<mosaic_0001>
module attributes {stable_mosaic.version = 11 : i64} {
  func.func @_input_projection_kernel(%arg0: i32, %arg1: memref<64x128xf32, #tpu.memory_space<vmem>>, %arg2: memref<128x384xf32, #tpu.memory_space<vmem>>, %arg3: memref<64x384xf32, #tpu.memory_space<vmem>>) attributes {dimension_semantics = [#tpu.dimension_semantics<parallel>], iteration_bounds = array<i64: 1>, scalar_prefetch = 0 : i64, scratch_operands = 0 : i64, tpu.core_type = #tpu.core_type<tc>, window_params = [{transform_indices = @transform_0, window_bounds = array<i64: 64, 128>}, {pipeline_mode = #tpu.pipeline_mode<synchronous>, transform_indices = @transform_1, window_bounds = array<i64: 128, 384>}, {transform_indices = @transform_2, window_bounds = array<i64: 64, 384>}]} {
    %c0 = arith.constant 0 : index
    %c0_0 = arith.constant 0 : index
    %0 = vector.load %arg1[%c0, %c0_0] : memref<64x128xf32, #tpu.memory_space<vmem>>, vector<64x128xf32>
    %1 = arith.mulf %0, %0 : vector<64x128xf32>
    %cst = arith.constant dense<0.000000e+00> : vector<64xf32>
    %2 = vector.multi_reduction <add>, %1, %cst [1] : vector<64x128xf32> to vector<64xf32>
    %3 = vector.shape_cast %2 : vector<64xf32> to vector<64x1xf32>
    %4 = math.sqrt %3 : vector<64x1xf32>
    %cst_1 = arith.constant 1.000000e-15 : f32
    %5 = vector.broadcast %cst_1 : f32 to vector<64x1xf32>
    %6 = arith.maximumf %4, %5 : vector<64x1xf32>
    %cst_2 = arith.constant 1.000000e+00 : f32
    %7 = vector.broadcast %cst_2 : f32 to vector<64x1xf32>
    %8 = arith.mulf %7, %6 : vector<64x1xf32>
    %cst_3 = arith.constant -0.99999988 : f32
    %cst_4 = arith.constant 0.99999988 : f32
    %9 = vector.broadcast %cst_3 : f32 to vector<64x1xf32>
    %10 = arith.maximumf %9, %8 : vector<64x1xf32>
    %11 = vector.broadcast %cst_4 : f32 to vector<64x1xf32>
    %12 = arith.minimumf %11, %10 : vector<64x1xf32>
    %cst_5 = arith.constant 1.000000e+00 : f32
    %13 = vector.broadcast %cst_5 : f32 to vector<64x1xf32>
    %14 = arith.addf %13, %12 : vector<64x1xf32>
    %cst_6 = arith.constant 1.000000e+00 : f32
    %15 = vector.broadcast %cst_6 : f32 to vector<64x1xf32>
    %16 = arith.subf %15, %12 : vector<64x1xf32>
    %17 = arith.divf %14, %16 : vector<64x1xf32>
    %18 = math.log %17 : vector<64x1xf32>
    %cst_7 = arith.constant 5.000000e-01 : f32
    %19 = vector.broadcast %cst_7 : f32 to vector<64x1xf32>
    %20 = arith.mulf %19, %18 : vector<64x1xf32>
    %21 = arith.divf %20, %6 : vector<64x1xf32>
    %c0_8 = arith.constant 0 : index
    %c0_9 = arith.constant 0 : index
    %22 = vector.load %arg2[%c0_8, %c0_9] : memref<128x384xf32, #tpu.memory_space<vmem>>, vector<128x384xf32>
    %cst_10 = arith.constant dense<0.000000e+00> : vector<64x384xf32>
    %23 = tpu.matmul %0, %22, %cst_10 {dimension_numbers = #tpu.dot_dimension_numbers<[1], [0], [0], [1], [0, 0, 1, 1], [], []>} : vector<64x128xf32>, vector<128x384xf32>, vector<64x384xf32> -> vector<64x384xf32>
    %24 = vector.extract_strided_slice %23 {offsets = [0, 0], sizes = [64, 128], strides = [1, 1]} : vector<64x384xf32> to vector<64x128xf32>
    %25 = arith.mulf %24, %24 : vector<64x128xf32>
    %cst_11 = arith.constant dense<0.000000e+00> : vector<64xf32>
    %26 = vector.multi_reduction <add>, %25, %cst_11 [1] : vector<64x128xf32> to vector<64xf32>
    %27 = vector.shape_cast %26 : vector<64xf32> to vector<64x1xf32>
    %28 = math.sqrt %27 : vector<64x1xf32>
    %cst_12 = arith.constant 1.000000e-15 : f32
    %29 = vector.broadcast %cst_12 : f32 to vector<64x1xf32>
    %30 = arith.maximumf %28, %29 : vector<64x1xf32>
    %31 = arith.mulf %30, %21 : vector<64x1xf32>
    %32 = math.tanh %31 : vector<64x1xf32>
    %33 = vector.broadcast %32 : vector<64x1xf32> to vector<64x128xf32>
    %34 = arith.mulf %33, %24 : vector<64x128xf32>
    %cst_13 = arith.constant 1.000000e+00 : f32
    %35 = vector.broadcast %cst_13 : f32 to vector<64x1xf32>
    %36 = arith.mulf %30, %35 : vector<64x1xf32>
    %37 = vector.broadcast %36 : vector<64x1xf32> to vector<64x128xf32>
    %38 = arith.divf %34, %37 : vector<64x128xf32>
    %cst_14 = arith.constant 0.000000e+00 : f32
    %39 = vector.broadcast %cst_14 : f32 to vector<64x1xf32>
    %40 = arith.cmpf oeq, %27, %39 : vector<64x1xf32>
    %cst_15 = arith.constant 0.000000e+00 : f32
    %41 = vector.broadcast %cst_15 : f32 to vector<64x128xf32>
    %42 = vector.shape_cast %40 : vector<64x1xi1> to vector<64x1xi1>
    %43 = vector.broadcast %42 : vector<64x1xi1> to vector<64x128xi1>
    %44 = arith.select %43, %41, %38 : vector<64x128xi1>, vector<64x128xf32>
    %c0_16 = arith.constant 0 : index
    %c0_17 = arith.constant 0 : index
    %45 = vector.load %arg3[%c0_16, %c0_17] : memref<64x384xf32, #tpu.memory_space<vmem>>, vector<64x128xf32>
    tpu.vector_store %arg3[%c0_16, %c0_17], %44 {strides = array<i32>} : memref<64x384xf32, #tpu.memory_space<vmem>>, vector<64x128xf32>,
    %46 = vector.extract_strided_slice %23 {offsets = [0, 128], sizes = [64, 128], strides = [1, 1]} : vector<64x384xf32> to vector<64x128xf32>
    %47 = arith.mulf %46, %46 : vector<64x128xf32>
    %cst_18 = arith.constant dense<0.000000e+00> : vector<64xf32>
    %48 = vector.multi_reduction <add>, %47, %cst_18 [1] : vector<64x128xf32> to vector<64xf32>
    %49 = vector.shape_cast %48 : vector<64xf32> to vector<64x1xf32>
    %50 = math.sqrt %49 : vector<64x1xf32>
    %cst_19 = arith.constant 1.000000e-15 : f32
    %51 = vector.broadcast %cst_19 : f32 to vector<64x1xf32>
    %52 = arith.maximumf %50, %51 : vector<64x1xf32>
    %53 = arith.mulf %52, %21 : vector<64x1xf32>
    %54 = math.tanh %53 : vector<64x1xf32>
    %55 = vector.broadcast %54 : vector<64x1xf32> to vector<64x128xf32>
    %56 = arith.mulf %55, %46 : vector<64x128xf32>
    %cst_20 = arith.constant 1.000000e+00 : f32
    %57 = vector.broadcast %cst_20 : f32 to vector<64x1xf32>
    %58 = arith.mulf %52, %57 : vector<64x1xf32>
    %59 = vector.broadcast %58 : vector<64x1xf32> to vector<64x128xf32>
    %60 = arith.divf %56, %59 : vector<64x128xf32>
    %cst_21 = arith.constant 0.000000e+00 : f32
    %61 = vector.broadcast %cst_21 : f32 to vector<64x1xf32>
    %62 = arith.cmpf oeq, %49, %61 : vector<64x1xf32>
    %cst_22 = arith.constant 0.000000e+00 : f32
    %63 = vector.broadcast %cst_22 : f32 to vector<64x128xf32>
    %64 = vector.shape_cast %62 : vector<64x1xi1> to vector<64x1xi1>
    %65 = vector.broadcast %64 : vector<64x1xi1> to vector<64x128xi1>
    %66 = arith.select %65, %63, %60 : vector<64x128xi1>, vector<64x128xf32>
    %c0_23 = arith.constant 0 : index
    %c128 = arith.constant 128 : index
    %67 = vector.load %arg3[%c0_23, %c128] : memref<64x384xf32, #tpu.memory_space<vmem>>, vector<64x128xf32>
    tpu.vector_store %arg3[%c0_23, %c128], %66 {strides = array<i32>} : memref<64x384xf32, #tpu.memory_space<vmem>>, vector<64x128xf32>,
    %68 = vector.extract_strided_slice %23 {offsets = [0, 256], sizes = [64, 128], strides = [1, 1]} : vector<64x384xf32> to vector<64x128xf32>
    %69 = arith.mulf %68, %68 : vector<64x128xf32>
    %cst_24 = arith.constant dense<0.000000e+00> : vector<64xf32>
    %70 = vector.multi_reduction <add>, %69, %cst_24 [1] : vector<64x128xf32> to vector<64xf32>
    %71 = vector.shape_cast %70 : vector<64xf32> to vector<64x1xf32>
    %72 = math.sqrt %71 : vector<64x1xf32>
    %cst_25 = arith.constant 1.000000e-15 : f32
    %73 = vector.broadcast %cst_25 : f32 to vector<64x1xf32>
    %74 = arith.maximumf %72, %73 : vector<64x1xf32>
    %75 = arith.mulf %74, %21 : vector<64x1xf32>
    %76 = math.tanh %75 : vector<64x1xf32>
    %77 = vector.broadcast %76 : vector<64x1xf32> to vector<64x128xf32>
    %78 = arith.mulf %77, %68 : vector<64x128xf32>
    %cst_26 = arith.constant 1.000000e+00 : f32
    %79 = vector.broadcast %cst_26 : f32 to vector<64x1xf32>
    %80 = arith.mulf %74, %79 : vector<64x1xf32>
    %81 = vector.broadcast %80 : vector<64x1xf32> to vector<64x128xf32>
    %82 = arith.divf %78, %81 : vector<64x128xf32>
    %cst_27 = arith.constant 0.000000e+00 : f32
    %83 = vector.broadcast %cst_27 : f32 to vector<64x1xf32>
    %84 = arith.cmpf oeq, %71, %83 : vector<64x1xf32>
    %cst_28 = arith.constant 0.000000e+00 : f32
    %85 = vector.broadcast %cst_28 : f32 to vector<64x128xf32>
    %86 = vector.shape_cast %84 : vector<64x1xi1> to vector<64x1xi1>
    %87 = vector.broadcast %86 : vector<64x1xi1> to vector<64x128xi1>
    %88 = arith.select %87, %85, %82 : vector<64x128xi1>, vector<64x128xf32>
    %c0_29 = arith.constant 0 : index
    %c256 = arith.constant 256 : index
    %89 = vector.load %arg3[%c0_29, %c256] : memref<64x384xf32, #tpu.memory_space<vmem>>, vector<64x128xf32>
    tpu.vector_store %arg3[%c0_29, %c256], %88 {strides = array<i32>} : memref<64x384xf32, #tpu.memory_space<vmem>>, vector<64x128xf32>,
    return
  }
  func.func @transform_0(%arg0: i32) -> (i32, i32) {
    %c0_i32 = arith.constant 0 : i32
    %c0_i32_0 = arith.constant 0 : i32
    return %arg0, %c0_i32 : i32, i32
  }
  func.func @transform_1(%arg0: i32) -> (i32, i32) {
    %c0_i32 = arith.constant 0 : i32
    %c0_i32_0 = arith.constant 0 : i32
    %c0_i32_1 = arith.constant 0 : i32
    return %c0_i32, %c0_i32_0 : i32, i32
  }
  func.func @transform_2(%arg0: i32) -> (i32, i32) {
    %c0_i32 = arith.constant 0 : i32
    %c0_i32_0 = arith.constant 0 : i32
    return %arg0, %c0_i32 : i32, i32
  }
}

module attributes {stable_mosaic.version = 11 : i64} {
  func.func @_mobius_gru_recurrent_kernel(%arg0: i32, %arg1: memref<8x8x384xf32, #tpu.memory_space<vmem>>, %arg2: memref<8x128xf32, #tpu.memory_space<vmem>>, %arg3: memref<128x384xf32, #tpu.memory_space<vmem>>, %arg4: memref<3x128xf32, #tpu.memory_space<vmem>>, %arg5: memref<8x8x128xf32, #tpu.memory_space<vmem>>, %arg6: memref<8x128xf32, #tpu.memory_space<vmem>>, %arg7: memref<8x128xf32, #tpu.memory_space<vmem>>) attributes {dimension_semantics = [#tpu.dimension_semantics<arbitrary>], iteration_bounds = array<i64: 1>, scalar_prefetch = 0 : i64, scratch_operands = 1 : i64, tpu.core_type = #tpu.core_type<tc>, window_params = [{transform_indices = @transform_0, window_bounds = array<i64: 8, 8, 384>}, {pipeline_mode = #tpu.pipeline_mode<synchronous>, transform_indices = @transform_1, window_bounds = array<i64: 8, 128>}, {pipeline_mode = #tpu.pipeline_mode<synchronous>, transform_indices = @transform_2, window_bounds = array<i64: 128, 384>}, {pipeline_mode = #tpu.pipeline_mode<synchronous>, transform_indices = @transform_3, window_bounds = array<i64: 3, 128>}, {transform_indices = @transform_4, window_bounds = array<i64: 8, 8, 128>}, {pipeline_mode = #tpu.pipeline_mode<synchronous>, transform_indices = @transform_5, window_bounds = array<i64: 8, 128>}]} {
    %c0_i32 = arith.constant 0 : i32
    %0 = arith.cmpi eq, %arg0, %c0_i32 : i32
    %1 = arith.extui %0 : i1 to i32
    %c0_i32_0 = arith.constant 0 : i32
    %2 = arith.cmpi ne, %1, %c0_i32_0 : i32
    scf.if %2 {
      %c0_10 = arith.constant 0 : index
      %c0_11 = arith.constant 0 : index
      %19 = vector.load %arg2[%c0_10, %c0_11] : memref<8x128xf32, #tpu.memory_space<vmem>>, vector<8x128xf32>
      %c0_12 = arith.constant 0 : index
      %c0_13 = arith.constant 0 : index
      %20 = vector.load %arg7[%c0_12, %c0_13] : memref<8x128xf32, #tpu.memory_space<vmem>>, vector<8x128xf32>
      tpu.vector_store %arg7[%c0_12, %c0_13], %19 {strides = array<i32>} : memref<8x128xf32, #tpu.memory_space<vmem>>, vector<8x128xf32>,
    } else {
    }
    %c0 = arith.constant 0 : index
    %c0_1 = arith.constant 0 : index
    %3 = vector.load %arg4[%c0, %c0_1] : memref<3x128xf32, #tpu.memory_space<vmem>>, vector<3x128xf32>
    %4 = vector.extract_strided_slice %3 {offsets = [0, 0], sizes = [1, 128], strides = [1, 1]} : vector<3x128xf32> to vector<1x128xf32>
    %5 = vector.extract_strided_slice %3 {offsets = [1, 0], sizes = [1, 128], strides = [1, 1]} : vector<3x128xf32> to vector<1x128xf32>
    %6 = vector.extract_strided_slice %3 {offsets = [2, 0], sizes = [1, 128], strides = [1, 1]} : vector<3x128xf32> to vector<1x128xf32>
    %7 = arith.mulf %4, %4 : vector<1x128xf32>
    %cst = arith.constant dense<0.000000e+00> : vector<1xf32>
    %8 = vector.multi_reduction <add>, %7, %cst [1] : vector<1x128xf32> to vector<1xf32>
    %9 = vector.shape_cast %8 : vector<1xf32> to vector<1x1xf32>
    %10 = arith.mulf %5, %5 : vector<1x128xf32>
    %cst_2 = arith.constant dense<0.000000e+00> : vector<1xf32>
    %11 = vector.multi_reduction <add>, %10, %cst_2 [1] : vector<1x128xf32> to vector<1xf32>
    %12 = vector.shape_cast %11 : vector<1xf32> to vector<1x1xf32>
    %13 = arith.mulf %6, %6 : vector<1x128xf32>
    %cst_3 = arith.constant dense<0.000000e+00> : vector<1xf32>
    %14 = vector.multi_reduction <add>, %13, %cst_3 [1] : vector<1x128xf32> to vector<1xf32>
    %15 = vector.shape_cast %14 : vector<1xf32> to vector<1x1xf32>
    %c0_i32_4 = arith.constant 0 : i32
    %c8_i32 = arith.constant 8 : i32
    %16 = arith.addi %c0_i32_4, %c8_i32 : i32
    %c1_i32 = arith.constant 1 : i32
    scf.for %arg8 = %c0_i32_4 to %16 step %c1_i32  : i32 {
      %c0_10 = arith.constant 0 : index
      %c0_11 = arith.constant 0 : index
      %19 = vector.load %arg7[%c0_10, %c0_11] : memref<8x128xf32, #tpu.memory_space<vmem>>, vector<8x128xf32>
      %20 = arith.index_cast %arg8 : i32 to index
      %c0_12 = arith.constant 0 : index
      %c0_13 = arith.constant 0 : index
      %21 = vector.load %arg1[%20, %c0_12, %c0_13] : memref<8x8x384xf32, #tpu.memory_space<vmem>>, vector<1x8x384xf32>
      %22 = vector.shape_cast %21 : vector<1x8x384xf32> to vector<8x384xf32>
      %c0_14 = arith.constant 0 : index
      %c0_15 = arith.constant 0 : index
      %23 = vector.load %arg3[%c0_14, %c0_15] : memref<128x384xf32, #tpu.memory_space<vmem>>, vector<128x256xf32>
      %c0_16 = arith.constant 0 : index
      %c256 = arith.constant 256 : index
      %24 = vector.load %arg3[%c0_16, %c256] : memref<128x384xf32, #tpu.memory_space<vmem>>, vector<128x128xf32>
      %25 = arith.mulf %19, %19 : vector<8x128xf32>
      %cst_17 = arith.constant dense<0.000000e+00> : vector<8xf32>
      %26 = vector.multi_reduction <add>, %25, %cst_17 [1] : vector<8x128xf32> to vector<8xf32>
      %27 = vector.shape_cast %26 : vector<8xf32> to vector<8x1xf32>
      %28 = math.sqrt %27 : vector<8x1xf32>
      %cst_18 = arith.constant 1.000000e-15 : f32
      %29 = vector.broadcast %cst_18 : f32 to vector<8x1xf32>
      %30 = arith.maximumf %28, %29 : vector<8x1xf32>
      %cst_19 = arith.constant 1.000000e+00 : f32
      %31 = vector.broadcast %cst_19 : f32 to vector<8x1xf32>
      %32 = arith.mulf %31, %30 : vector<8x1xf32>
      %cst_20 = arith.constant -0.99999988 : f32
      %cst_21 = arith.constant 0.99999988 : f32
      %33 = vector.broadcast %cst_20 : f32 to vector<8x1xf32>
      %34 = arith.maximumf %33, %32 : vector<8x1xf32>
      %35 = vector.broadcast %cst_21 : f32 to vector<8x1xf32>
      %36 = arith.minimumf %35, %34 : vector<8x1xf32>
      %cst_22 = arith.constant 1.000000e+00 : f32
      %37 = vector.broadcast %cst_22 : f32 to vector<8x1xf32>
      %38 = arith.addf %37, %36 : vector<8x1xf32>
      %cst_23 = arith.constant 1.000000e+00 : f32
      %39 = vector.broadcast %cst_23 : f32 to vector<8x1xf32>
      %40 = arith.subf %39, %36 : vector<8x1xf32>
      %41 = arith.divf %38, %40 : vector<8x1xf32>
      %42 = math.log %41 : vector<8x1xf32>
      %cst_24 = arith.constant 5.000000e-01 : f32
      %43 = vector.broadcast %cst_24 : f32 to vector<8x1xf32>
      %44 = arith.mulf %43, %42 : vector<8x1xf32>
      %45 = arith.divf %44, %30 : vector<8x1xf32>
      %cst_25 = arith.constant dense<0.000000e+00> : vector<8x256xf32>
      %46 = tpu.matmul %19, %23, %cst_25 {dimension_numbers = #tpu.dot_dimension_numbers<[1], [0], [0], [1], [0, 0, 1, 1], [], []>} : vector<8x128xf32>, vector<128x256xf32>, vector<8x256xf32> -> vector<8x256xf32>
      %47 = vector.extract_strided_slice %46 {offsets = [0, 0], sizes = [8, 128], strides = [1, 1]} : vector<8x256xf32> to vector<8x128xf32>
      %48 = arith.mulf %47, %47 : vector<8x128xf32>
      %cst_26 = arith.constant dense<0.000000e+00> : vector<8xf32>
      %49 = vector.multi_reduction <add>, %48, %cst_26 [1] : vector<8x128xf32> to vector<8xf32>
      %50 = vector.shape_cast %49 : vector<8xf32> to vector<8x1xf32>
      %51 = math.sqrt %50 : vector<8x1xf32>
      %cst_27 = arith.constant 1.000000e-15 : f32
      %52 = vector.broadcast %cst_27 : f32 to vector<8x1xf32>
      %53 = arith.maximumf %51, %52 : vector<8x1xf32>
      %54 = arith.mulf %53, %45 : vector<8x1xf32>
      %55 = math.tanh %54 : vector<8x1xf32>
      %56 = vector.broadcast %55 : vector<8x1xf32> to vector<8x128xf32>
      %57 = arith.mulf %56, %47 : vector<8x128xf32>
      %cst_28 = arith.constant 1.000000e+00 : f32
      %58 = vector.broadcast %cst_28 : f32 to vector<8x1xf32>
      %59 = arith.mulf %53, %58 : vector<8x1xf32>
      %60 = vector.broadcast %59 : vector<8x1xf32> to vector<8x128xf32>
      %61 = arith.divf %57, %60 : vector<8x128xf32>
      %cst_29 = arith.constant 0.000000e+00 : f32
      %62 = vector.broadcast %cst_29 : f32 to vector<8x1xf32>
      %63 = arith.cmpf oeq, %50, %62 : vector<8x1xf32>
      %cst_30 = arith.constant 0.000000e+00 : f32
      %64 = vector.broadcast %cst_30 : f32 to vector<8x128xf32>
      %65 = vector.shape_cast %63 : vector<8x1xi1> to vector<8x1xi1>
      %66 = vector.broadcast %65 : vector<8x1xi1> to vector<8x128xi1>
      %67 = arith.select %66, %64, %61 : vector<8x128xi1>, vector<8x128xf32>
      %68 = vector.extract_strided_slice %46 {offsets = [0, 128], sizes = [8, 128], strides = [1, 1]} : vector<8x256xf32> to vector<8x128xf32>
      %69 = arith.mulf %68, %68 : vector<8x128xf32>
      %cst_31 = arith.constant dense<0.000000e+00> : vector<8xf32>
      %70 = vector.multi_reduction <add>, %69, %cst_31 [1] : vector<8x128xf32> to vector<8xf32>
      %71 = vector.shape_cast %70 : vector<8xf32> to vector<8x1xf32>
      %72 = math.sqrt %71 : vector<8x1xf32>
      %cst_32 = arith.constant 1.000000e-15 : f32
      %73 = vector.broadcast %cst_32 : f32 to vector<8x1xf32>
      %74 = arith.maximumf %72, %73 : vector<8x1xf32>
      %75 = arith.mulf %74, %45 : vector<8x1xf32>
      %76 = math.tanh %75 : vector<8x1xf32>
      %77 = vector.broadcast %76 : vector<8x1xf32> to vector<8x128xf32>
      %78 = arith.mulf %77, %68 : vector<8x128xf32>
      %cst_33 = arith.constant 1.000000e+00 : f32
      %79 = vector.broadcast %cst_33 : f32 to vector<8x1xf32>
      %80 = arith.mulf %74, %79 : vector<8x1xf32>
      %81 = vector.broadcast %80 : vector<8x1xf32> to vector<8x128xf32>
      %82 = arith.divf %78, %81 : vector<8x128xf32>
      %cst_34 = arith.constant 0.000000e+00 : f32
      %83 = vector.broadcast %cst_34 : f32 to vector<8x1xf32>
      %84 = arith.cmpf oeq, %71, %83 : vector<8x1xf32>
      %cst_35 = arith.constant 0.000000e+00 : f32
      %85 = vector.broadcast %cst_35 : f32 to vector<8x128xf32>
      %86 = vector.shape_cast %84 : vector<8x1xi1> to vector<8x1xi1>
      %87 = vector.broadcast %86 : vector<8x1xi1> to vector<8x128xi1>
      %88 = arith.select %87, %85, %82 : vector<8x128xi1>, vector<8x128xf32>
      %89 = vector.extract_strided_slice %22 {offsets = [0, 0], sizes = [8, 128], strides = [1, 1]} : vector<8x384xf32> to vector<8x128xf32>
      %90 = vector.extract_strided_slice %22 {offsets = [0, 128], sizes = [8, 128], strides = [1, 1]} : vector<8x384xf32> to vector<8x128xf32>
      %91 = vector.extract_strided_slice %22 {offsets = [0, 256], sizes = [8, 128], strides = [1, 1]} : vector<8x384xf32> to vector<8x128xf32>
      %92 = arith.mulf %67, %67 : vector<8x128xf32>
      %cst_36 = arith.constant dense<0.000000e+00> : vector<8xf32>
      %93 = vector.multi_reduction <add>, %92, %cst_36 [1] : vector<8x128xf32> to vector<8xf32>
      %94 = vector.shape_cast %93 : vector<8xf32> to vector<8x1xf32>
      %95 = arith.mulf %89, %89 : vector<8x128xf32>
      %cst_37 = arith.constant dense<0.000000e+00> : vector<8xf32>
      %96 = vector.multi_reduction <add>, %95, %cst_37 [1] : vector<8x128xf32> to vector<8xf32>
      %97 = vector.shape_cast %96 : vector<8xf32> to vector<8x1xf32>
      %98 = arith.mulf %67, %89 : vector<8x128xf32>
      %cst_38 = arith.constant dense<0.000000e+00> : vector<8xf32>
      %99 = vector.multi_reduction <add>, %98, %cst_38 [1] : vector<8x128xf32> to vector<8xf32>
      %100 = vector.shape_cast %99 : vector<8xf32> to vector<8x1xf32>
      %cst_39 = arith.constant 2.000000e+00 : f32
      %101 = vector.broadcast %cst_39 : f32 to vector<8x1xf32>
      %102 = arith.mulf %101, %100 : vector<8x1xf32>
      %cst_40 = arith.constant 1.000000e+00 : f32
      %103 = vector.broadcast %cst_40 : f32 to vector<8x1xf32>
      %104 = arith.addf %103, %102 : vector<8x1xf32>
      %cst_41 = arith.constant 1.000000e+00 : f32
      %105 = vector.broadcast %cst_41 : f32 to vector<8x1xf32>
      %106 = arith.mulf %105, %97 : vector<8x1xf32>
      %107 = arith.addf %104, %106 : vector<8x1xf32>
      %108 = vector.broadcast %107 : vector<8x1xf32> to vector<8x128xf32>
      %109 = arith.mulf %108, %67 : vector<8x128xf32>
      %cst_42 = arith.constant 1.000000e+00 : f32
      %110 = vector.broadcast %cst_42 : f32 to vector<8x1xf32>
      %111 = arith.mulf %110, %94 : vector<8x1xf32>
      %cst_43 = arith.constant 1.000000e+00 : f32
      %112 = vector.broadcast %cst_43 : f32 to vector<8x1xf32>
      %113 = arith.subf %112, %111 : vector<8x1xf32>
      %114 = vector.broadcast %113 : vector<8x1xf32> to vector<8x128xf32>
      %115 = arith.mulf %114, %89 : vector<8x128xf32>
      %116 = arith.addf %109, %115 : vector<8x128xf32>
      %cst_44 = arith.constant 2.000000e+00 : f32
      %117 = vector.broadcast %cst_44 : f32 to vector<8x1xf32>
      %118 = arith.mulf %117, %100 : vector<8x1xf32>
      %cst_45 = arith.constant 1.000000e+00 : f32
      %119 = vector.broadcast %cst_45 : f32 to vector<8x1xf32>
      %120 = arith.addf %119, %118 : vector<8x1xf32>
      %cst_46 = arith.constant 1.000000e+00 : f32
      %121 = vector.broadcast %cst_46 : f32 to vector<8x1xf32>
      %122 = arith.mulf %121, %94 : vector<8x1xf32>
      %123 = arith.mulf %122, %97 : vector<8x1xf32>
      %124 = arith.addf %120, %123 : vector<8x1xf32>
      %cst_47 = arith.constant 1.000000e-15 : f32
      %125 = vector.broadcast %cst_47 : f32 to vector<8x1xf32>
      %126 = arith.maximumf %124, %125 : vector<8x1xf32>
      %127 = vector.broadcast %126 : vector<8x1xf32> to vector<8x128xf32>
      %128 = arith.divf %116, %127 : vector<8x128xf32>
      %129 = arith.mulf %128, %128 : vector<8x128xf32>
      %cst_48 = arith.constant dense<0.000000e+00> : vector<8xf32>
      %130 = vector.multi_reduction <add>, %129, %cst_48 [1] : vector<8x128xf32> to vector<8xf32>
      %131 = vector.shape_cast %130 : vector<8xf32> to vector<8x1xf32>
      %132 = vector.broadcast %4 : vector<1x128xf32> to vector<8x128xf32>
      %133 = arith.mulf %128, %132 : vector<8x128xf32>
      %cst_49 = arith.constant dense<0.000000e+00> : vector<8xf32>
      %134 = vector.multi_reduction <add>, %133, %cst_49 [1] : vector<8x128xf32> to vector<8xf32>
      %135 = vector.shape_cast %134 : vector<8xf32> to vector<8x1xf32>
      %cst_50 = arith.constant 2.000000e+00 : f32
      %136 = vector.broadcast %cst_50 : f32 to vector<8x1xf32>
      %137 = arith.mulf %136, %135 : vector<8x1xf32>
      %cst_51 = arith.constant 1.000000e+00 : f32
      %138 = vector.broadcast %cst_51 : f32 to vector<8x1xf32>
      %139 = arith.addf %138, %137 : vector<8x1xf32>
      %cst_52 = arith.constant 1.000000e+00 : f32
      %140 = vector.broadcast %cst_52 : f32 to vector<1x1xf32>
      %141 = arith.mulf %140, %9 : vector<1x1xf32>
      %142 = vector.broadcast %141 : vector<1x1xf32> to vector<8x1xf32>
      %143 = arith.addf %139, %142 : vector<8x1xf32>
      %144 = vector.broadcast %143 : vector<8x1xf32> to vector<8x128xf32>
      %145 = arith.mulf %144, %128 : vector<8x128xf32>
      %cst_53 = arith.constant 1.000000e+00 : f32
      %146 = vector.broadcast %cst_53 : f32 to vector<8x1xf32>
      %147 = arith.mulf %146, %131 : vector<8x1xf32>
      %cst_54 = arith.constant 1.000000e+00 : f32
      %148 = vector.broadcast %cst_54 : f32 to vector<8x1xf32>
      %149 = arith.subf %148, %147 : vector<8x1xf32>
      %150 = vector.broadcast %149 : vector<8x1xf32> to vector<8x128xf32>
      %151 = vector.broadcast %4 : vector<1x128xf32> to vector<8x128xf32>
      %152 = arith.mulf %150, %151 : vector<8x128xf32>
      %153 = arith.addf %145, %152 : vector<8x128xf32>
      %cst_55 = arith.constant 2.000000e+00 : f32
      %154 = vector.broadcast %cst_55 : f32 to vector<8x1xf32>
      %155 = arith.mulf %154, %135 : vector<8x1xf32>
      %cst_56 = arith.constant 1.000000e+00 : f32
      %156 = vector.broadcast %cst_56 : f32 to vector<8x1xf32>
      %157 = arith.addf %156, %155 : vector<8x1xf32>
      %cst_57 = arith.constant 1.000000e+00 : f32
      %158 = vector.broadcast %cst_57 : f32 to vector<8x1xf32>
      %159 = arith.mulf %158, %131 : vector<8x1xf32>
      %160 = vector.broadcast %9 : vector<1x1xf32> to vector<8x1xf32>
      %161 = arith.mulf %159, %160 : vector<8x1xf32>
      %162 = arith.addf %157, %161 : vector<8x1xf32>
      %cst_58 = arith.constant 1.000000e-15 : f32
      %163 = vector.broadcast %cst_58 : f32 to vector<8x1xf32>
      %164 = arith.maximumf %162, %163 : vector<8x1xf32>
      %165 = vector.broadcast %164 : vector<8x1xf32> to vector<8x128xf32>
      %166 = arith.divf %153, %165 : vector<8x128xf32>
      %167 = arith.mulf %88, %88 : vector<8x128xf32>
      %cst_59 = arith.constant dense<0.000000e+00> : vector<8xf32>
      %168 = vector.multi_reduction <add>, %167, %cst_59 [1] : vector<8x128xf32> to vector<8xf32>
      %169 = vector.shape_cast %168 : vector<8xf32> to vector<8x1xf32>
      %170 = arith.mulf %90, %90 : vector<8x128xf32>
      %cst_60 = arith.constant dense<0.000000e+00> : vector<8xf32>
      %171 = vector.multi_reduction <add>, %170, %cst_60 [1] : vector<8x128xf32> to vector<8xf32>
      %172 = vector.shape_cast %171 : vector<8xf32> to vector<8x1xf32>
      %173 = arith.mulf %88, %90 : vector<8x128xf32>
      %cst_61 = arith.constant dense<0.000000e+00> : vector<8xf32>
      %174 = vector.multi_reduction <add>, %173, %cst_61 [1] : vector<8x128xf32> to vector<8xf32>
      %175 = vector.shape_cast %174 : vector<8xf32> to vector<8x1xf32>
      %cst_62 = arith.constant 2.000000e+00 : f32
      %176 = vector.broadcast %cst_62 : f32 to vector<8x1xf32>
      %177 = arith.mulf %176, %175 : vector<8x1xf32>
      %cst_63 = arith.constant 1.000000e+00 : f32
      %178 = vector.broadcast %cst_63 : f32 to vector<8x1xf32>
      %179 = arith.addf %178, %177 : vector<8x1xf32>
      %cst_64 = arith.constant 1.000000e+00 : f32
      %180 = vector.broadcast %cst_64 : f32 to vector<8x1xf32>
      %181 = arith.mulf %180, %172 : vector<8x1xf32>
      %182 = arith.addf %179, %181 : vector<8x1xf32>
      %183 = vector.broadcast %182 : vector<8x1xf32> to vector<8x128xf32>
      %184 = arith.mulf %183, %88 : vector<8x128xf32>
      %cst_65 = arith.constant 1.000000e+00 : f32
      %185 = vector.broadcast %cst_65 : f32 to vector<8x1xf32>
      %186 = arith.mulf %185, %169 : vector<8x1xf32>
      %cst_66 = arith.constant 1.000000e+00 : f32
      %187 = vector.broadcast %cst_66 : f32 to vector<8x1xf32>
      %188 = arith.subf %187, %186 : vector<8x1xf32>
      %189 = vector.broadcast %188 : vector<8x1xf32> to vector<8x128xf32>
      %190 = arith.mulf %189, %90 : vector<8x128xf32>
      %191 = arith.addf %184, %190 : vector<8x128xf32>
      %cst_67 = arith.constant 2.000000e+00 : f32
      %192 = vector.broadcast %cst_67 : f32 to vector<8x1xf32>
      %193 = arith.mulf %192, %175 : vector<8x1xf32>
      %cst_68 = arith.constant 1.000000e+00 : f32
      %194 = vector.broadcast %cst_68 : f32 to vector<8x1xf32>
      %195 = arith.addf %194, %193 : vector<8x1xf32>
      %cst_69 = arith.constant 1.000000e+00 : f32
      %196 = vector.broadcast %cst_69 : f32 to vector<8x1xf32>
      %197 = arith.mulf %196, %169 : vector<8x1xf32>
      %198 = arith.mulf %197, %172 : vector<8x1xf32>
      %199 = arith.addf %195, %198 : vector<8x1xf32>
      %cst_70 = arith.constant 1.000000e-15 : f32
      %200 = vector.broadcast %cst_70 : f32 to vector<8x1xf32>
      %201 = arith.maximumf %199, %200 : vector<8x1xf32>
      %202 = vector.broadcast %201 : vector<8x1xf32> to vector<8x128xf32>
      %203 = arith.divf %191, %202 : vector<8x128xf32>
      %204 = arith.mulf %203, %203 : vector<8x128xf32>
      %cst_71 = arith.constant dense<0.000000e+00> : vector<8xf32>
      %205 = vector.multi_reduction <add>, %204, %cst_71 [1] : vector<8x128xf32> to vector<8xf32>
      %206 = vector.shape_cast %205 : vector<8xf32> to vector<8x1xf32>
      %207 = vector.broadcast %5 : vector<1x128xf32> to vector<8x128xf32>
      %208 = arith.mulf %203, %207 : vector<8x128xf32>
      %cst_72 = arith.constant dense<0.000000e+00> : vector<8xf32>
      %209 = vector.multi_reduction <add>, %208, %cst_72 [1] : vector<8x128xf32> to vector<8xf32>
      %210 = vector.shape_cast %209 : vector<8xf32> to vector<8x1xf32>
      %cst_73 = arith.constant 2.000000e+00 : f32
      %211 = vector.broadcast %cst_73 : f32 to vector<8x1xf32>
      %212 = arith.mulf %211, %210 : vector<8x1xf32>
      %cst_74 = arith.constant 1.000000e+00 : f32
      %213 = vector.broadcast %cst_74 : f32 to vector<8x1xf32>
      %214 = arith.addf %213, %212 : vector<8x1xf32>
      %cst_75 = arith.constant 1.000000e+00 : f32
      %215 = vector.broadcast %cst_75 : f32 to vector<1x1xf32>
      %216 = arith.mulf %215, %12 : vector<1x1xf32>
      %217 = vector.broadcast %216 : vector<1x1xf32> to vector<8x1xf32>
      %218 = arith.addf %214, %217 : vector<8x1xf32>
      %219 = vector.broadcast %218 : vector<8x1xf32> to vector<8x128xf32>
      %220 = arith.mulf %219, %203 : vector<8x128xf32>
      %cst_76 = arith.constant 1.000000e+00 : f32
      %221 = vector.broadcast %cst_76 : f32 to vector<8x1xf32>
      %222 = arith.mulf %221, %206 : vector<8x1xf32>
      %cst_77 = arith.constant 1.000000e+00 : f32
      %223 = vector.broadcast %cst_77 : f32 to vector<8x1xf32>
      %224 = arith.subf %223, %222 : vector<8x1xf32>
      %225 = vector.broadcast %224 : vector<8x1xf32> to vector<8x128xf32>
      %226 = vector.broadcast %5 : vector<1x128xf32> to vector<8x128xf32>
      %227 = arith.mulf %225, %226 : vector<8x128xf32>
      %228 = arith.addf %220, %227 : vector<8x128xf32>
      %cst_78 = arith.constant 2.000000e+00 : f32
      %229 = vector.broadcast %cst_78 : f32 to vector<8x1xf32>
      %230 = arith.mulf %229, %210 : vector<8x1xf32>
      %cst_79 = arith.constant 1.000000e+00 : f32
      %231 = vector.broadcast %cst_79 : f32 to vector<8x1xf32>
      %232 = arith.addf %231, %230 : vector<8x1xf32>
      %cst_80 = arith.constant 1.000000e+00 : f32
      %233 = vector.broadcast %cst_80 : f32 to vector<8x1xf32>
      %234 = arith.mulf %233, %206 : vector<8x1xf32>
      %235 = vector.broadcast %12 : vector<1x1xf32> to vector<8x1xf32>
      %236 = arith.mulf %234, %235 : vector<8x1xf32>
      %237 = arith.addf %232, %236 : vector<8x1xf32>
      %cst_81 = arith.constant 1.000000e-15 : f32
      %238 = vector.broadcast %cst_81 : f32 to vector<8x1xf32>
      %239 = arith.maximumf %237, %238 : vector<8x1xf32>
      %240 = vector.broadcast %239 : vector<8x1xf32> to vector<8x128xf32>
      %241 = arith.divf %228, %240 : vector<8x128xf32>
      %242 = arith.mulf %166, %166 : vector<8x128xf32>
      %cst_82 = arith.constant dense<0.000000e+00> : vector<8xf32>
      %243 = vector.multi_reduction <add>, %242, %cst_82 [1] : vector<8x128xf32> to vector<8xf32>
      %244 = vector.shape_cast %243 : vector<8xf32> to vector<8x1xf32>
      %245 = math.sqrt %244 : vector<8x1xf32>
      %cst_83 = arith.constant 1.000000e-15 : f32
      %246 = vector.broadcast %cst_83 : f32 to vector<8x1xf32>
      %247 = arith.maximumf %245, %246 : vector<8x1xf32>
      %248 = vector.broadcast %247 : vector<8x1xf32> to vector<8x128xf32>
      %249 = arith.divf %166, %248 : vector<8x128xf32>
      %cst_84 = arith.constant 1.000000e+00 : f32
      %250 = vector.broadcast %cst_84 : f32 to vector<8x128xf32>
      %251 = arith.divf %249, %250 : vector<8x128xf32>
      %cst_85 = arith.constant 1.000000e+00 : f32
      %252 = vector.broadcast %cst_85 : f32 to vector<8x1xf32>
      %253 = arith.mulf %252, %247 : vector<8x1xf32>
      %cst_86 = arith.constant -0.99999988 : f32
      %cst_87 = arith.constant 0.99999988 : f32
      %254 = vector.broadcast %cst_86 : f32 to vector<8x1xf32>
      %255 = arith.maximumf %254, %253 : vector<8x1xf32>
      %256 = vector.broadcast %cst_87 : f32 to vector<8x1xf32>
      %257 = arith.minimumf %256, %255 : vector<8x1xf32>
      %cst_88 = arith.constant 1.000000e+00 : f32
      %258 = vector.broadcast %cst_88 : f32 to vector<8x1xf32>
      %259 = arith.addf %258, %257 : vector<8x1xf32>
      %cst_89 = arith.constant 1.000000e+00 : f32
      %260 = vector.broadcast %cst_89 : f32 to vector<8x1xf32>
      %261 = arith.subf %260, %257 : vector<8x1xf32>
      %262 = arith.divf %259, %261 : vector<8x1xf32>
      %263 = math.log %262 : vector<8x1xf32>
      %cst_90 = arith.constant 5.000000e-01 : f32
      %264 = vector.broadcast %cst_90 : f32 to vector<8x1xf32>
      %265 = arith.mulf %264, %263 : vector<8x1xf32>
      %266 = vector.broadcast %265 : vector<8x1xf32> to vector<8x128xf32>
      %267 = arith.mulf %251, %266 : vector<8x128xf32>
      %268 = arith.negf %267 : vector<8x128xf32>
      %269 = math.exp %268 : vector<8x128xf32>
      %cst_91 = arith.constant 1.000000e+00 : f32
      %270 = vector.broadcast %cst_91 : f32 to vector<8x128xf32>
      %271 = arith.addf %270, %269 : vector<8x128xf32>
      %272 = arith.divf %270, %271 : vector<8x128xf32>
      %273 = arith.mulf %241, %241 : vector<8x128xf32>
      %cst_92 = arith.constant dense<0.000000e+00> : vector<8xf32>
      %274 = vector.multi_reduction <add>, %273, %cst_92 [1] : vector<8x128xf32> to vector<8xf32>
      %275 = vector.shape_cast %274 : vector<8xf32> to vector<8x1xf32>
      %276 = math.sqrt %275 : vector<8x1xf32>
      %cst_93 = arith.constant 1.000000e-15 : f32
      %277 = vector.broadcast %cst_93 : f32 to vector<8x1xf32>
      %278 = arith.maximumf %276, %277 : vector<8x1xf32>
      %279 = vector.broadcast %278 : vector<8x1xf32> to vector<8x128xf32>
      %280 = arith.divf %241, %279 : vector<8x128xf32>
      %cst_94 = arith.constant 1.000000e+00 : f32
      %281 = vector.broadcast %cst_94 : f32 to vector<8x128xf32>
      %282 = arith.divf %280, %281 : vector<8x128xf32>
      %cst_95 = arith.constant 1.000000e+00 : f32
      %283 = vector.broadcast %cst_95 : f32 to vector<8x1xf32>
      %284 = arith.mulf %283, %278 : vector<8x1xf32>
      %cst_96 = arith.constant -0.99999988 : f32
      %cst_97 = arith.constant 0.99999988 : f32
      %285 = vector.broadcast %cst_96 : f32 to vector<8x1xf32>
      %286 = arith.maximumf %285, %284 : vector<8x1xf32>
      %287 = vector.broadcast %cst_97 : f32 to vector<8x1xf32>
      %288 = arith.minimumf %287, %286 : vector<8x1xf32>
      %cst_98 = arith.constant 1.000000e+00 : f32
      %289 = vector.broadcast %cst_98 : f32 to vector<8x1xf32>
      %290 = arith.addf %289, %288 : vector<8x1xf32>
      %cst_99 = arith.constant 1.000000e+00 : f32
      %291 = vector.broadcast %cst_99 : f32 to vector<8x1xf32>
      %292 = arith.subf %291, %288 : vector<8x1xf32>
      %293 = arith.divf %290, %292 : vector<8x1xf32>
      %294 = math.log %293 : vector<8x1xf32>
      %cst_100 = arith.constant 5.000000e-01 : f32
      %295 = vector.broadcast %cst_100 : f32 to vector<8x1xf32>
      %296 = arith.mulf %295, %294 : vector<8x1xf32>
      %297 = vector.broadcast %296 : vector<8x1xf32> to vector<8x128xf32>
      %298 = arith.mulf %282, %297 : vector<8x128xf32>
      %299 = arith.negf %298 : vector<8x128xf32>
      %300 = math.exp %299 : vector<8x128xf32>
      %cst_101 = arith.constant 1.000000e+00 : f32
      %301 = vector.broadcast %cst_101 : f32 to vector<8x128xf32>
      %302 = arith.addf %301, %300 : vector<8x128xf32>
      %303 = arith.divf %301, %302 : vector<8x128xf32>
      %304 = arith.mulf %272, %19 : vector<8x128xf32>
      %305 = arith.mulf %304, %304 : vector<8x128xf32>
      %cst_102 = arith.constant dense<0.000000e+00> : vector<8xf32>
      %306 = vector.multi_reduction <add>, %305, %cst_102 [1] : vector<8x128xf32> to vector<8xf32>
      %307 = vector.shape_cast %306 : vector<8xf32> to vector<8x1xf32>
      %308 = math.sqrt %307 : vector<8x1xf32>
      %cst_103 = arith.constant 1.000000e-15 : f32
      %309 = vector.broadcast %cst_103 : f32 to vector<8x1xf32>
      %310 = arith.maximumf %308, %309 : vector<8x1xf32>
      %311 = arith.mulf %310, %45 : vector<8x1xf32>
      %312 = math.tanh %311 : vector<8x1xf32>
      %313 = vector.broadcast %312 : vector<8x1xf32> to vector<8x128xf32>
      %314 = arith.mulf %313, %304 : vector<8x128xf32>
      %cst_104 = arith.constant 1.000000e+00 : f32
      %315 = vector.broadcast %cst_104 : f32 to vector<8x1xf32>
      %316 = arith.mulf %310, %315 : vector<8x1xf32>
      %317 = vector.broadcast %316 : vector<8x1xf32> to vector<8x128xf32>
      %318 = arith.divf %314, %317 : vector<8x128xf32>
      %cst_105 = arith.constant 0.000000e+00 : f32
      %319 = vector.broadcast %cst_105 : f32 to vector<8x1xf32>
      %320 = arith.cmpf oeq, %307, %319 : vector<8x1xf32>
      %cst_106 = arith.constant 0.000000e+00 : f32
      %321 = vector.broadcast %cst_106 : f32 to vector<8x128xf32>
      %322 = vector.shape_cast %320 : vector<8x1xi1> to vector<8x1xi1>
      %323 = vector.broadcast %322 : vector<8x1xi1> to vector<8x128xi1>
      %324 = arith.select %323, %321, %318 : vector<8x128xi1>, vector<8x128xf32>
      %325 = arith.mulf %324, %324 : vector<8x128xf32>
      %cst_107 = arith.constant dense<0.000000e+00> : vector<8xf32>
      %326 = vector.multi_reduction <add>, %325, %cst_107 [1] : vector<8x128xf32> to vector<8xf32>
      %327 = vector.shape_cast %326 : vector<8xf32> to vector<8x1xf32>
      %328 = math.sqrt %327 : vector<8x1xf32>
      %cst_108 = arith.constant 1.000000e-15 : f32
      %329 = vector.broadcast %cst_108 : f32 to vector<8x1xf32>
      %330 = arith.maximumf %328, %329 : vector<8x1xf32>
      %cst_109 = arith.constant 1.000000e+00 : f32
      %331 = vector.broadcast %cst_109 : f32 to vector<8x1xf32>
      %332 = arith.mulf %331, %330 : vector<8x1xf32>
      %cst_110 = arith.constant -0.99999988 : f32
      %cst_111 = arith.constant 0.99999988 : f32
      %333 = vector.broadcast %cst_110 : f32 to vector<8x1xf32>
      %334 = arith.maximumf %333, %332 : vector<8x1xf32>
      %335 = vector.broadcast %cst_111 : f32 to vector<8x1xf32>
      %336 = arith.minimumf %335, %334 : vector<8x1xf32>
      %cst_112 = arith.constant 1.000000e+00 : f32
      %337 = vector.broadcast %cst_112 : f32 to vector<8x1xf32>
      %338 = arith.addf %337, %336 : vector<8x1xf32>
      %cst_113 = arith.constant 1.000000e+00 : f32
      %339 = vector.broadcast %cst_113 : f32 to vector<8x1xf32>
      %340 = arith.subf %339, %336 : vector<8x1xf32>
      %341 = arith.divf %338, %340 : vector<8x1xf32>
      %342 = math.log %341 : vector<8x1xf32>
      %cst_114 = arith.constant 5.000000e-01 : f32
      %343 = vector.broadcast %cst_114 : f32 to vector<8x1xf32>
      %344 = arith.mulf %343, %342 : vector<8x1xf32>
      %345 = arith.divf %344, %330 : vector<8x1xf32>
      %cst_115 = arith.constant dense<0.000000e+00> : vector<8x128xf32>
      %346 = tpu.matmul %324, %24, %cst_115 {dimension_numbers = #tpu.dot_dimension_numbers<[1], [0], [0], [1], [0, 0, 1, 1], [], []>} : vector<8x128xf32>, vector<128x128xf32>, vector<8x128xf32> -> vector<8x128xf32>
      %347 = arith.mulf %346, %346 : vector<8x128xf32>
      %cst_116 = arith.constant dense<0.000000e+00> : vector<8xf32>
      %348 = vector.multi_reduction <add>, %347, %cst_116 [1] : vector<8x128xf32> to vector<8xf32>
      %349 = vector.shape_cast %348 : vector<8xf32> to vector<8x1xf32>
      %350 = math.sqrt %349 : vector<8x1xf32>
      %cst_117 = arith.constant 1.000000e-15 : f32
      %351 = vector.broadcast %cst_117 : f32 to vector<8x1xf32>
      %352 = arith.maximumf %350, %351 : vector<8x1xf32>
      %353 = arith.mulf %352, %345 : vector<8x1xf32>
      %354 = math.tanh %353 : vector<8x1xf32>
      %355 = vector.broadcast %354 : vector<8x1xf32> to vector<8x128xf32>
      %356 = arith.mulf %355, %346 : vector<8x128xf32>
      %cst_118 = arith.constant 1.000000e+00 : f32
      %357 = vector.broadcast %cst_118 : f32 to vector<8x1xf32>
      %358 = arith.mulf %352, %357 : vector<8x1xf32>
      %359 = vector.broadcast %358 : vector<8x1xf32> to vector<8x128xf32>
      %360 = arith.divf %356, %359 : vector<8x128xf32>
      %cst_119 = arith.constant 0.000000e+00 : f32
      %361 = vector.broadcast %cst_119 : f32 to vector<8x1xf32>
      %362 = arith.cmpf oeq, %349, %361 : vector<8x1xf32>
      %cst_120 = arith.constant 0.000000e+00 : f32
      %363 = vector.broadcast %cst_120 : f32 to vector<8x128xf32>
      %364 = vector.shape_cast %362 : vector<8x1xi1> to vector<8x1xi1>
      %365 = vector.broadcast %364 : vector<8x1xi1> to vector<8x128xi1>
      %366 = arith.select %365, %363, %360 : vector<8x128xi1>, vector<8x128xf32>
      %367 = arith.mulf %366, %366 : vector<8x128xf32>
      %cst_121 = arith.constant dense<0.000000e+00> : vector<8xf32>
      %368 = vector.multi_reduction <add>, %367, %cst_121 [1] : vector<8x128xf32> to vector<8xf32>
      %369 = vector.shape_cast %368 : vector<8xf32> to vector<8x1xf32>
      %370 = arith.mulf %91, %91 : vector<8x128xf32>
      %cst_122 = arith.constant dense<0.000000e+00> : vector<8xf32>
      %371 = vector.multi_reduction <add>, %370, %cst_122 [1] : vector<8x128xf32> to vector<8xf32>
      %372 = vector.shape_cast %371 : vector<8xf32> to vector<8x1xf32>
      %373 = arith.mulf %366, %91 : vector<8x128xf32>
      %cst_123 = arith.constant dense<0.000000e+00> : vector<8xf32>
      %374 = vector.multi_reduction <add>, %373, %cst_123 [1] : vector<8x128xf32> to vector<8xf32>
      %375 = vector.shape_cast %374 : vector<8xf32> to vector<8x1xf32>
      %cst_124 = arith.constant 2.000000e+00 : f32
      %376 = vector.broadcast %cst_124 : f32 to vector<8x1xf32>
      %377 = arith.mulf %376, %375 : vector<8x1xf32>
      %cst_125 = arith.constant 1.000000e+00 : f32
      %378 = vector.broadcast %cst_125 : f32 to vector<8x1xf32>
      %379 = arith.addf %378, %377 : vector<8x1xf32>
      %cst_126 = arith.constant 1.000000e+00 : f32
      %380 = vector.broadcast %cst_126 : f32 to vector<8x1xf32>
      %381 = arith.mulf %380, %372 : vector<8x1xf32>
      %382 = arith.addf %379, %381 : vector<8x1xf32>
      %383 = vector.broadcast %382 : vector<8x1xf32> to vector<8x128xf32>
      %384 = arith.mulf %383, %366 : vector<8x128xf32>
      %cst_127 = arith.constant 1.000000e+00 : f32
      %385 = vector.broadcast %cst_127 : f32 to vector<8x1xf32>
      %386 = arith.mulf %385, %369 : vector<8x1xf32>
      %cst_128 = arith.constant 1.000000e+00 : f32
      %387 = vector.broadcast %cst_128 : f32 to vector<8x1xf32>
      %388 = arith.subf %387, %386 : vector<8x1xf32>
      %389 = vector.broadcast %388 : vector<8x1xf32> to vector<8x128xf32>
      %390 = arith.mulf %389, %91 : vector<8x128xf32>
      %391 = arith.addf %384, %390 : vector<8x128xf32>
      %cst_129 = arith.constant 2.000000e+00 : f32
      %392 = vector.broadcast %cst_129 : f32 to vector<8x1xf32>
      %393 = arith.mulf %392, %375 : vector<8x1xf32>
      %cst_130 = arith.constant 1.000000e+00 : f32
      %394 = vector.broadcast %cst_130 : f32 to vector<8x1xf32>
      %395 = arith.addf %394, %393 : vector<8x1xf32>
      %cst_131 = arith.constant 1.000000e+00 : f32
      %396 = vector.broadcast %cst_131 : f32 to vector<8x1xf32>
      %397 = arith.mulf %396, %369 : vector<8x1xf32>
      %398 = arith.mulf %397, %372 : vector<8x1xf32>
      %399 = arith.addf %395, %398 : vector<8x1xf32>
      %cst_132 = arith.constant 1.000000e-15 : f32
      %400 = vector.broadcast %cst_132 : f32 to vector<8x1xf32>
      %401 = arith.maximumf %399, %400 : vector<8x1xf32>
      %402 = vector.broadcast %401 : vector<8x1xf32> to vector<8x128xf32>
      %403 = arith.divf %391, %402 : vector<8x128xf32>
      %404 = arith.mulf %403, %403 : vector<8x128xf32>
      %cst_133 = arith.constant dense<0.000000e+00> : vector<8xf32>
      %405 = vector.multi_reduction <add>, %404, %cst_133 [1] : vector<8x128xf32> to vector<8xf32>
      %406 = vector.shape_cast %405 : vector<8xf32> to vector<8x1xf32>
      %407 = vector.broadcast %6 : vector<1x128xf32> to vector<8x128xf32>
      %408 = arith.mulf %403, %407 : vector<8x128xf32>
      %cst_134 = arith.constant dense<0.000000e+00> : vector<8xf32>
      %409 = vector.multi_reduction <add>, %408, %cst_134 [1] : vector<8x128xf32> to vector<8xf32>
      %410 = vector.shape_cast %409 : vector<8xf32> to vector<8x1xf32>
      %cst_135 = arith.constant 2.000000e+00 : f32
      %411 = vector.broadcast %cst_135 : f32 to vector<8x1xf32>
      %412 = arith.mulf %411, %410 : vector<8x1xf32>
      %cst_136 = arith.constant 1.000000e+00 : f32
      %413 = vector.broadcast %cst_136 : f32 to vector<8x1xf32>
      %414 = arith.addf %413, %412 : vector<8x1xf32>
      %cst_137 = arith.constant 1.000000e+00 : f32
      %415 = vector.broadcast %cst_137 : f32 to vector<1x1xf32>
      %416 = arith.mulf %415, %15 : vector<1x1xf32>
      %417 = vector.broadcast %416 : vector<1x1xf32> to vector<8x1xf32>
      %418 = arith.addf %414, %417 : vector<8x1xf32>
      %419 = vector.broadcast %418 : vector<8x1xf32> to vector<8x128xf32>
      %420 = arith.mulf %419, %403 : vector<8x128xf32>
      %cst_138 = arith.constant 1.000000e+00 : f32
      %421 = vector.broadcast %cst_138 : f32 to vector<8x1xf32>
      %422 = arith.mulf %421, %406 : vector<8x1xf32>
      %cst_139 = arith.constant 1.000000e+00 : f32
      %423 = vector.broadcast %cst_139 : f32 to vector<8x1xf32>
      %424 = arith.subf %423, %422 : vector<8x1xf32>
      %425 = vector.broadcast %424 : vector<8x1xf32> to vector<8x128xf32>
      %426 = vector.broadcast %6 : vector<1x128xf32> to vector<8x128xf32>
      %427 = arith.mulf %425, %426 : vector<8x128xf32>
      %428 = arith.addf %420, %427 : vector<8x128xf32>
      %cst_140 = arith.constant 2.000000e+00 : f32
      %429 = vector.broadcast %cst_140 : f32 to vector<8x1xf32>
      %430 = arith.mulf %429, %410 : vector<8x1xf32>
      %cst_141 = arith.constant 1.000000e+00 : f32
      %431 = vector.broadcast %cst_141 : f32 to vector<8x1xf32>
      %432 = arith.addf %431, %430 : vector<8x1xf32>
      %cst_142 = arith.constant 1.000000e+00 : f32
      %433 = vector.broadcast %cst_142 : f32 to vector<8x1xf32>
      %434 = arith.mulf %433, %406 : vector<8x1xf32>
      %435 = vector.broadcast %15 : vector<1x1xf32> to vector<8x1xf32>
      %436 = arith.mulf %434, %435 : vector<8x1xf32>
      %437 = arith.addf %432, %436 : vector<8x1xf32>
      %cst_143 = arith.constant 1.000000e-15 : f32
      %438 = vector.broadcast %cst_143 : f32 to vector<8x1xf32>
      %439 = arith.maximumf %437, %438 : vector<8x1xf32>
      %440 = vector.broadcast %439 : vector<8x1xf32> to vector<8x128xf32>
      %441 = arith.divf %428, %440 : vector<8x128xf32>
      %cst_144 = arith.constant 0.000000e+00 : f32
      %442 = vector.broadcast %cst_144 : f32 to vector<8x128xf32>
      %443 = arith.subf %442, %19 : vector<8x128xf32>
      %444 = arith.mulf %441, %441 : vector<8x128xf32>
      %cst_145 = arith.constant dense<0.000000e+00> : vector<8xf32>
      %445 = vector.multi_reduction <add>, %444, %cst_145 [1] : vector<8x128xf32> to vector<8xf32>
      %446 = vector.shape_cast %445 : vector<8xf32> to vector<8x1xf32>
      %447 = arith.mulf %443, %441 : vector<8x128xf32>
      %cst_146 = arith.constant dense<0.000000e+00> : vector<8xf32>
      %448 = vector.multi_reduction <add>, %447, %cst_146 [1] : vector<8x128xf32> to vector<8xf32>
      %449 = vector.shape_cast %448 : vector<8xf32> to vector<8x1xf32>
      %cst_147 = arith.constant 2.000000e+00 : f32
      %450 = vector.broadcast %cst_147 : f32 to vector<8x1xf32>
      %451 = arith.mulf %450, %449 : vector<8x1xf32>
      %cst_148 = arith.constant 1.000000e+00 : f32
      %452 = vector.broadcast %cst_148 : f32 to vector<8x1xf32>
      %453 = arith.addf %452, %451 : vector<8x1xf32>
      %cst_149 = arith.constant 1.000000e+00 : f32
      %454 = vector.broadcast %cst_149 : f32 to vector<8x1xf32>
      %455 = arith.mulf %454, %446 : vector<8x1xf32>
      %456 = arith.addf %453, %455 : vector<8x1xf32>
      %457 = vector.broadcast %456 : vector<8x1xf32> to vector<8x128xf32>
      %458 = arith.mulf %457, %443 : vector<8x128xf32>
      %cst_150 = arith.constant 1.000000e+00 : f32
      %459 = vector.broadcast %cst_150 : f32 to vector<8x1xf32>
      %460 = arith.mulf %459, %27 : vector<8x1xf32>
      %cst_151 = arith.constant 1.000000e+00 : f32
      %461 = vector.broadcast %cst_151 : f32 to vector<8x1xf32>
      %462 = arith.subf %461, %460 : vector<8x1xf32>
      %463 = vector.broadcast %462 : vector<8x1xf32> to vector<8x128xf32>
      %464 = arith.mulf %463, %441 : vector<8x128xf32>
      %465 = arith.addf %458, %464 : vector<8x128xf32>
      %cst_152 = arith.constant 2.000000e+00 : f32
      %466 = vector.broadcast %cst_152 : f32 to vector<8x1xf32>
      %467 = arith.mulf %466, %449 : vector<8x1xf32>
      %cst_153 = arith.constant 1.000000e+00 : f32
      %468 = vector.broadcast %cst_153 : f32 to vector<8x1xf32>
      %469 = arith.addf %468, %467 : vector<8x1xf32>
      %cst_154 = arith.constant 1.000000e+00 : f32
      %470 = vector.broadcast %cst_154 : f32 to vector<8x1xf32>
      %471 = arith.mulf %470, %27 : vector<8x1xf32>
      %472 = arith.mulf %471, %446 : vector<8x1xf32>
      %473 = arith.addf %469, %472 : vector<8x1xf32>
      %cst_155 = arith.constant 1.000000e-15 : f32
      %474 = vector.broadcast %cst_155 : f32 to vector<8x1xf32>
      %475 = arith.maximumf %473, %474 : vector<8x1xf32>
      %476 = vector.broadcast %475 : vector<8x1xf32> to vector<8x128xf32>
      %477 = arith.divf %465, %476 : vector<8x128xf32>
      %478 = arith.mulf %477, %477 : vector<8x128xf32>
      %cst_156 = arith.constant dense<0.000000e+00> : vector<8xf32>
      %479 = vector.multi_reduction <add>, %478, %cst_156 [1] : vector<8x128xf32> to vector<8xf32>
      %480 = vector.shape_cast %479 : vector<8xf32> to vector<8x1xf32>
      %481 = math.sqrt %480 : vector<8x1xf32>
      %cst_157 = arith.constant 1.000000e-15 : f32
      %482 = vector.broadcast %cst_157 : f32 to vector<8x1xf32>
      %483 = arith.maximumf %481, %482 : vector<8x1xf32>
      %cst_158 = arith.constant 1.000000e+00 : f32
      %484 = vector.broadcast %cst_158 : f32 to vector<8x1xf32>
      %485 = arith.mulf %484, %483 : vector<8x1xf32>
      %cst_159 = arith.constant -0.99999988 : f32
      %cst_160 = arith.constant 0.99999988 : f32
      %486 = vector.broadcast %cst_159 : f32 to vector<8x1xf32>
      %487 = arith.maximumf %486, %485 : vector<8x1xf32>
      %488 = vector.broadcast %cst_160 : f32 to vector<8x1xf32>
      %489 = arith.minimumf %488, %487 : vector<8x1xf32>
      %cst_161 = arith.constant 1.000000e+00 : f32
      %490 = vector.broadcast %cst_161 : f32 to vector<8x1xf32>
      %491 = arith.addf %490, %489 : vector<8x1xf32>
      %cst_162 = arith.constant 1.000000e+00 : f32
      %492 = vector.broadcast %cst_162 : f32 to vector<8x1xf32>
      %493 = arith.subf %492, %489 : vector<8x1xf32>
      %494 = arith.divf %491, %493 : vector<8x1xf32>
      %495 = math.log %494 : vector<8x1xf32>
      %cst_163 = arith.constant 5.000000e-01 : f32
      %496 = vector.broadcast %cst_163 : f32 to vector<8x1xf32>
      %497 = arith.mulf %496, %495 : vector<8x1xf32>
      %498 = arith.divf %497, %483 : vector<8x1xf32>
      %499 = arith.mulf %303, %477 : vector<8x128xf32>
      %500 = arith.mulf %499, %499 : vector<8x128xf32>
      %cst_164 = arith.constant dense<0.000000e+00> : vector<8xf32>
      %501 = vector.multi_reduction <add>, %500, %cst_164 [1] : vector<8x128xf32> to vector<8xf32>
      %502 = vector.shape_cast %501 : vector<8xf32> to vector<8x1xf32>
      %503 = math.sqrt %502 : vector<8x1xf32>
      %cst_165 = arith.constant 1.000000e-15 : f32
      %504 = vector.broadcast %cst_165 : f32 to vector<8x1xf32>
      %505 = arith.maximumf %503, %504 : vector<8x1xf32>
      %506 = arith.mulf %505, %498 : vector<8x1xf32>
      %507 = math.tanh %506 : vector<8x1xf32>
      %508 = vector.broadcast %507 : vector<8x1xf32> to vector<8x128xf32>
      %509 = arith.mulf %508, %499 : vector<8x128xf32>
      %cst_166 = arith.constant 1.000000e+00 : f32
      %510 = vector.broadcast %cst_166 : f32 to vector<8x1xf32>
      %511 = arith.mulf %505, %510 : vector<8x1xf32>
      %512 = vector.broadcast %511 : vector<8x1xf32> to vector<8x128xf32>
      %513 = arith.divf %509, %512 : vector<8x128xf32>
      %cst_167 = arith.constant 0.000000e+00 : f32
      %514 = vector.broadcast %cst_167 : f32 to vector<8x1xf32>
      %515 = arith.cmpf oeq, %502, %514 : vector<8x1xf32>
      %cst_168 = arith.constant 0.000000e+00 : f32
      %516 = vector.broadcast %cst_168 : f32 to vector<8x128xf32>
      %517 = vector.shape_cast %515 : vector<8x1xi1> to vector<8x1xi1>
      %518 = vector.broadcast %517 : vector<8x1xi1> to vector<8x128xi1>
      %519 = arith.select %518, %516, %513 : vector<8x128xi1>, vector<8x128xf32>
      %520 = arith.mulf %519, %519 : vector<8x128xf32>
      %cst_169 = arith.constant dense<0.000000e+00> : vector<8xf32>
      %521 = vector.multi_reduction <add>, %520, %cst_169 [1] : vector<8x128xf32> to vector<8xf32>
      %522 = vector.shape_cast %521 : vector<8xf32> to vector<8x1xf32>
      %523 = arith.mulf %19, %519 : vector<8x128xf32>
      %cst_170 = arith.constant dense<0.000000e+00> : vector<8xf32>
      %524 = vector.multi_reduction <add>, %523, %cst_170 [1] : vector<8x128xf32> to vector<8xf32>
      %525 = vector.shape_cast %524 : vector<8xf32> to vector<8x1xf32>
      %cst_171 = arith.constant 2.000000e+00 : f32
      %526 = vector.broadcast %cst_171 : f32 to vector<8x1xf32>
      %527 = arith.mulf %526, %525 : vector<8x1xf32>
      %cst_172 = arith.constant 1.000000e+00 : f32
      %528 = vector.broadcast %cst_172 : f32 to vector<8x1xf32>
      %529 = arith.addf %528, %527 : vector<8x1xf32>
      %cst_173 = arith.constant 1.000000e+00 : f32
      %530 = vector.broadcast %cst_173 : f32 to vector<8x1xf32>
      %531 = arith.mulf %530, %522 : vector<8x1xf32>
      %532 = arith.addf %529, %531 : vector<8x1xf32>
      %533 = vector.broadcast %532 : vector<8x1xf32> to vector<8x128xf32>
      %534 = arith.mulf %533, %19 : vector<8x128xf32>
      %cst_174 = arith.constant 1.000000e+00 : f32
      %535 = vector.broadcast %cst_174 : f32 to vector<8x1xf32>
      %536 = arith.mulf %535, %27 : vector<8x1xf32>
      %cst_175 = arith.constant 1.000000e+00 : f32
      %537 = vector.broadcast %cst_175 : f32 to vector<8x1xf32>
      %538 = arith.subf %537, %536 : vector<8x1xf32>
      %539 = vector.broadcast %538 : vector<8x1xf32> to vector<8x128xf32>
      %540 = arith.mulf %539, %519 : vector<8x128xf32>
      %541 = arith.addf %534, %540 : vector<8x128xf32>
      %cst_176 = arith.constant 2.000000e+00 : f32
      %542 = vector.broadcast %cst_176 : f32 to vector<8x1xf32>
      %543 = arith.mulf %542, %525 : vector<8x1xf32>
      %cst_177 = arith.constant 1.000000e+00 : f32
      %544 = vector.broadcast %cst_177 : f32 to vector<8x1xf32>
      %545 = arith.addf %544, %543 : vector<8x1xf32>
      %cst_178 = arith.constant 1.000000e+00 : f32
      %546 = vector.broadcast %cst_178 : f32 to vector<8x1xf32>
      %547 = arith.mulf %546, %27 : vector<8x1xf32>
      %548 = arith.mulf %547, %522 : vector<8x1xf32>
      %549 = arith.addf %545, %548 : vector<8x1xf32>
      %cst_179 = arith.constant 1.000000e-15 : f32
      %550 = vector.broadcast %cst_179 : f32 to vector<8x1xf32>
      %551 = arith.maximumf %549, %550 : vector<8x1xf32>
      %552 = vector.broadcast %551 : vector<8x1xf32> to vector<8x128xf32>
      %553 = arith.divf %541, %552 : vector<8x128xf32>
      %c0_180 = arith.constant 0 : index
      %c0_181 = arith.constant 0 : index
      %554 = vector.load %arg7[%c0_180, %c0_181] : memref<8x128xf32, #tpu.memory_space<vmem>>, vector<8x128xf32>
      tpu.vector_store %arg7[%c0_180, %c0_181], %553 {strides = array<i32>} : memref<8x128xf32, #tpu.memory_space<vmem>>, vector<8x128xf32>,
      %555 = arith.index_cast %arg8 : i32 to index
      %c0_182 = arith.constant 0 : index
      %c0_183 = arith.constant 0 : index
      %556 = vector.load %arg5[%555, %c0_182, %c0_183] : memref<8x8x128xf32, #tpu.memory_space<vmem>>, vector<1x8x128xf32>
      %557 = vector.shape_cast %556 : vector<1x8x128xf32> to vector<8x128xf32>
      %558 = vector.shape_cast %553 : vector<8x128xf32> to vector<1x8x128xf32>
      tpu.vector_store %arg5[%555, %c0_182, %c0_183], %558 {strides = array<i32>} : memref<8x8x128xf32, #tpu.memory_space<vmem>>, vector<1x8x128xf32>,
    }
    %c8_i32_5 = arith.constant 8 : i32
    %c0_6 = arith.constant 0 : index
    %c0_7 = arith.constant 0 : index
    %17 = vector.load %arg7[%c0_6, %c0_7] : memref<8x128xf32, #tpu.memory_space<vmem>>, vector<8x128xf32>
    %c0_8 = arith.constant 0 : index
    %c0_9 = arith.constant 0 : index
    %18 = vector.load %arg6[%c0_8, %c0_9] : memref<8x128xf32, #tpu.memory_space<vmem>>, vector<8x128xf32>
    tpu.vector_store %arg6[%c0_8, %c0_9], %17 {strides = array<i32>} : memref<8x128xf32, #tpu.memory_space<vmem>>, vector<8x128xf32>,
    return
  }
  func.func @transform_0(%arg0: i32) -> (i32, i32, i32) {
    %c0_i32 = arith.constant 0 : i32
    %c0_i32_0 = arith.constant 0 : i32
    %c0_i32_1 = arith.constant 0 : i32
    return %arg0, %c0_i32, %c0_i32_0 : i32, i32, i32
  }
  func.func @transform_1(%arg0: i32) -> (i32, i32) {
    %c0_i32 = arith.constant 0 : i32
    %c0_i32_0 = arith.constant 0 : i32
    %c0_i32_1 = arith.constant 0 : i32
    return %c0_i32, %c0_i32_0 : i32, i32
  }
  func.func @transform_2(%arg0: i32) -> (i32, i32) {
    %c0_i32 = arith.constant 0 : i32
    %c0_i32_0 = arith.constant 0 : i32
    %c0_i32_1 = arith.constant 0 : i32
    return %c0_i32, %c0_i32_0 : i32, i32
  }
  func.func @transform_3(%arg0: i32) -> (i32, i32) {
    %c0_i32 = arith.constant 0 : i32
    %c0_i32_0 = arith.constant 0 : i32
    %c0_i32_1 = arith.constant 0 : i32
    return %c0_i32, %c0_i32_0 : i32, i32
  }
  func.func @transform_4(%arg0: i32) -> (i32, i32, i32) {
    %c0_i32 = arith.constant 0 : i32
    %c0_i32_0 = arith.constant 0 : i32
    %c0_i32_1 = arith.constant 0 : i32
    return %arg0, %c0_i32, %c0_i32_0 : i32, i32, i32
  }
  func.func @transform_5(%arg0: i32) -> (i32, i32) {
    %c0_i32 = arith.constant 0 : i32
    %c0_i32_0 = arith.constant 0 : i32
    %c0_i32_1 = arith.constant 0 : i32
    return %c0_i32, %c0_i32_0 : i32, i32
  }
}

</mosaic_0001>

<bundles_post_ra>
// kernel: mobius_gru_forward.4
= control target key start
LH: loop header
LB: loop body
LE: loop exit
PB: predicated region body
PF: predicated region fallthrough
CT: control target
= control target key end

     0   :  { %v1254_v3 = vmov 0.0   ;;  %s2115_s1 = inlined_call_operand.vmem [shape: f32[128,384], index: 1, kind: input, shape index: {}]   ;;  %s2116_s0 = inlined_call_operand.vmem [shape: f32[64,128], index: 0, kind: input, shape index: {}]   ;;  %s2117_s2 = inlined_call_operand.vmem [shape: f32[64,384], index: 2, kind: output, shape index: {}]  }
   0x1   :  { %v241_v0 = vld [vmem:[%s2115_s1 + $0x170] sm:$0xff]  ;;  %v242_v1 = vld [vmem:[%s2115_s1 + $0x178] sm:$0xff]  ;;  %v240_v2 = vld [vmem:[%s2115_s1 + $0x168] sm:$0xff]  ;;  %307 = vmatprep.mubr.f32.mxu0 %v1254_v3 }
   0x2   :  { %243 = vmatprep.subr.mxu0 %v241_v0  ;;  %1001 = vmatprep.subr.mxu1 %v242_v1  ;;  %v238_v4 = vld [vmem:[%s2115_s1 + $0x158] sm:$0xff]  ;;  %v239_v5 = vld [vmem:[%s2115_s1 + $0x160] sm:$0xff]  ;;  %v237_v6 = vld [vmem:[%s2115_s1 + $0x150] sm:$0xff] }
   0x3   :  { %244 = vmatpush1.msra.mxu0 %v240_v2  ;;  %1002 = vmatpush3.msra.mxu1 %v242_v1  ;;  %v235_v7 = vld [vmem:[%s2115_s1 + $0x140] sm:$0xff]  ;;  %v236_v8 = vld [vmem:[%s2115_s1 + $0x148] sm:$0xff]  ;;  %v234_v9 = vld [vmem:[%s2115_s1 + $0x138] sm:$0xff] }
   0x4   :  { %245 = vmatprep.subr.mxu0 %v238_v4  ;;  %1003 = vmatprep.subr.mxu1 %v239_v5  ;;  %v232_v10 = vld [vmem:[%s2115_s1 + $0x128] sm:$0xff]  ;;  %v233_v11 = vld [vmem:[%s2115_s1 + $0x130] sm:$0xff]  ;;  %v231_v12 = vld [vmem:[%s2115_s1 + $0x120] sm:$0xff] }
   0x5   :  { %246 = vmatpush1.msra.mxu0 %v237_v6  ;;  %1004 = vmatpush3.msra.mxu1 %v239_v5  ;;  %v229_v13 = vld [vmem:[%s2115_s1 + $0x110] sm:$0xff]  ;;  %v230_v14 = vld [vmem:[%s2115_s1 + $0x118] sm:$0xff]  ;;  %v228_v15 = vld [vmem:[%s2115_s1 + $0x108] sm:$0xff] }
   0x6   :  { %247 = vmatprep.subr.mxu0 %v235_v7  ;;  %1005 = vmatprep.subr.mxu1 %v236_v8  ;;  %v226_v16 = vld [vmem:[%s2115_s1 + $0xf8] sm:$0xff]  ;;  %v227_v17 = vld [vmem:[%s2115_s1 + $0x100] sm:$0xff]  ;;  %v225_v18 = vld [vmem:[%s2115_s1 + $0xf0] sm:$0xff] }
   0x7   :  { %248 = vmatpush1.msra.mxu0 %v234_v9  ;;  %1006 = vmatpush3.msra.mxu1 %v236_v8  ;;  %v223_v19 = vld [vmem:[%s2115_s1 + $0xe0] sm:$0xff]  ;;  %v224_v20 = vld [vmem:[%s2115_s1 + $0xe8] sm:$0xff]  ;;  %v222_v21 = vld [vmem:[%s2115_s1 + $0xd8] sm:$0xff] }
   0x8   :  { %249 = vmatprep.subr.mxu0 %v232_v10  ;;  %1007 = vmatprep.subr.mxu1 %v233_v11  ;;  %v220_v22 = vld [vmem:[%s2115_s1 + $0xc8] sm:$0xff]  ;;  %v221_v23 = vld [vmem:[%s2115_s1 + $0xd0] sm:$0xff]  ;;  %v219_v24 = vld [vmem:[%s2115_s1 + $0xc0] sm:$0xff] }
   0x9   :  { %250 = vmatpush1.msra.mxu0 %v231_v12  ;;  %1008 = vmatpush3.msra.mxu1 %v233_v11  ;;  %v217_v25 = vld [vmem:[%s2115_s1 + $0xb0] sm:$0xff]  ;;  %v218_v26 = vld [vmem:[%s2115_s1 + $0xb8] sm:$0xff]  ;;  %v216_v27 = vld [vmem:[%s2115_s1 + $0xa8] sm:$0xff] }
   0xa   :  { %251 = vmatprep.subr.mxu0 %v229_v13  ;;  %1009 = vmatprep.subr.mxu1 %v230_v14  ;;  %v214_v28 = vld [vmem:[%s2115_s1 + $0x98] sm:$0xff]  ;;  %v215_v29 = vld [vmem:[%s2115_s1 + $0xa0] sm:$0xff]  ;;  %v213_v30 = vld [vmem:[%s2115_s1 + $0x90] sm:$0xff] }
   0xb   :  { %252 = vmatpush1.msra.mxu0 %v228_v15  ;;  %1010 = vmatpush3.msra.mxu1 %v230_v14  ;;  %v211_v31 = vld [vmem:[%s2115_s1 + $0x80] sm:$0xff]  ;;  %v212_v32 = vld [vmem:[%s2115_s1 + $0x88] sm:$0xff]  ;;  %v210_v33 = vld [vmem:[%s2115_s1 + $0x78] sm:$0xff] }
   0xc   :  { %253 = vmatprep.subr.mxu0 %v226_v16  ;;  %1011 = vmatprep.subr.mxu1 %v227_v17  ;;  %v208_v34 = vld [vmem:[%s2115_s1 + $0x68] sm:$0xff]  ;;  %v209_v35 = vld [vmem:[%s2115_s1 + $0x70] sm:$0xff]  ;;  %v207_v36 = vld [vmem:[%s2115_s1 + $0x60] sm:$0xff] }
   0xd   :  { %254 = vmatpush1.msra.mxu0 %v225_v18  ;;  %1012 = vmatpush3.msra.mxu1 %v227_v17  ;;  %v205_v37 = vld [vmem:[%s2115_s1 + $0x50] sm:$0xff]  ;;  %v206_v38 = vld [vmem:[%s2115_s1 + $0x58] sm:$0xff]  ;;  %v204_v39 = vld [vmem:[%s2115_s1 + $0x48] sm:$0xff] }
   0xe   :  { %255 = vmatprep.subr.mxu0 %v223_v19  ;;  %1013 = vmatprep.subr.mxu1 %v224_v20  ;;  %v202_v40 = vld [vmem:[%s2115_s1 + $0x38] sm:$0xff]  ;;  %v203_v41 = vld [vmem:[%s2115_s1 + $0x40] sm:$0xff]  ;;  %v201_v42 = vld [vmem:[%s2115_s1 + $0x30] sm:$0xff] }
   0xf   :  { %256 = vmatpush1.msra.mxu0 %v222_v21  ;;  %1014 = vmatpush3.msra.mxu1 %v224_v20  ;;  %v199_v43 = vld [vmem:[%s2115_s1 + $0x20] sm:$0xff]  ;;  %v200_v44 = vld [vmem:[%s2115_s1 + $0x28] sm:$0xff]  ;;  %v198_v45 = vld [vmem:[%s2115_s1 + $0x18] sm:$0xff] }
  0x10   :  { %257 = vmatprep.subr.mxu0 %v220_v22  ;;  %1015 = vmatprep.subr.mxu1 %v221_v23  ;;  %v196_v46 = vld [vmem:[%s2115_s1 + $0x8] sm:$0xff]  ;;  %v197_v47 = vld [vmem:[%s2115_s1 + $0x10] sm:$0xff]  ;;  %v195_v48 = vld [vmem:[%s2115_s1] sm:$0xff] }
  0x11   :  { %258 = vmatpush1.msra.mxu0 %v219_v24  ;;  %1016 = vmatpush3.msra.mxu1 %v221_v23  ;;  %v11_v49 = vld [vmem:[%s2116_s0] sm:$0xff]  ;;  %v13_v50 = vld [vmem:[%s2116_s0 + $0x10] sm:$0xff]  ;;  %v12_v51 = vld [vmem:[%s2116_s0 + $0x8] sm:$0xff] }
  0x12   :  { %259 = vmatprep.subr.mxu0 %v217_v25  ;;  %1017 = vmatprep.subr.mxu1 %v218_v26  ;;  %v21_v52 = vmul.f32 %v13_v50, %v13_v50  ;;  %v19_v53 = vmul.f32 %v11_v49, %v11_v49  ;;  %v14_v54 = vld [vmem:[%s2116_s0 + $0x18] sm:$0xff]  ;;  %v15_v56 = vld [vmem:[%s2116_s0 + $0x20] sm:$0xff]  ;;  %v20_v57 = vmul.f32 %v12_v51, %v12_v51  ;;  %v16_v58 = vld [vmem:[%s2116_s0 + $0x28] sm:$0xff] }
  0x13   :  { %260 = vmatpush1.msra.mxu0 %v216_v27  ;;  %1018 = vmatpush3.msra.mxu1 %v218_v26  ;;  %v22_v55 = vmul.f32 %v14_v54, %v14_v54  ;;  %v24_v59 = vmul.f32 %v16_v58, %v16_v58  ;;  %v23_v60 = vmul.f32 %v15_v56, %v15_v56  ;;  %v17_v61 = vld [vmem:[%s2116_s0 + $0x30] sm:$0xff]  ;;  %v18_v62 = vld [vmem:[%s2116_s0 + $0x38] sm:$0xff] }
  0x14   :  { %261 = vmatprep.subr.mxu0 %v214_v28  ;;  %1019 = vmatprep.subr.mxu1 %v215_v29  ;;  %v26_v63 = vmul.f32 %v18_v62, %v18_v62  ;;  %v25_v0 = vmul.f32 %v17_v61, %v17_v61 }
  0x15   :  { %262 = vmatpush1.msra.mxu0 %v213_v30  ;;  %1020 = vmatpush3.msra.mxu1 %v215_v29 }
  0x16   :  { %263 = vmatprep.subr.mxu0 %v211_v31  ;;  %1021 = vmatprep.subr.mxu1 %v212_v32 }
  0x17   :  { %264 = vmatpush1.msra.mxu0 %v210_v33  ;;  %1022 = vmatpush3.msra.mxu1 %v212_v32 }
  0x18   :  { %265 = vmatprep.subr.mxu0 %v208_v34  ;;  %1023 = vmatprep.subr.mxu1 %v209_v35 }
  0x19   :  { %266 = vmatpush1.msra.mxu0 %v207_v36  ;;  %1024 = vmatpush3.msra.mxu1 %v209_v35 }
  0x1a   :  { %267 = vmatprep.subr.mxu0 %v205_v37  ;;  %1025 = vmatprep.subr.mxu1 %v206_v38 }
  0x1b   :  { %268 = vmatpush1.msra.mxu0 %v204_v39  ;;  %1026 = vmatpush3.msra.mxu1 %v206_v38 }
  0x1c   :  { %269 = vmatprep.subr.mxu0 %v202_v40  ;;  %1027 = vmatprep.subr.mxu1 %v203_v41 }
  0x1d   :  { %270 = vmatpush1.msra.mxu0 %v201_v42  ;;  %1028 = vmatpush3.msra.mxu1 %v203_v41 }
  0x1e   :  { %271 = vmatprep.subr.mxu0 %v199_v43  ;;  %1029 = vmatprep.subr.mxu1 %v200_v44 }
  0x1f   :  { %272 = vmatpush1.msra.mxu0 %v198_v45  ;;  %1030 = vmatpush3.msra.mxu1 %v200_v44 }
  0x20   :  { %273 = vmatprep.subr.mxu0 %v196_v46  ;;  %1031 = vmatprep.subr.mxu1 %v197_v47 }
  0x21   :  { %274 = vmatpush1.msra.mxu0 %v195_v48  ;;  %1032 = vmatpush3.msra.mxu1 %v197_v47 }
  0x22   :  { %1033 = vmatprep.mubr.f32.mxu1 %v11_v49  ;;  %308 = vmatmul.mubr.f32.vlgmr.msra.gmra.mxu0 %v11_v49 }
  0x23   :  { %1034 = vmatmul.mubr.f32.vlgmr.msra.gmra.mxu1 %v12_v51  ;;  %313 = vmatprep.mubr.f32.mxu0 %v1254_v3 }
  0x24   :  { %1036 = vmatprep.mubr.f32.mxu1 %v13_v50  ;;  %31 = vadd.xlane.f32.xlu1 %v21_v52 }
  0x25   :  { %27 = vadd.xlane.f32.xlu0 %v19_v53 }
  0x26   :  { %314 = vmatmul.mubr.f32.gmra.mxu0 %v12_v51 }
  0x27   :  { %1037 = vmatmul.mubr.f32.gmra.mxu1 %v14_v54  ;;  %319 = vmatprep.mubr.f32.mxu0 %v1254_v3 }
  0x28   :  { %1039 = vmatprep.mubr.f32.mxu1 %v15_v56  ;;  %33 = vadd.xlane.f32.xlu1 %v22_v55 }
  0x29   :  { %29 = vadd.xlane.f32.xlu0 %v20_v57 }
  0x2a   :  { %320 = vmatmul.mubr.f32.gmra.mxu0 %v13_v50 }
  0x2b   :  { %1040 = vmatmul.mubr.f32.gmra.mxu1 %v16_v58  ;;  %325 = vmatprep.mubr.f32.mxu0 %v1254_v3 }
  0x2c   :  { %1042 = vmatprep.mubr.f32.mxu1 %v17_v61  ;;  %37 = vadd.xlane.f32.xlu1 %v24_v59 }
  0x2d   :  { %35 = vadd.xlane.f32.xlu0 %v23_v60 }
  0x2e   :  { %326 = vmatmul.mubr.f32.gmra.mxu0 %v14_v54 }
  0x2f   :  { %331 = vmatprep.mubr.f32.mxu0 %v1254_v3  ;;  %1043 = vmatmul.mubr.f32.gmra.mxu1 %v18_v62 }
  0x30   :  { %41 = vadd.xlane.f32.xlu1 %v26_v63 }
  0x31   :  { %39 = vadd.xlane.f32.xlu0 %v25_v0 }
  0x32   :  { %332 = vmatmul.mubr.f32.gmra.mxu0 %v15_v56 }
  0x33   :  { %337 = vmatprep.mubr.f32.mxu0 %v1254_v3 }
  0x36   :  { %338 = vmatmul.mubr.f32.gmra.mxu0 %v16_v58 }
  0x37   :  { %343 = vmatprep.mubr.f32.mxu0 %v1254_v3 }
  0x3a   :  { %344 = vmatmul.mubr.f32.gmra.mxu0 %v17_v61 }
  0x3b   :  { %349 = vmatprep.mubr.f32.mxu0 %v1254_v3 }
  0x3e   :  { %350 = vmatmul.mubr.f32.gmra.mxu0 %v18_v62 }
  0xad   :  { %v32_v49 = vpop.xlane.xlu1 %31 }
  0xae   :  { %v28_v50 = vpop.xlane.xlu0 %27  ;;  %1046 = vrsqrt.f32 %v32_v49  ;;  %vm59_vm0 = vcmp.eq.f32.partialorder %v32_v49, inf  ;;  %v62_v63 = vand.u32 2147483648, %v32_v49  ;;  %vm61_vm3 = vcmp.eq.f32.partialorder %v32_v49, 0.0 }
  0xaf   :  { %1048 = vrsqrt.f32 %v28_v50  ;;  %vm45_vm1 = vcmp.eq.f32.partialorder %v28_v50, inf  ;;  %vm47_vm5 = vcmp.eq.f32.partialorder %v28_v50, 0.0 }
  0xb1   :  { %v34_v51 = vpop.xlane.xlu1 %33 }
  0xb2   :  { %v30_v52 = vpop.xlane.xlu0 %29  ;;  %1050 = vrsqrt.f32 %v34_v51  ;;  %vm66_vm2 = vcmp.eq.f32.partialorder %v34_v51, inf  ;;  %vm68_vm6 = vcmp.eq.f32.partialorder %v34_v51, 0.0 }
  0xb3   :  { %1052 = vrsqrt.f32 %v30_v52  ;;  %vm52_vm4 = vcmp.eq.f32.partialorder %v30_v52, inf  ;;  %vm54_vm7 = vcmp.eq.f32.partialorder %v30_v52, 0.0 }
  0xb5   :  { %v38_v53 = vpop.xlane.xlu1 %37 }
  0xb6   :  { %1054 = vrsqrt.f32 %v38_v53  ;;  %v1542_v57 = vpop.xlane.xlu0 %35  ;;  %vm80_vm8 = vcmp.eq.f32.partialorder %v38_v53, inf  ;;  %vm82_vm9 = vcmp.eq.f32.partialorder %v38_v53, 0.0 }
  0xb7   :  { %1056 = vrsqrt.f32 %v1542_v57  ;;  %vm73_vm10 = vcmp.eq.f32.partialorder %v1542_v57, inf  ;;  %vm75_vm12 = vcmp.eq.f32.partialorder %v1542_v57, 0.0 }
  0xb9   :  { %v1544_v60 = vpop.xlane.xlu1 %41 }
  0xba   :  { %1058 = vrsqrt.f32 %v1544_v60  ;;  %vm94_vm11 = vcmp.eq.f32.partialorder %v1544_v60, inf  ;;  %vm96_vm13 = vcmp.eq.f32.partialorder %v1544_v60, 0.0 }
  0xbb   :  { %v1047_v54 = vpop.eup %1046 }
  0xbc   :  { %v1049_v55 = vpop.eup %1048  ;;  %v58_v59 = vmul.f32 %v1047_v54, %v32_v49 }
  0xbd   :  { %v44_v61 = vmul.f32 %v1049_v55, %v28_v50 }
  0xbf   :  { %v1051_v56 = vpop.eup %1050 }
  0xc0   :  { %v1053_v58 = vpop.eup %1052  ;;  %v65_v62 = vmul.f32 %v1051_v56, %v34_v51 }
  0xc1   :  { %v51_v0 = vmul.f32 %v1053_v58, %v30_v52 }
  0xe2   :  { %v1446_v1 = vpop.f32.mrf.mxu0 }
  0xe3   :  { %v1448_v2 = vpop.f32.mrf.mxu1  ;;  %v461_v4 = vmul.f32 %v1446_v1, %v1446_v1 }
  0xe4   :  { %v1452_v5 = vpop.f32.mrf.mxu0  ;;  %v798_v6 = vmul.f32 %v1448_v2, %v1448_v2 }
  0xe5   :  { %469 = vadd.xlane.f32.xlu0 %v461_v4  ;;  %v1456_v7 = vpop.f32.mrf.mxu1  ;;  %v629_v9 = vmul.f32 %v1452_v5, %v1452_v5  ;;  %v1055_v4 = vpop.eup %1054 }
  0xe6   :  { %807 = vadd.xlane.f32.xlu1 %v798_v6  ;;  %v1458_v8 = vpop.f32.mrf.mxu0  ;;  %v797_v14 = vmul.f32 %v1456_v7, %v1456_v7  ;;  %v60_v6 = vsel %vm59_vm0, %v32_v49, %v58_v59 }
  0xe7   :  { %v462_v3 = vmul.f32 %v1458_v8, %v1458_v8  ;;  %v1466_v11 = vpop.f32.mrf.mxu1 }
  0xe8   :  { %v1464_v10 = vpop.f32.mrf.mxu0  ;;  %v800_v12 = vmul.f32 %v1466_v11, %v1466_v11 }
  0xe9   :  { %637 = vadd.xlane.f32.xlu0 %v629_v9  ;;  %v1474_v15 = vpop.f32.mrf.mxu1  ;;  %v630_v19 = vmul.f32 %v1464_v10, %v1464_v10  ;;  %v46_v9 = vsel %vm45_vm1, %v28_v50, %v44_v61 }
  0xea   :  { %471 = vadd.xlane.f32.xlu1 %v462_v3  ;;  %v1470_v13 = vpop.f32.mrf.mxu0  ;;  %v799_v18 = vmul.f32 %v1474_v15, %v1474_v15  ;;  %v48_v3 = vand.u32 2147483648, %v28_v50 }
  0xeb   :  { %v1486_v21 = vpop.f32.mrf.mxu1  ;;  %v463_v22 = vmul.f32 %v1470_v13, %v1470_v13 }
  0xec   :  { %v1476_v16 = vpop.f32.mrf.mxu0  ;;  %v802_v23 = vmul.f32 %v1486_v21, %v1486_v21 }
  0xed   :  { %805 = vadd.xlane.f32.xlu0 %v797_v14  ;;  %v631_v28 = vmul.f32 %v1476_v16, %v1476_v16  ;;  %v1502_v29 = vpop.f32.mrf.mxu1  ;;  %v67_v14 = vsel %vm66_vm2, %v34_v51, %v65_v62  ;;  %v76_v62 = vand.u32 2147483648, %v1542_v57 }
  0xee   :  { %811 = vadd.xlane.f32.xlu1 %v800_v12  ;;  %v1478_v17 = vpop.f32.mrf.mxu0  ;;  %v801_v31 = vmul.f32 %v1502_v29, %v1502_v29  ;;  %v69_v12 = vand.u32 2147483648, %v34_v51 }
  0xef   :  { %v464_v26 = vmul.f32 %v1478_v17, %v1478_v17  ;;  %v1528_v42 = vpop.f32.mrf.mxu1 }
  0xf0   :  { %v1484_v20 = vpop.f32.mrf.mxu0  ;;  %2127 = vst [vmem:[#allocation3_spill] sm:$0xff] %v1528_v42  ;;  %v804_v48 = vmul.f32 %v1528_v42, %v1528_v42 }
  0xf1   :  { %809 = vadd.xlane.f32.xlu0 %v799_v18  ;;  %v632_v32 = vmul.f32 %v1484_v20, %v1484_v20  ;;  %v1536_v46 = vpop.f32.mrf.mxu1  ;;  %v55_v18 = vand.u32 2147483648, %v30_v52 }
  0xf2   :  { %639 = vadd.xlane.f32.xlu1 %v630_v19  ;;  %v1492_v24 = vpop.f32.mrf.mxu0  ;;  %2129 = vst [vmem:[#allocation5_spill] sm:$0xff] %v1536_v46  ;;  %v803_v47 = vmul.f32 %v1536_v46, %v1536_v46  ;;  %v1548_v19 = vsel %vm61_vm3, %v62_v63, %v60_v6 }
  0xf3   :  { %v465_v35 = vmul.f32 %v1492_v24, %v1492_v24 }
  0xf4   :  { %v1494_v25 = vpop.f32.mrf.mxu0 }
  0xf5   :  { %473 = vadd.xlane.f32.xlu0 %v463_v22  ;;  %v633_v37 = vmul.f32 %v1494_v25, %v1494_v25  ;;  %v53_v22 = vsel %vm52_vm4, %v30_v52, %v51_v0  ;;  %v97_v0 = vand.u32 2147483648, %v1544_v60 }
  0xf6   :  { %815 = vadd.xlane.f32.xlu1 %v802_v23  ;;  %v1498_v27 = vpop.f32.mrf.mxu0  ;;  %v79_v23 = vmul.f32 %v1055_v4, %v38_v53 }
  0xf7   :  { %v466_v34 = vmul.f32 %v1498_v27, %v1498_v27 }
  0xf8   :  { %v1504_v30 = vpop.f32.mrf.mxu0 }
  0xf9   :  { %641 = vadd.xlane.f32.xlu0 %v631_v28  ;;  %v634_v38 = vmul.f32 %v1504_v30, %v1504_v30  ;;  %v1550_v28 = vsel %vm47_vm5, %v48_v3, %v46_v9 }
  0xfa   :  { %475 = vadd.xlane.f32.xlu1 %v464_v26  ;;  %v1510_v33 = vpop.f32.mrf.mxu0  ;;  %v40_v26 = vpop.xlane.xlu0 %39 }
  0xfb   :  { %v467_v41 = vmul.f32 %v1510_v33, %v1510_v33  ;;  %1060 = vrsqrt.f32 %v40_v26  ;;  %vm87_vm14 = vcmp.eq.f32.partialorder %v40_v26, inf  ;;  %vm89_vm15 = vcmp.eq.f32.partialorder %v40_v26, 0.0 }
  0xfc   :  { %v1516_v36 = vpop.f32.mrf.mxu0 }
  0xfd   :  { %813 = vadd.xlane.f32.xlu0 %v801_v31  ;;  %2126 = vst [vmem:[#allocation2_spill] sm:$0xff] %v1516_v36  ;;  %v635_v44 = vmul.f32 %v1516_v36, %v1516_v36  ;;  %v1552_v31 = vsel %vm68_vm6, %v69_v12, %v67_v14 }
  0xfe   :  { %643 = vadd.xlane.f32.xlu1 %v632_v32  ;;  %v1522_v39 = vpop.f32.mrf.mxu0  ;;  %v101_v32 = vmax.f32 %v1548_v19, 1e-15 }
  0xff   :  { %v468_v40 = vmul.f32 %v1522_v39, %v1522_v39 }
 0x100   :  { %v1530_v43 = vpop.f32.mrf.mxu0 }
 0x101   :  { %477 = vadd.xlane.f32.xlu0 %v465_v35  ;;  %2128 = vst [vmem:[#allocation4_spill] sm:$0xff] %v1530_v43  ;;  %v636_v45 = vmul.f32 %v1530_v43, %v1530_v43  ;;  %v83_v35 = vand.u32 2147483648, %v38_v53 }
 0x102   :  { %479 = vadd.xlane.f32.xlu1 %v466_v34  ;;  %v1555_v34 = vsel %vm54_vm7, %v55_v18, %v53_v22 }
 0x105   :  { %645 = vadd.xlane.f32.xlu0 %v633_v37  ;;  %v99_v37 = vmax.f32 %v1550_v28, 1e-15 }
 0x106   :  { %647 = vadd.xlane.f32.xlu1 %v634_v38  ;;  %v81_v38 = vsel %vm80_vm8, %v38_v53, %v79_v23  ;;  %v90_v23 = vand.u32 2147483648, %v40_v26 }
 0x109   :  { %481 = vadd.xlane.f32.xlu0 %v467_v41  ;;  %v100_v41 = vmax.f32 %v1555_v34, 1e-15 }
 0x10a   :  { %483 = vadd.xlane.f32.xlu1 %v468_v40  ;;  %v102_v40 = vmax.f32 %v1552_v31, 1e-15 }
 0x10b   :  { %v970_v51 = vclamps-f32 %v100_v41, 0.9999999 }
 0x10c   :  { %v972_v50 = vclamps-f32 %v102_v40, 0.9999999 }
 0x10d   :  { %649 = vadd.xlane.f32.xlu0 %v635_v44  ;;  %v971_v44 = vclamps-f32 %v101_v32, 0.9999999  ;;  %v132_v59 = vsub.f32 1.0, %v970_v51 }
 0x10e   :  { %651 = vadd.xlane.f32.xlu1 %v636_v45  ;;  %v1562_v45 = vsel %vm82_vm9, %v83_v35, %v81_v38  ;;  %v134_v58 = vsub.f32 1.0, %v972_v50 }
 0x10f   :  { %v104_v52 = vmax.f32 %v1562_v45, 1e-15  ;;  %v133_v53 = vsub.f32 1.0, %v971_v44 }
 0x111   :  { %817 = vadd.xlane.f32.xlu0 %v803_v47  ;;  %v1057_v47 = vpop.eup %1056  ;;  %v974_v61 = vclamps-f32 %v104_v52, 0.9999999  ;;  %1062 = vrcp.f32 %v133_v53 }
 0x112   :  { %819 = vadd.xlane.f32.xlu1 %v804_v48  ;;  %v969_v48 = vclamps-f32 %v99_v37, 0.9999999  ;;  %v1059_v49 = vpop.eup %1058  ;;  %v72_v54 = vmul.f32 %v1057_v47, %v1542_v57 }
 0x113   :  { %v93_v56 = vmul.f32 %v1059_v49, %v1544_v60  ;;  %v1061_v4 = vpop.eup %1060  ;;  %v136_v3 = vsub.f32 1.0, %v974_v61  ;;  %v125_v49 = vadd.f32 1.0, %v971_v44 }
 0x114   :  { %v131_v55 = vsub.f32 1.0, %v969_v48  ;;  %v74_v63 = vsel %vm73_vm10, %v1542_v57, %v72_v54  ;;  %v86_v14 = vmul.f32 %v1061_v4, %v40_v26  ;;  %v123_v54 = vadd.f32 1.0, %v969_v48 }
 0x115   :  { %v95_v6 = vsel %vm94_vm11, %v1544_v60, %v93_v56  ;;  %v77_v9 = vsel %vm75_vm12, %v76_v62, %v74_v63  ;;  %v124_v62 = vadd.f32 1.0, %v970_v51 }
 0x116   :  { %1064 = vrcp.f32 %v131_v55  ;;  %v98_v12 = vsel %vm96_vm13, %v97_v0, %v95_v6  ;;  %v103_v18 = vmax.f32 %v77_v9, 1e-15  ;;  %v88_v57 = vsel %vm87_vm14, %v40_v26, %v86_v14 }
 0x117   :  { %1066 = vrcp.f32 %v134_v58  ;;  %v106_v22 = vmax.f32 %v98_v12, 1e-15  ;;  %v91_v47 = vsel %vm89_vm15, %v90_v23, %v88_v57  ;;  %v126_v55 = vadd.f32 1.0, %v972_v50 }
 0x118   :  { %1068 = vrcp.f32 %v132_v59  ;;  %v973_v35 = vclamps-f32 %v103_v18, 0.9999999  ;;  %v105_v58 = vmax.f32 %v91_v47, 1e-15  ;;  %v128_v12 = vadd.f32 1.0, %v974_v61 }
 0x119   :  { %1070 = vrcp.f32 %v136_v3  ;;  %v976_v38 = vclamps-f32 %v106_v22, 0.9999999 }
 0x11a   :  { %v135_v56 = vsub.f32 1.0, %v973_v35  ;;  %v975_v9 = vclamps-f32 %v105_v58, 0.9999999  ;;  %v127_v57 = vadd.f32 1.0, %v973_v35 }
 0x11b   :  { %v138_v63 = vsub.f32 1.0, %v976_v38 }
 0x11c   :  { %1072 = vrcp.f32 %v135_v56  ;;  %v137_v44 = vsub.f32 1.0, %v975_v9 }
 0x11d   :  { %1074 = vrcp.f32 %v138_v63 }
 0x11e   :  { %v1063_v53 = vpop.eup %1062 }
 0x11f   :  { %v144_v4 = vmul.f32 %v1063_v53, %v125_v49 }
 0x121   :  { %1076 = vlog2.f32 %v144_v4 }
 0x123   :  { %v1065_v60 = vpop.eup %1064 }
 0x124   :  { %v1067_v59 = vpop.eup %1066  ;;  %v140_v6 = vmul.f32 %v1065_v60, %v123_v54 }
 0x125   :  { %v1069_v0 = vpop.eup %1068  ;;  %v146_v3 = vmul.f32 %v1067_v59, %v126_v55 }
 0x126   :  { %v142_v26 = vmul.f32 %v1069_v0, %v124_v62  ;;  %v1071_v14 = vpop.eup %1070  ;;  %1078 = vlog2.f32 %v140_v6 }
 0x127   :  { %1080 = vlog2.f32 %v146_v3  ;;  %v150_v48 = vmul.f32 %v1071_v14, %v128_v12 }
 0x128   :  { %1082 = vlog2.f32 %v142_v26 }
 0x129   :  { %1084 = vrcp.f32 %v137_v44  ;;  %v1073_v50 = vpop.eup %1072 }
 0x12a   :  { %1086 = vlog2.f32 %v150_v48  ;;  %v1075_v51 = vpop.eup %1074  ;;  %v148_v34 = vmul.f32 %v1073_v50, %v127_v57 }
 0x12b   :  { %1088 = vrcp.f32 %v101_v32  ;;  %v130_v32 = vadd.f32 1.0, %v976_v38 }
 0x12c   :  { %1090 = vrcp.f32 %v99_v37 }
 0x12d   :  { %1092 = vrcp.f32 %v102_v40  ;;  %v129_v40 = vadd.f32 1.0, %v975_v9  ;;  %v154_v47 = vmul.f32 %v1075_v51, %v130_v32 }
 0x12e   :  { %1094 = vrcp.f32 %v100_v41  ;;  %v1077_v61 = vpop.eup %1076 }
 0x12f   :  { %1096 = vrcp.f32 %v104_v52  ;;  %v160_v45 = vmul.f32 0.6931472, %v1077_v61 }
 0x130   :  { %1098 = vrcp.f32 %v103_v18 }
 0x131   :  { %1100 = vrcp.f32 %v106_v22  ;;  %v173_v56 = vmul.f32 0.5, %v160_v45 }
 0x133   :  { %v1079_v23 = vpop.eup %1078 }
 0x134   :  { %v1081_v19 = vpop.eup %1080  ;;  %v156_v41 = vmul.f32 0.6931472, %v1079_v23 }
 0x135   :  { %v1083_v37 = vpop.eup %1082  ;;  %v162_v22 = vmul.f32 0.6931472, %v1081_v19 }
 0x136   :  { %v1085_v52 = vpop.eup %1084  ;;  %v158_v18 = vmul.f32 0.6931472, %v1083_v37  ;;  %v171_v55 = vmul.f32 0.5, %v156_v41 }
 0x137   :  { %v1087_v38 = vpop.eup %1086  ;;  %v152_v60 = vmul.f32 %v1085_v52, %v129_v40  ;;  %v174_v62 = vmul.f32 0.5, %v162_v22 }
 0x138   :  { %v1089_v53 = vpop.eup %1088  ;;  %v166_v0 = vmul.f32 0.6931472, %v1087_v38 }
 0x139   :  { %v1091_v54 = vpop.eup %1090  ;;  %v1615_v26 = vmul.f32 %v1089_v53, %v173_v56 }
 0x13a   :  { %v1093_v59 = vpop.eup %1092  ;;  %v1613_v9 = vmul.f32 %v1091_v54, %v171_v55  ;;  %v1626_v50 = vmul.f32 0.5, %v166_v0 }
 0x13b   :  { %v1095_v4 = vpop.eup %1094  ;;  %v1622_v44 = vmul.f32 %v1093_v59, %v174_v62 }
 0x13c   :  { %v1611_v3 = vpop.eup %1096 }
 0x13d   :  { %v1617_v12 = vpop.eup %1098 }
 0x13e   :  { %v1628_v51 = vpop.eup %1100 }
 0x16e   :  { %v1593_v28 = vpop.xlane.xlu0 %469 }
 0x16f   :  { %v1595_v31 = vpop.xlane.xlu1 %807  ;;  %1102 = vrsqrt.f32 %v1593_v28  ;;  %vm487_vm0 = vcmp.eq.f32.partialorder %v1593_v28, inf  ;;  %vm489_vm2 = vcmp.eq.f32.partialorder %v1593_v28, 0.0  ;;  %v490_v61 = vand.u32 2147483648, %v1593_v28 }
 0x170   :  { %1104 = vrsqrt.f32 %v1595_v31  ;;  %vm830_vm1 = vcmp.eq.f32.partialorder %v1595_v31, inf  ;;  %vm832_vm3 = vcmp.eq.f32.partialorder %v1595_v31, 0.0  ;;  %v833_v19 = vand.u32 2147483648, %v1595_v31 }
 0x171   :  { %1106 = vrcp.f32 %v105_v58  ;;  %v172_v58 = vmul.f32 0.5, %v158_v18 }
 0x172   :  { %v1599_v35 = vpop.xlane.xlu0 %637 }
 0x173   :  { %v1601_v49 = vpop.xlane.xlu1 %471  ;;  %1108 = vrsqrt.f32 %v1599_v35  ;;  %v1619_v14 = vmul.f32 %v1095_v4, %v172_v58  ;;  %vm655_vm4 = vcmp.eq.f32.partialorder %v1599_v35, inf  ;;  %vm657_vm6 = vcmp.eq.f32.partialorder %v1599_v35, 0.0 }
 0x174   :  { %1110 = vrsqrt.f32 %v1601_v49  ;;  %vm494_vm5 = vcmp.eq.f32.partialorder %v1601_v49, inf  ;;  %vm496_vm7 = vcmp.eq.f32.partialorder %v1601_v49, 0.0  ;;  %v497_v41 = vand.u32 2147483648, %v1601_v49 }
 0x175   :  { %1112 = vlog2.f32 %v148_v34  ;;  %v658_v34 = vand.u32 2147483648, %v1599_v35 }
 0x176   :  { %1114 = vlog2.f32 %v154_v47  ;;  %v1605_v63 = vpop.xlane.xlu0 %805 }
 0x177   :  { %v1607_v6 = vpop.xlane.xlu1 %811  ;;  %1116 = vrsqrt.f32 %v1605_v63  ;;  %vm823_vm8 = vcmp.eq.f32.partialorder %v1605_v63, inf  ;;  %vm825_vm10 = vcmp.eq.f32.partialorder %v1605_v63, 0.0  ;;  %v826_v18 = vand.u32 2147483648, %v1605_v63 }
 0x178   :  { %1118 = vrsqrt.f32 %v1607_v6  ;;  %vm844_vm9 = vcmp.eq.f32.partialorder %v1607_v6, inf  ;;  %vm846_vm11 = vcmp.eq.f32.partialorder %v1607_v6, 0.0  ;;  %v847_v58 = vand.u32 2147483648, %v1607_v6 }
 0x179   :  { %1120 = vlog2.f32 %v152_v60 }
 0x17a   :  { %v1624_v48 = vpop.xlane.xlu0 %809 }
 0x17b   :  { %v1633_v23 = vpop.xlane.xlu1 %639  ;;  %1122 = vrsqrt.f32 %v1624_v48  ;;  %vm837_vm12 = vcmp.eq.f32.partialorder %v1624_v48, inf  ;;  %vm839_vm14 = vcmp.eq.f32.partialorder %v1624_v48, 0.0 }
 0x17c   :  { %v1103_v57 = vpop.eup %1102  ;;  %1124 = vrsqrt.f32 %v1633_v23  ;;  %vm662_vm13 = vcmp.eq.f32.partialorder %v1633_v23, inf  ;;  %vm664_vm15 = vcmp.eq.f32.partialorder %v1633_v23, 0.0 }
 0x17d   :  { %v1105_v32 = vpop.eup %1104  ;;  %v486_v37 = vmul.f32 %v1103_v57, %v1593_v28 }
 0x17e   :  { %v829_v40 = vmul.f32 %v1105_v32, %v1595_v31  ;;  %v1648_v45 = vpop.xlane.xlu0 %473  ;;  %v1650_v52 = vpop.eup %1106 }
 0x17f   :  { %v488_v47 = vsel %vm487_vm0, %v1593_v28, %v486_v37  ;;  %v1658_v22 = vpop.xlane.xlu1 %815  ;;  %1126 = vrsqrt.f32 %v1648_v45  ;;  %vm501_vm0 = vcmp.eq.f32.partialorder %v1648_v45, inf }
 0x180   :  { %v1109_v38 = vpop.eup %1108  ;;  %v831_v53 = vsel %vm830_vm1, %v1595_v31, %v829_v40  ;;  %v491_v54 = vsel %vm489_vm2, %v490_v61, %v488_v47  ;;  %1128 = vrsqrt.f32 %v1658_v22  ;;  %v840_v61 = vand.u32 2147483648, %v1624_v48 }
 0x181   :  { %v1111_v60 = vpop.eup %1110  ;;  %v834_v55 = vsel %vm832_vm3, %v833_v19, %v831_v53  ;;  %v541_v56 = vmax.f32 %v491_v54, 1e-15  ;;  %v654_v59 = vmul.f32 %v1109_v38, %v1599_v35  ;;  %v665_v40 = vand.u32 2147483648, %v1633_v23 }
 0x182   :  { %v1672_v62 = vpop.eup %1112  ;;  %v878_v0 = vmax.f32 %v834_v55, 1e-15  ;;  %v493_v4 = vmul.f32 %v1111_v60, %v1601_v49  ;;  %v1677_v57 = vpop.xlane.xlu0 %641  ;;  %vm503_vm1 = vcmp.eq.f32.partialorder %v1648_v45, 0.0 }
 0x183   :  { %v1679_v32 = vpop.eup %1114  ;;  %v549_v19 = vmul.f32 %v541_v56, %v1613_v9  ;;  %1130 = vrcp.f32 %v541_v56  ;;  %v656_v37 = vsel %vm655_vm4, %v1599_v35, %v654_v59  ;;  %v1688_v47 = vpop.xlane.xlu1 %475  ;;  %vm858_vm4 = vcmp.eq.f32.partialorder %v1658_v22, inf }
 0x184   :  { %v1117_v38 = vpop.eup %1116  ;;  %v886_v53 = vmul.f32 %v878_v0, %v1619_v14  ;;  %1132 = vrcp.f32 %v878_v0  ;;  %v495_v54 = vsel %vm494_vm5, %v1601_v49, %v493_v4  ;;  %v659_v60 = vsel %vm657_vm6, %v658_v34, %v656_v37 }
 0x185   :  { %v1119_v55 = vpop.eup %1118  ;;  %1134 = vtanh.f32 %v549_v19  ;;  %v498_v56 = vsel %vm496_vm7, %v497_v41, %v495_v54  ;;  %v709_v59 = vmax.f32 %v659_v60, 1e-15  ;;  %v822_v46 = vmul.f32 %v1117_v38, %v1605_v63 }
 0x186   :  { %v1700_v42 = vpop.eup %1120  ;;  %1136 = vtanh.f32 %v886_v53  ;;  %v542_v0 = vmax.f32 %v498_v56, 1e-15  ;;  %v843_v36 = vmul.f32 %v1119_v55, %v1607_v6  ;;  %v1704_v4 = vpop.xlane.xlu0 %813  ;;  %vm860_vm5 = vcmp.eq.f32.partialorder %v1658_v22, 0.0 }
 0x187   :  { %v717_v34 = vmul.f32 %v709_v59, %v1613_v9  ;;  %1138 = vrcp.f32 %v709_v59  ;;  %v824_v41 = vsel %vm823_vm8, %v1605_v63, %v822_v46  ;;  %v1711_v19 = vpop.xlane.xlu1 %643 }
 0x188   :  { %v1123_v37 = vpop.eup %1122  ;;  %v550_v38 = vmul.f32 %v542_v0, %v1619_v14  ;;  %1140 = vrcp.f32 %v542_v0  ;;  %v845_v53 = vsel %vm844_vm9, %v1607_v6, %v843_v36  ;;  %v827_v54 = vsel %vm825_vm10, %v826_v18, %v824_v41 }
 0x189   :  { %v1125_v60 = vpop.eup %1124  ;;  %1142 = vtanh.f32 %v717_v34  ;;  %v848_v46 = vsel %vm846_vm11, %v847_v58, %v845_v53  ;;  %v877_v55 = vmax.f32 %v827_v54, 1e-15  ;;  %v836_v56 = vmul.f32 %v1123_v37, %v1624_v48 }
 0x18a   :  { %1144 = vtanh.f32 %v550_v38  ;;  %v880_v59 = vmax.f32 %v848_v46, 1e-15  ;;  %v661_v43 = vmul.f32 %v1125_v60, %v1633_v23  ;;  %v1737_v37 = vpop.xlane.xlu0 %477  ;;  %vm676_vm8 = vcmp.eq.f32.partialorder %v1711_v19, inf }
 0x18b   :  { %v885_v0 = vmul.f32 %v877_v55, %v1613_v9  ;;  %1146 = vrcp.f32 %v877_v55  ;;  %v838_v36 = vsel %vm837_vm12, %v1624_v48, %v836_v56  ;;  %v1729_v18 = vpop.xlane.xlu1 %479  ;;  %v504_v56 = vand.u32 2147483648, %v1648_v45 }
 0x18c   :  { %v1127_v58 = vpop.eup %1126  ;;  %v888_v34 = vmul.f32 %v880_v59, %v1622_v44  ;;  %1148 = vrcp.f32 %v880_v59  ;;  %v663_v41 = vsel %vm662_vm13, %v1633_v23, %v661_v43  ;;  %v841_v9 = vsel %vm839_vm14, %v840_v61, %v838_v36 }
 0x18d   :  { %v1129_v38 = vpop.eup %1128  ;;  %1150 = vtanh.f32 %v885_v0  ;;  %v666_v53 = vsel %vm664_vm15, %v665_v40, %v663_v41  ;;  %v879_v54 = vmax.f32 %v841_v9, 1e-15  ;;  %v500_v60 = vmul.f32 %v1127_v58, %v1648_v45 }
 0x18e   :  { %1152 = vtanh.f32 %v888_v34  ;;  %v710_v46 = vmax.f32 %v666_v53, 1e-15  ;;  %v857_v55 = vmul.f32 %v1129_v38, %v1658_v22  ;;  %v861_v61 = vand.u32 2147483648, %v1658_v22 }
 0x18f   :  { %v887_v43 = vmul.f32 %v879_v54, %v1615_v26  ;;  %1154 = vrcp.f32 %v879_v54  ;;  %v502_v59 = vsel %vm501_vm0, %v1648_v45, %v500_v60  ;;  %v1757_v38 = vpop.xlane.xlu1 %647  ;;  %v1763_v60 = vpop.xlane.xlu0 %645  ;;  %vm2125_vm9 = vcmp.eq.f32.partialorder %v1711_v19, 0.0 }
 0x190   :  { %v1131_v0 = vpop.eup %1130  ;;  %v718_v40 = vmul.f32 %v710_v46, %v1619_v14  ;;  %1156 = vrcp.f32 %v710_v46  ;;  %v859_v36 = vsel %vm858_vm4, %v1658_v22, %v857_v55  ;;  %v505_v58 = vsel %vm503_vm1, %v504_v56, %v502_v59 }
 0x191   :  { %v1133_v34 = vpop.eup %1132  ;;  %1158 = vtanh.f32 %v887_v43  ;;  %v862_v41 = vsel %vm860_vm5, %v861_v61, %v859_v36  ;;  %v543_v9 = vmax.f32 %v505_v58, 1e-15  ;;  %v1761_v14 = vmul.f32 %v1611_v3, %v1626_v50 }
 0x192   :  { %v1135_v53 = vpop.eup %1134  ;;  %1160 = vtanh.f32 %v718_v40  ;;  %v882_v54 = vmax.f32 %v862_v41, 1e-15  ;;  %v164_v40 = vmul.f32 0.6931472, %v1672_v62  ;;  %v170_v50 = vmul.f32 0.6931472, %v1679_v32 }
 0x193   :  { %v1137_v46 = vpop.eup %1136  ;;  %v565_v55 = vmul.f32 %v1135_v53, %v1446_v1  ;;  %v551_v56 = vmul.f32 %v543_v9, %v1615_v26  ;;  %1162 = vrcp.f32 %v543_v9  ;;  %v168_v58 = vmul.f32 0.6931472, %v1700_v42  ;;  %v1785_v32 = vpop.xlane.xlu0 %481 }
 0x194   :  { %v1139_v43 = vpop.eup %1138  ;;  %v902_v61 = vmul.f32 %v1137_v46, %v1448_v2  ;;  %v890_v59 = vmul.f32 %v882_v54, %v1761_v14  ;;  %1164 = vrcp.f32 %v882_v54  ;;  %v1776_v54 = vpop.xlane.xlu1 %483  ;;  %v175_v28 = vmul.f32 0.5, %v164_v40 }
 0x195   :  { %v1141_v36 = vpop.eup %1140  ;;  %v574_v3 = vmul.f32 %v1131_v0, %v565_v55  ;;  %1166 = vtanh.f32 %v551_v56  ;;  %v178_v31 = vmul.f32 0.5, %v170_v50  ;;  %v177_v46 = vmul.f32 0.5, %v168_v58 }
 0x196   :  { %v1143_v41 = vpop.eup %1142  ;;  %v912_v1 = vmul.f32 %v1133_v34, %v902_v61  ;;  %1168 = vtanh.f32 %v890_v59  ;;  %vm522_vm12 = vcmp.eq.f32.partialorder %v1729_v18, inf  ;;  %vm2123_vm13 = vcmp.eq.f32.partialorder %v1729_v18, 0.0 }
 0x197   :  { %v1145_v53 = vpop.eup %1144  ;;  %v613_v9 = vsel %vm489_vm2, 0.0, %v574_v3  ;;  %v733_v2 = vmul.f32 %v1143_v41, %v1452_v5  ;;  %1170 = vrsqrt.f32 %v1688_v47  ;;  %v1803_v3 = vmul.f32 %v1617_v12, %v175_v28 }
 0x198   :  { %v1147_v62 = vpop.eup %1146  ;;  %v950_v0 = vsel %vm832_vm3, 0.0, %v912_v1  ;;  %621 = vst [vmem:[%s2117_s2] sm:$0xff] %v613_v9  ;;  %v566_v42 = vmul.f32 %v1145_v53, %v1458_v8  ;;  %1172 = vrsqrt.f32 %v1677_v57  ;;  %v1811_v49 = vmul.f32 %v1628_v51, %v178_v31  ;;  %v1821_v1 = vpop.xlane.xlu0 %649 }
 0x199   :  { %v1149_v5 = vpop.eup %1148  ;;  %958 = vst [vmem:[%s2117_s2 + $0x28] sm:$0xff] %v950_v0  ;;  %v742_v34 = vmul.f32 %v1139_v43, %v733_v2  ;;  %1174 = vrsqrt.f32 %v1711_v19  ;;  %v1814_v50 = vmul.f32 %v1650_v52, %v177_v46  ;;  %vm508_vm2 = vcmp.eq.f32.partialorder %v1688_v47, inf }
 0x19a   :  { %v1151_v55 = vpop.eup %1150  ;;  %v576_v56 = vmul.f32 %v1141_v36, %v566_v42  ;;  %1176 = vrsqrt.f32 %v1704_v4  ;;  %v511_v41 = vand.u32 2147483648, %v1688_v47  ;;  %vm510_vm3 = vcmp.eq.f32.partialorder %v1688_v47, 0.0 }
 0x19b   :  { %v1153_v8 = vpop.eup %1152  ;;  %v781_v61 = vsel %vm657_vm6, 0.0, %v742_v34  ;;  %v901_v59 = vmul.f32 %v1151_v55, %v1456_v7  ;;  %1178 = vrsqrt.f32 %v1729_v18  ;;  %vm669_vm6 = vcmp.eq.f32.partialorder %v1677_v57, inf }
 0x19c   :  { %v1155_v40 = vpop.eup %1154  ;;  %v614_v43 = vsel %vm496_vm7, 0.0, %v576_v56  ;;  %789 = vst [vmem:[%s2117_s2 + $0x8] sm:$0xff] %v781_v61  ;;  %v904_v36 = vmul.f32 %v1153_v8, %v1466_v11  ;;  %1180 = vrsqrt.f32 %v1737_v37  ;;  %v1816_v11 = vpop.xlane.xlu1 %651  ;;  %v672_v52 = vand.u32 2147483648, %v1677_v57 }
 0x19d   :  { %v1157_v35 = vpop.eup %1156  ;;  %622 = vst [vmem:[%s2117_s2 + $0x18] sm:$0xff] %v614_v43  ;;  %v910_v7 = vmul.f32 %v1147_v62, %v901_v59  ;;  %1182 = vrsqrt.f32 %v1757_v38  ;;  %vm671_vm7 = vcmp.eq.f32.partialorder %v1677_v57, 0.0  ;;  %v525_v42 = vand.u32 2147483648, %v1729_v18 }
 0x19e   :  { %v1159_v12 = vpop.eup %1158  ;;  %v916_v58 = vmul.f32 %v1149_v5, %v904_v36  ;;  %1184 = vrsqrt.f32 %v1763_v60  ;;  %v518_v34 = vand.u32 2147483648, %v1737_v37  ;;  %v693_v31 = vand.u32 2147483648, %v1757_v38 }
 0x19f   :  { %v1161_v53 = vpop.eup %1160  ;;  %v949_v51 = vsel %vm825_vm10, 0.0, %v910_v7  ;;  %v903_v9 = vmul.f32 %v1159_v12, %v1474_v15  ;;  %1186 = vrsqrt.f32 %v1776_v54  ;;  %v679_v15 = vand.u32 2147483648, %v1711_v19 }
 0x1a0   :  { %v1163_v2 = vpop.eup %1162  ;;  %v952_v62 = vsel %vm846_vm11, 0.0, %v916_v58  ;;  %957 = vst [vmem:[%s2117_s2 + $0x10] sm:$0xff] %v949_v51  ;;  %v734_v63 = vmul.f32 %v1161_v53, %v1464_v10  ;;  %1188 = vrsqrt.f32 %v1785_v32  ;;  %vm851_vm10 = vcmp.eq.f32.partialorder %v1704_v4, inf }
 0x1a1   :  { %v1165_v0 = vpop.eup %1164  ;;  %960 = vst [vmem:[%s2117_s2 + $0x58] sm:$0xff] %v952_v62  ;;  %v914_v6 = vmul.f32 %v1155_v40, %v903_v9  ;;  %v854_v10 = vand.u32 2147483648, %v1704_v4  ;;  %vm2122_vm11 = vcmp.eq.f32.partialorder %v1704_v4, 0.0  ;;  %v686_v46 = vand.u32 2147483648, %v1763_v60  ;;  %v1857_v40 = vpop.xlane.xlu1 %819 }
 0x1a2   :  { %v1167_v28 = vpop.eup %1166  ;;  %v744_v5 = vmul.f32 %v1157_v35, %v734_v63  ;;  %v539_v61 = vand.u32 2147483648, %v1776_v54  ;;  %v532_v59 = vand.u32 2147483648, %v1785_v32  ;;  %1190 = vrsqrt.f32 %v1816_v11  ;;  %v1869_v35 = vpop.xlane.xlu0 %817 }
 0x1a3   :  { %v1169_v55 = vpop.eup %1168  ;;  %v951_v56 = vsel %vm839_vm14, 0.0, %v914_v6  ;;  %v567_v8 = vmul.f32 %v1167_v28, %v1470_v13  ;;  %vm515_vm14 = vcmp.eq.f32.partialorder %v1737_v37, inf  ;;  %v707_v13 = vand.u32 2147483648, %v1816_v11 }
 0x1a4   :  { %v1171_v43 = vpop.eup %1170  ;;  %v782_v36 = vsel %vm664_vm15, 0.0, %v744_v5  ;;  %959 = vst [vmem:[%s2117_s2 + $0x40] sm:$0xff] %v951_v56  ;;  %v906_v48 = vmul.f32 %v1169_v55, %v1486_v21  ;;  %vm2124_vm15 = vcmp.eq.f32.partialorder %v1737_v37, 0.0  ;;  %1192 = vrsqrt.f32 %v1821_v1 }
 0x1a5   :  { %v1173_v7 = vpop.eup %1172  ;;  %790 = vst [vmem:[%s2117_s2 + $0x20] sm:$0xff] %v782_v36  ;;  %v578_v23 = vmul.f32 %v1163_v2, %v567_v8  ;;  %v507_v12 = vmul.f32 %v1171_v43, %v1688_v47  ;;  %v700_v21 = vand.u32 2147483648, %v1821_v1  ;;  %1194 = vrsqrt.f32 %v1857_v40 }
 0x1a6   :  { %v1175_v58 = vpop.eup %1174  ;;  %v920_v53 = vmul.f32 %v1165_v0, %v906_v48  ;;  %v668_v51 = vmul.f32 %v1173_v7, %v1677_v57  ;;  %v875_v9 = vand.u32 2147483648, %v1857_v40  ;;  %1196 = vrsqrt.f32 %v1869_v35 }
 0x1a7   :  { %v1177_v62 = vpop.eup %1176  ;;  %v615_v2 = vsel %vm503_vm1, 0.0, %v578_v23  ;;  %v509_v63 = vsel %vm508_vm2, %v1688_v47, %v507_v12  ;;  %v675_v6 = vmul.f32 %v1175_v58, %v1711_v19  ;;  %vm690_vm0 = vcmp.eq.f32.partialorder %v1757_v38, inf }
 0x1a8   :  { %v1179_v28 = vpop.eup %1178  ;;  %v954_v0 = vsel %vm860_vm5, 0.0, %v920_v53  ;;  %623 = vst [vmem:[%s2117_s2 + $0x30] sm:$0xff] %v615_v2  ;;  %v512_v45 = vsel %vm510_vm3, %v511_v41, %v509_v63  ;;  %v670_v5 = vsel %vm669_vm6, %v1677_v57, %v668_v51  ;;  %v850_v55 = vmul.f32 %v1177_v62, %v1704_v4 }
 0x1a9   :  { %vm683_vm1 = vcmp.eq.f32.partialorder %v1763_v60, inf  ;;  %v1181_v22 = vpop.eup %1180  ;;  %962 = vst [vmem:[%s2117_s2 + $0x88] sm:$0xff] %v954_v0  ;;  %v544_v56 = vmax.f32 %v512_v45, 1e-15  ;;  %v673_v41 = vsel %vm671_vm7, %v672_v52, %v670_v5  ;;  %v677_v8 = vsel %vm676_vm8, %v1711_v19, %v675_v6 }
 0x1aa   :  { %v521_v43 = vmul.f32 %v1179_v28, %v1729_v18  ;;  %vm692_vm4 = vcmp.eq.f32.partialorder %v1757_v38, 0.0  ;;  %vm685_vm5 = vcmp.eq.f32.partialorder %v1763_v60, 0.0  ;;  %vm536_vm2 = vcmp.eq.f32.partialorder %v1776_v54, inf  ;;  %v1183_v36 = vpop.eup %1182 }
 0x1ab   :  { %v711_v48 = vmax.f32 %v673_v41, 1e-15  ;;  %v680_v7 = vsel %vm2125_vm9, %v679_v15, %v677_v8  ;;  %v852_v52 = vsel %vm851_vm10, %v1704_v4, %v850_v55  ;;  %v514_v23 = vmul.f32 %v1181_v22, %v1737_v37  ;;  %v1185_v12 = vpop.eup %1184 }
 0x1ac   :  { %vm538_vm6 = vcmp.eq.f32.partialorder %v1776_v54, 0.0  ;;  %v552_v58 = vmul.f32 %v544_v56, %v1622_v44  ;;  %1198 = vrcp.f32 %v544_v56  ;;  %v712_v53 = vmax.f32 %v680_v7, 1e-15  ;;  %v1187_v15 = vpop.eup %1186 }
 0x1ad   :  { %v855_v51 = vsel %vm2122_vm11, %v854_v10, %v852_v52  ;;  %vm529_vm8 = vcmp.eq.f32.partialorder %v1785_v32, inf  ;;  %v719_v62 = vmul.f32 %v711_v48, %v1615_v26  ;;  %1200 = vrcp.f32 %v711_v48  ;;  %v1189_v6 = vpop.eup %1188 }
 0x1ae   :  { %v881_v2 = vmax.f32 %v855_v51, 1e-15  ;;  %v523_v63 = vsel %vm522_vm12, %v1729_v18, %v521_v43  ;;  %vm531_vm10 = vcmp.eq.f32.partialorder %v1785_v32, 0.0  ;;  %1202 = vtanh.f32 %v552_v58 }
 0x1af   :  { %v720_v28 = vmul.f32 %v712_v53, %v1622_v44  ;;  %v526_v10 = vsel %vm2123_vm13, %v525_v42, %v523_v63  ;;  %v516_v26 = vsel %vm515_vm14, %v1737_v37, %v514_v23  ;;  %vm704_vm11 = vcmp.eq.f32.partialorder %v1816_v11, inf }
 0x1b0   :  { %1204 = vtanh.f32 %v719_v62  ;;  %v889_v0 = vmul.f32 %v881_v2, %v1803_v3  ;;  %v546_v45 = vmax.f32 %v526_v10, 1e-15  ;;  %v519_v44 = vsel %vm2124_vm15, %v518_v34, %v516_v26  ;;  %v1191_v34 = vpop.eup %1190 }
 0x1b1   :  { %vm706_vm12 = vcmp.eq.f32.partialorder %v1816_v11, 0.0  ;;  %1206 = vtanh.f32 %v720_v28  ;;  %v545_v5 = vmax.f32 %v519_v44, 1e-15  ;;  %v689_v42 = vmul.f32 %v1183_v36, %v1757_v38  ;;  %v1193_v48 = vpop.eup %1192 }
 0x1b2   :  { %v682_v55 = vmul.f32 %v1185_v12, %v1763_v60  ;;  %1208 = vrcp.f32 %v712_v53  ;;  %v554_v22 = vmul.f32 %v546_v45, %v1761_v14  ;;  %v535_v56 = vmul.f32 %v1187_v15, %v1776_v54  ;;  %v1195_v12 = vpop.eup %1194 }
 0x1b3   :  { %v528_v41 = vmul.f32 %v1189_v6, %v1785_v32  ;;  %vm697_vm14 = vcmp.eq.f32.partialorder %v1821_v1, inf  ;;  %vm872_vm13 = vcmp.eq.f32.partialorder %v1857_v40, inf  ;;  %1210 = vtanh.f32 %v889_v0 }
 0x1b4   :  { %v553_v8 = vmul.f32 %v545_v5, %v1803_v3  ;;  %v691_v43 = vsel %vm690_vm0, %v1757_v38, %v689_v42  ;;  %v684_v36 = vsel %vm683_vm1, %v1763_v60, %v682_v55  ;;  %vm699_vm15 = vcmp.eq.f32.partialorder %v1821_v1, 0.0 }
 0x1b5   :  { %vm874_vm9 = vcmp.eq.f32.partialorder %v1857_v40, 0.0  ;;  %1212 = vrcp.f32 %v881_v2  ;;  %v694_v7 = vsel %vm692_vm4, %v693_v31, %v691_v43  ;;  %v687_v52 = vsel %vm685_vm5, %v686_v46, %v684_v36  ;;  %v1197_v31 = vpop.eup %1196 }
 0x1b6   :  { %v537_v23 = vsel %vm536_vm2, %v1776_v54, %v535_v56  ;;  %1214 = vtanh.f32 %v554_v22  ;;  %v714_v58 = vmax.f32 %v694_v7, 1e-15  ;;  %v713_v53 = vmax.f32 %v687_v52, 1e-15 }
 0x1b7   :  { %v540_v51 = vsel %vm538_vm6, %v539_v61, %v537_v23  ;;  %vm865_vm0 = vcmp.eq.f32.partialorder %v1869_v35, inf  ;;  %1216 = vrcp.f32 %v546_v45  ;;  %v530_v46 = vsel %vm529_vm8, %v1785_v32, %v528_v41 }
 0x1b8   :  { %v548_v15 = vmax.f32 %v540_v51, 1e-15  ;;  %v703_v62 = vmul.f32 %v1191_v34, %v1816_v11  ;;  %1218 = vtanh.f32 %v553_v8  ;;  %v722_v2 = vmul.f32 %v714_v58, %v1761_v14 }
 0x1b9   :  { %v721_v63 = vmul.f32 %v713_v53, %v1803_v3  ;;  %v533_v61 = vsel %vm531_vm10, %v532_v59, %v530_v46  ;;  %1220 = vrcp.f32 %v545_v5  ;;  %v696_v3 = vmul.f32 %v1193_v48, %v1821_v1  ;;  %v1199_v0 = vpop.eup %1198 }
 0x1ba   :  { %v556_v6 = vmul.f32 %v548_v15, %v1811_v49  ;;  %v547_v28 = vmax.f32 %v533_v61, 1e-15  ;;  %v705_v10 = vsel %vm704_vm11, %v1816_v11, %v703_v62  ;;  %1222 = vtanh.f32 %v722_v2  ;;  %v1201_v44 = vpop.eup %1200 }
 0x1bb   :  { %v708_v14 = vsel %vm706_vm12, %v707_v13, %v705_v10  ;;  %v871_v26 = vmul.f32 %v1195_v12, %v1857_v40  ;;  %1224 = vrcp.f32 %v714_v58  ;;  %v864_v45 = vmul.f32 %v1197_v31, %v1869_v35  ;;  %v1203_v55 = vpop.eup %1202 }
 0x1bc   :  { %v716_v59 = vmax.f32 %v708_v14, 1e-15  ;;  %vm867_vm1 = vcmp.eq.f32.partialorder %v1869_v35, 0.0  ;;  %1226 = vtanh.f32 %v721_v63  ;;  %v555_v5 = vmul.f32 %v547_v28, %v1814_v50 }
 0x1bd   :  { %v698_v42 = vsel %vm697_vm14, %v1821_v1, %v696_v3  ;;  %v873_v13 = vsel %vm872_vm13, %v1857_v40, %v871_v26  ;;  %1228 = vrcp.f32 %v713_v53  ;;  %v1205_v34 = vpop.eup %1204  ;;  %v568_v8 = vmul.f32 %v1203_v55, %v1478_v17 }
 0x1be   :  { %v724_v22 = vmul.f32 %v716_v59, %v1811_v49  ;;  %v701_v56 = vsel %vm699_vm15, %v700_v21, %v698_v42  ;;  %v876_v41 = vsel %vm874_vm9, %v875_v9, %v873_v13  ;;  %1230 = vtanh.f32 %v556_v6  ;;  %v1207_v48 = vpop.eup %1206 }
 0x1bf   :  { %v715_v43 = vmax.f32 %v701_v56, 1e-15  ;;  %v884_v36 = vmax.f32 %v876_v41, 1e-15  ;;  %v735_v7 = vmul.f32 %v1205_v34, %v1476_v16  ;;  %1232 = vrcp.f32 %v548_v15  ;;  %v1209_v23 = vpop.eup %1208 }
 0x1c0   :  { %v866_v52 = vsel %vm865_vm0, %v1869_v35, %v864_v45  ;;  %v868_v21 = vand.u32 2147483648, %v1869_v35  ;;  %v580_v12 = vmul.f32 %v1199_v0, %v568_v8  ;;  %v736_v9 = vmul.f32 %v1207_v48, %v1484_v20  ;;  %v1211_v58 = vpop.eup %1210  ;;  %v2134_v8 = vld [vmem:[#allocation4_spill] sm:$0xff] }
 0x1c1   :  { %1234 = vtanh.f32 %v555_v5  ;;  %v723_v17 = vmul.f32 %v715_v43, %v1814_v50  ;;  %v746_v53 = vmul.f32 %v1201_v44, %v735_v7  ;;  %v892_v51 = vmul.f32 %v884_v36, %v1811_v49  ;;  %v2135_v7 = vld [vmem:[#allocation2_spill] sm:$0xff] }
 0x1c2   :  { %1236 = vrcp.f32 %v547_v28  ;;  %v869_v16 = vsel %vm867_vm1, %v868_v21, %v866_v52  ;;  %v1213_v31 = vpop.eup %1212  ;;  %v616_v15 = vsel %vm510_vm3, 0.0, %v580_v12  ;;  %v748_v46 = vmul.f32 %v1209_v23, %v736_v9  ;;  %v2136_v9 = vld [vmem:[#allocation3_spill] sm:$0xff] }
 0x1c3   :  { %v905_v62 = vmul.f32 %v1211_v58, %v1502_v29  ;;  %1238 = vtanh.f32 %v724_v22  ;;  %v1215_v20 = vpop.eup %1214  ;;  %624 = vst [vmem:[%s2117_s2 + $0x48] sm:$0xff] %v616_v15  ;;  %v783_v2 = vsel %vm671_vm7, 0.0, %v746_v53  ;;  %v883_v49 = vmax.f32 %v869_v16, 1e-15 }
 0x1c4   :  { %1240 = vrcp.f32 %v716_v59  ;;  %v1217_v63 = vpop.eup %1216  ;;  %791 = vst [vmem:[%s2117_s2 + $0x38] sm:$0xff] %v783_v2  ;;  %vm2130_vm3 = vcmp.eq.f32.partialorder %v1711_v19, 0.0  ;;  %v570_v61 = vmul.f32 %v1215_v20, %v1498_v27  ;;  %vm2131_vm7 = vcmp.eq.f32.partialorder %v1704_v4, 0.0 }
 0x1c5   :  { %v784_v47 = vsel %vm2130_vm3, 0.0, %v748_v46  ;;  %v918_v29 = vmul.f32 %v1213_v31, %v905_v62  ;;  %1242 = vtanh.f32 %v723_v17  ;;  %v1219_v6 = vpop.eup %1218  ;;  %v891_v57 = vmul.f32 %v883_v49, %v1814_v50 }
 0x1c6   :  { %792 = vst [vmem:[%s2117_s2 + $0x50] sm:$0xff] %v784_v47  ;;  %1244 = vrcp.f32 %v715_v43  ;;  %v1221_v28 = vpop.eup %1220  ;;  %v584_v14 = vmul.f32 %v1217_v63, %v570_v61  ;;  %v569_v19 = vmul.f32 %v1219_v6, %v1492_v24  ;;  %vm2132_vm11 = vcmp.eq.f32.partialorder %v1729_v18, 0.0 }
 0x1c7   :  { %v953_v10 = vsel %vm2131_vm7, 0.0, %v918_v29  ;;  %1246 = vtanh.f32 %v892_v51  ;;  %v1223_v3 = vpop.eup %1222  ;;  %vm2133_vm13 = vcmp.eq.f32.partialorder %v1737_v37, 0.0  ;;  %v2137_v51 = vld [vmem:[#allocation5_spill] sm:$0xff] }
 0x1c8   :  { %961 = vst [vmem:[%s2117_s2 + $0x70] sm:$0xff] %v953_v10  ;;  %1248 = vrcp.f32 %v884_v36  ;;  %v1225_v27 = vpop.eup %1224  ;;  %v618_v26 = vsel %vm2132_vm11, 0.0, %v584_v14  ;;  %v582_v0 = vmul.f32 %v1221_v28, %v569_v19  ;;  %v738_v50 = vmul.f32 %v1223_v3, %v1504_v30 }
 0x1c9   :  { %1250 = vtanh.f32 %v891_v57  ;;  %v1227_v4 = vpop.eup %1226  ;;  %626 = vst [vmem:[%s2117_s2 + $0x78] sm:$0xff] %v618_v26 }
 0x1ca   :  { %v1229_v24 = vpop.eup %1228  ;;  %v617_v59 = vsel %vm2133_vm13, 0.0, %v582_v0  ;;  %v752_v45 = vmul.f32 %v1225_v27, %v738_v50  ;;  %v737_v44 = vmul.f32 %v1227_v4, %v1494_v25  ;;  %1252 = vrcp.f32 %v883_v49 }
 0x1cb   :  { %v1231_v5 = vpop.eup %1230  ;;  %625 = vst [vmem:[%s2117_s2 + $0x60] sm:$0xff] %v617_v59 }
 0x1cc   :  { %v1233_v30 = vpop.eup %1232  ;;  %v786_v18 = vsel %vm692_vm4, 0.0, %v752_v45  ;;  %v750_v42 = vmul.f32 %v1229_v24, %v737_v44  ;;  %v572_v13 = vmul.f32 %v1231_v5, %v1522_v39 }
 0x1cd   :  { %794 = vst [vmem:[%s2117_s2 + $0x80] sm:$0xff] %v786_v18 }
 0x1ce   :  { %v1235_v55 = vpop.eup %1234  ;;  %v785_v25 = vsel %vm685_vm5, 0.0, %v750_v42  ;;  %v588_v22 = vmul.f32 %v1233_v30, %v572_v13 }
 0x1cf   :  { %v1237_v37 = vpop.eup %1236  ;;  %v571_v56 = vmul.f32 %v1235_v55, %v1510_v33  ;;  %793 = vst [vmem:[%s2117_s2 + $0x68] sm:$0xff] %v785_v25 }
 0x1d0   :  { %v1239_v41 = vpop.eup %1238  ;;  %v620_v39 = vsel %vm538_vm6, 0.0, %v588_v22 }
 0x1d1   :  { %v1241_v38 = vpop.eup %1240  ;;  %v586_v34 = vmul.f32 %v1237_v37, %v571_v56  ;;  %v740_v43 = vmul.f32 %v1239_v41, %v2134_v8  ;;  %628 = vst [vmem:[%s2117_s2 + $0xa8] sm:$0xff] %v620_v39 }
 0x1d2   :  { %v1243_v36 = vpop.eup %1242 }
 0x1d3   :  { %v1245_v60 = vpop.eup %1244  ;;  %v619_v33 = vsel %vm531_vm10, 0.0, %v586_v34  ;;  %v756_v48 = vmul.f32 %v1241_v38, %v740_v43  ;;  %v739_v52 = vmul.f32 %v1243_v36, %v2135_v7 }
 0x1d4   :  { %v1247_v21 = vpop.eup %1246  ;;  %627 = vst [vmem:[%s2117_s2 + $0x90] sm:$0xff] %v619_v33 }
 0x1d5   :  { %v1249_v54 = vpop.eup %1248  ;;  %v788_v23 = vsel %vm706_vm12, 0.0, %v756_v48  ;;  %v754_v12 = vmul.f32 %v1245_v60, %v739_v52  ;;  %v908_v17 = vmul.f32 %v1247_v21, %v2136_v9 }
 0x1d6   :  { %v1251_v58 = vpop.eup %1250  ;;  %796 = vst [vmem:[%s2117_s2 + $0xb0] sm:$0xff] %v788_v23 }
 0x1d7   :  { %v787_v32 = vsel %vm699_vm15, 0.0, %v754_v12  ;;  %v924_v53 = vmul.f32 %v1249_v54, %v908_v17  ;;  %v907_v16 = vmul.f32 %v1251_v58, %v2137_v51  ;;  %v1253_v31 = vpop.eup %1252 }
 0x1d8   :  { %795 = vst [vmem:[%s2117_s2 + $0x98] sm:$0xff] %v787_v32 }
 0x1d9   :  { %v956_v11 = vsel %vm874_vm9, 0.0, %v924_v53  ;;  %v922_v15 = vmul.f32 %v1253_v31, %v907_v16 }
 0x1da   :  { %964 = vst [vmem:[%s2117_s2 + $0xb8] sm:$0xff] %v956_v11 }
 0x1db   :  { %v955_v1 = vsel %vm867_vm1, 0.0, %v922_v15 }
 0x1dc   :  { %963 = vst [vmem:[%s2117_s2 + $0xa0] sm:$0xff] %v955_v1 }

// kernel: mobius_gru_forward.5
= control target key start
LH: loop header
LB: loop body
LE: loop exit
PB: predicated region body
PF: predicated region fallthrough
CT: control target
= control target key end

     0   :  { %vm27_vm0 = vcmask 1040384   ;;  %vm35_vm1 = vcmask 1042434   ;;  %vm31_vm2 = vcmask 1041409   ;;  %s1134_s3 = inlined_call_operand.vmem [shape: f32[3,128], index: 3, kind: input, shape index: {}]   ;;  %s1135_s1 = inlined_call_operand.vmem [shape: f32[8,128], index: 1, kind: input, shape index: {}]   ;;  %s1136_s0 = inlined_call_operand.vmem [shape: f32[8,8,384], index: 0, kind: input, shape index: {}]   ;;  %s1137_s2 = inlined_call_operand.vmem [shape: f32[128,384], index: 2, kind: input, shape index: {}]   ;;  %s1138_s4 = inlined_call_operand.vmem [shape: f32[8,8,128], index: 4, kind: output, shape index: {0}]   ;;  %s1139_s5 = inlined_call_operand.vmem [shape: f32[8,128], index: 5, kind: output, shape index: {1}]  }
   0x1   :  { %v879_v0 = vld [vmem:[%s1134_s3] sm:$0x7]  ;;  %s892_s3 = smov 0  }
   0x2   :  { %v26_v1 = vmul.f32 %v879_v0, %v879_v0  ;;  %v23_v5 = vld [vmem:[%s1135_s1] sm:$0xff] }
   0x3   :  { %24 = vst [vmem:[#allocation2] sm:$0xff] %v23_v5 }
   0x4   :  { %v28_v2 = vsel %vm27_vm0, %v26_v1, 0.0  ;;  %v36_v3 = vsel %vm35_vm1, %v26_v1, 0.0  ;;  %v32_v4 = vsel %vm31_vm2, %v26_v1, 0.0 }
   0x5   :  { %29 = vadd.xlane.f32.xlu0 %v28_v2  ;;  %37 = vadd.xlane.f32.xlu1 %v36_v3 }
   0x9   :  { %33 = vadd.xlane.f32.xlu0 %v32_v4 }
  0x8e   :  { %v886_v6 = vpop.xlane.xlu0 %29  ;;  %v888_v7 = vpop.xlane.xlu1 %37 }
  0x92   :  { %v890_v8 = vpop.xlane.xlu0 %33 }
  0x93 LB: > { %v83_v9 = vld [vmem:[%s1137_s2 + $0x170] sm:$0xff]  ;;  %v82_v10 = vld [vmem:[%s1137_s2 + $0x168] sm:$0xff]  ;;  %v81_v11 = vld [vmem:[%s1137_s2 + $0x158] sm:$0xff]  ;;  %v844_v13 = vmov 0.0   ;;  %s678_s8 = smul.u32 24, %s842_s3  ;;  %vm845_vm9 = vmmov 0   ;;  %s842_s3 = sphi %s892_s3, %s44_s3  }
  0x94   : > { %122 = vmatprep.subr.mxu0 %v83_v9  ;;  %v80_v12 = vld [vmem:[%s1137_s2 + $0x150] sm:$0xff]  ;;  %186 = vmatprep.mubr.f32.mxu0 %v844_v13  ;;  %v79_v14 = vld [vmem:[%s1137_s2 + $0x140] sm:$0xff]  ;;  %v78_v15 = vld [vmem:[%s1137_s2 + $0x138] sm:$0xff] }
  0x95   : > { %123 = vmatpush1.msra.mxu0 %v82_v10  ;;  %696 = vmatprep.subr.mxu1 %v844_v13  ;;  %v77_v16 = vld [vmem:[%s1137_s2 + $0x128] sm:$0xff]  ;;  %v76_v17 = vld [vmem:[%s1137_s2 + $0x120] sm:$0xff]  ;;  %v75_v18 = vld [vmem:[%s1137_s2 + $0x110] sm:$0xff]  ;;  %s1004_s11 = scalar_lea.vmem %s1136_s0, %s678_s8 }
  0x96   : > { %124 = vmatprep.subr.mxu0 %v81_v11  ;;  %v74_v19 = vld [vmem:[%s1137_s2 + $0x108] sm:$0xff]  ;;  %v73_v20 = vld [vmem:[%s1137_s2 + $0xf8] sm:$0xff]  ;;  %v72_v21 = vld [vmem:[%s1137_s2 + $0xf0] sm:$0xff]  ;;  %728 = vmatprep.mubr.msk.f32.mxu1 %vm845_vm9, %v844_v13 }
  0x97   : > { %125 = vmatpush1.msra.mxu0 %v80_v12  ;;  %v71_v22 = vld [vmem:[%s1137_s2 + $0xe0] sm:$0xff]  ;;  %v70_v24 = vld [vmem:[%s1137_s2 + $0xd8] sm:$0xff]  ;;  %v69_v26 = vld [vmem:[%s1137_s2 + $0xc8] sm:$0xff] }
  0x98   : > { %126 = vmatprep.subr.mxu0 %v79_v14  ;;  %v938_v23 = vld [vmem:[#allocation2] sm:$0xff]  ;;  %v67_v28 = vld [vmem:[%s1137_s2 + $0xb0] sm:$0xff]  ;;  %v66_v29 = vld [vmem:[%s1137_s2 + $0xa8] sm:$0xff] }
  0x99   : > { %127 = vmatpush1.msra.mxu0 %v78_v15  ;;  %v100_v25 = vmul.f32 %v938_v23, %v938_v23  ;;  %v68_v27 = vld [vmem:[%s1137_s2 + $0xc0] sm:$0xff]  ;;  %v65_v30 = vld [vmem:[%s1137_s2 + $0x98] sm:$0xff]  ;;  %v64_v31 = vld [vmem:[%s1137_s2 + $0x90] sm:$0xff] }
  0x9a   : > { %128 = vmatprep.subr.mxu0 %v77_v16  ;;  %v63_v32 = vld [vmem:[%s1137_s2 + $0x80] sm:$0xff]  ;;  %v62_v33 = vld [vmem:[%s1137_s2 + $0x78] sm:$0xff]  ;;  %v61_v34 = vld [vmem:[%s1137_s2 + $0x68] sm:$0xff] }
  0x9b   : > { %129 = vmatpush1.msra.mxu0 %v76_v17  ;;  %101 = vadd.xlane.f32.xlu0 %v100_v25  ;;  %v60_v35 = vld [vmem:[%s1137_s2 + $0x60] sm:$0xff]  ;;  %v59_v36 = vld [vmem:[%s1137_s2 + $0x50] sm:$0xff]  ;;  %v58_v37 = vld [vmem:[%s1137_s2 + $0x48] sm:$0xff] }
  0x9c   : > { %130 = vmatprep.subr.mxu0 %v75_v18  ;;  %v57_v38 = vld [vmem:[%s1137_s2 + $0x38] sm:$0xff]  ;;  %v56_v39 = vld [vmem:[%s1137_s2 + $0x30] sm:$0xff]  ;;  %v55_v40 = vld [vmem:[%s1137_s2 + $0x20] sm:$0xff] }
  0x9d   : > { %131 = vmatpush1.msra.mxu0 %v74_v19  ;;  %v54_v41 = vld [vmem:[%s1137_s2 + $0x18] sm:$0xff]  ;;  %v53_v42 = vld [vmem:[%s1137_s2 + $0x8] sm:$0xff]  ;;  %v52_v43 = vld [vmem:[%s1137_s2] sm:$0xff] }
  0x9e   : > { %132 = vmatprep.subr.mxu0 %v73_v20  ;;  %v49_v46 = vld [vmem:[%s1004_s11] sm:$0xff] }
  0x9f   : > { %133 = vmatpush1.msra.mxu0 %v72_v21  ;;  %v236_v47 = vmul.f32 %v49_v46, %v49_v46 }
  0xa0   : > { %134 = vmatprep.subr.mxu0 %v71_v22 }
  0xa1   : > { %135 = vmatpush1.msra.mxu0 %v70_v24 }
  0xa2   : > { %136 = vmatprep.subr.mxu0 %v69_v26 }
  0xa3   : > { %137 = vmatpush1.msra.mxu0 %v68_v27 }
  0xa4   : > { %138 = vmatprep.subr.mxu0 %v67_v28 }
  0xa5   : > { %139 = vmatpush1.msra.mxu0 %v66_v29 }
  0xa6   : > { %140 = vmatprep.subr.mxu0 %v65_v30  ;;  %v257_v30 = vlaneseq }
  0xa7   : > { %141 = vmatpush1.msra.mxu0 %v64_v31 }
  0xa8   : > { %142 = vmatprep.subr.mxu0 %v63_v32 }
  0xa9   : > { %143 = vmatpush1.msra.mxu0 %v62_v33  ;;  %v1018_v33 = vshrl.u32 %v257_v30, 7  ;;  %v98_v30 = vld [vmem:[%s1137_s2 + $0x160] sm:$0xff] }
  0xaa   : > { %144 = vmatprep.subr.mxu0 %v61_v34 }
  0xab   : > { %145 = vmatpush1.msra.mxu0 %v60_v35 }
  0xac   : > { %146 = vmatprep.subr.mxu0 %v59_v36  ;;  %v259_v36 = vsub.s32 0, %v1018_v33 }
  0xad   : > { %147 = vmatpush1.msra.mxu0 %v58_v37 }
  0xae   : > { %148 = vmatprep.subr.mxu0 %v57_v38  ;;  %v260_v38 = vrot.slane %v879_v0, %v259_v36 }
  0xaf   : > { %149 = vmatpush1.msra.mxu0 %v56_v39 }
  0xb0   : > { %150 = vmatprep.subr.mxu0 %v55_v40 }
  0xb1   : > { %151 = vmatpush1.msra.mxu0 %v54_v41 }
  0xb2   : > { %152 = vmatprep.subr.mxu0 %v53_v42 }
  0xb3   : > { %153 = vmatpush1.msra.mxu0 %v52_v43  ;;  %v269_v43 = vrot.slane %v886_v6, %v259_v36  ;;  %v93_v36 = vld [vmem:[%s1137_s2 + $0xe8] sm:$0xff] }
  0xb4   : > { %187 = vmatmul.mubr.f32.vlgmr.msra.gmra.mxu0 %v938_v23 }
 0x124   : > { %v1007_v48 = vpop.xlane.xlu0 %101 }
 0x125   : > { %741 = vrsqrt.f32 %v1007_v48  ;;  %vm105_vm3 = vcmp.eq.f32.partialorder %v1007_v48, inf  ;;  %v108_v51 = vand.u32 2147483648, %v1007_v48  ;;  %vm107_vm4 = vcmp.eq.f32.partialorder %v1007_v48, 0.0 }
 0x132   : > { %v742_v49 = vpop.eup %741 }
 0x133   : > { %v104_v50 = vmul.f32 %v742_v49, %v1007_v48 }
 0x135   : > { %v106_v52 = vsel %vm105_vm3, %v1007_v48, %v104_v50 }
 0x136   : > { %v109_v53 = vsel %vm107_vm4, %v108_v51, %v106_v52 }
 0x137   : > { %v110_v54 = vmax.f32 %v109_v53, 1e-15 }
 0x139   : > { %v668_v55 = vclamps-f32 %v110_v54, 0.9999999 }
 0x13b   : > { %v114_v56 = vsub.f32 1.0, %v668_v55  ;;  %v113_v57 = vadd.f32 1.0, %v668_v55 }
 0x13d   : > { %743 = vrcp.f32 %v114_v56 }
 0x14a   : > { %v744_v58 = vpop.eup %743 }
 0x14b   : > { %v116_v59 = vmul.f32 %v744_v58, %v113_v57 }
 0x14d   : > { %745 = vlog2.f32 %v116_v59 }
 0x15a   : > { %v746_v61 = vpop.eup %745 }
 0x15b   : > { %v118_v62 = vmul.f32 0.6931472, %v746_v61 }
 0x15d   : > { %v119_v2 = vmul.f32 0.5, %v118_v62 }
 0x174   : > { %v188_v44 = vpop.f32.mrf.mxu0 }
 0x175   : > { %v193_v45 = vmul.f32 %v188_v44, %v188_v44 }
 0x177   : > { %194 = vadd.xlane.f32.xlu0 %v193_v45 }
 0x17b   : > { %237 = vadd.xlane.f32.xlu0 %v236_v47 }
 0x200   : > { %v195_v60 = vpop.xlane.xlu0 %194 }
 0x201   : > { %747 = vrsqrt.f32 %v195_v60  ;;  %vm198_vm5 = vcmp.eq.f32.partialorder %v195_v60, inf  ;;  %v201_v4 = vand.u32 2147483648, %v195_v60  ;;  %vm200_vm6 = vcmp.eq.f32.partialorder %v195_v60, 0.0 }
 0x202   : > { %749 = vrcp.f32 %v110_v54 }
 0x204   : > { %v238_v24 = vpop.xlane.xlu0 %237 }
 0x20e   : > { %v748_v63 = vpop.eup %747 }
 0x20f   : > { %v197_v1 = vmul.f32 %v748_v63, %v195_v60  ;;  %v750_v3 = vpop.eup %749 }
 0x210   : > { %v1015_v10 = vmul.f32 %v750_v3, %v119_v2 }
 0x211   : > { %v199_v5 = vsel %vm198_vm5, %v195_v60, %v197_v1 }
 0x212   : > { %v202_v9 = vsel %vm200_vm6, %v201_v4, %v199_v5 }
 0x213   : > { %v203_v11 = vmax.f32 %v202_v9, 1e-15 }
 0x215   : > { %v204_v12 = vmul.f32 %v203_v11, %v1015_v10 }
 0x217   : > { %751 = vtanh.f32 %v204_v12 }
 0x218   : > { %753 = vrcp.f32 %v203_v11 }
 0x224   : > { %v752_v14 = vpop.eup %751 }
 0x225   : > { %v206_v15 = vmul.f32 %v752_v14, %v188_v44  ;;  %v754_v16 = vpop.eup %753 }
 0x227   : > { %v208_v17 = vmul.f32 %v754_v16, %v206_v15 }
 0x229   : > { %v212_v18 = vsel %vm200_vm6, 0.0, %v208_v17 }
 0x22a   : > { %v239_v19 = vmul.f32 %v212_v18, %v49_v46  ;;  %v233_v20 = vmul.f32 %v212_v18, %v212_v18 }
 0x22c   : > { %240 = vadd.xlane.f32.xlu1 %v239_v19 }
 0x230   : > { %234 = vadd.xlane.f32.xlu1 %v233_v20 }
 0x2b5   : > { %v241_v21 = vpop.xlane.xlu1 %240 }
 0x2b6   : > { %v242_v22 = vmul.f32 2.0, %v241_v21 }
 0x2b8   : > { %v243_v26 = vadd.f32 1.0, %v242_v22 }
 0x2b9   : > { %v235_v25 = vpop.xlane.xlu1 %234 }
 0x2ba   : > { %v249_v27 = vmul.f32 %v238_v24, %v235_v25  ;;  %v246_v31 = vsub.f32 1.0, %v235_v25  ;;  %v244_v32 = vadd.f32 %v243_v26, %v238_v24 }
 0x2bc   : > { %v250_v28 = vadd.f32 %v249_v27, %v243_v26  ;;  %v247_v34 = vmul.f32 %v246_v31, %v49_v46  ;;  %v245_v35 = vmul.f32 %v244_v32, %v212_v18  ;;  %v1028_v27 = vpop.f32.mrf.mxu0  ;;  %v97_v31 = vld [vmem:[%s1137_s2 + $0x148] sm:$0xff]  ;;  %v96_v32 = vld [vmem:[%s1137_s2 + $0x130] sm:$0xff] }
 0x2be   : > { %v251_v29 = vmax.f32 %v250_v28, 1e-15  ;;  %v248_v37 = vadd.f32 %v247_v34, %v245_v35  ;;  %v213_v28 = vmul.f32 %v1028_v27, %v1028_v27  ;;  %v95_v34 = vld [vmem:[%s1137_s2 + $0x118] sm:$0xff]  ;;  %v94_v35 = vld [vmem:[%s1137_s2 + $0x100] sm:$0xff] }
 0x2c0   : > { %755 = vrcp.f32 %v251_v29  ;;  %v99_v29 = vld [vmem:[%s1137_s2 + $0x178] sm:$0xff] }
 0x2c1   : > { %697 = vmatpush3.msra.mxu1 %v99_v29 }
 0x2c2   : > { %698 = vmatprep.subr.mxu1 %v844_v13 }
 0x2c3   : > { %699 = vmatpush3.msra.mxu1 %v98_v30 }
 0x2c4   : > { %700 = vmatprep.subr.mxu1 %v844_v13 }
 0x2c5   : > { %701 = vmatpush3.msra.mxu1 %v97_v31 }
 0x2c6   : > { %702 = vmatprep.subr.mxu1 %v844_v13 }
 0x2c7   : > { %703 = vmatpush3.msra.mxu1 %v96_v32 }
 0x2c8   : > { %704 = vmatprep.subr.mxu1 %v844_v13 }
 0x2c9   : > { %705 = vmatpush3.msra.mxu1 %v95_v34 }
 0x2ca   : > { %706 = vmatprep.subr.mxu1 %v844_v13 }
 0x2cb   : > { %707 = vmatpush3.msra.mxu1 %v94_v35 }
 0x2cc   : > { %708 = vmatprep.subr.mxu1 %v844_v13 }
 0x2cd   : > { %v756_v39 = vpop.eup %755  ;;  %709 = vmatpush3.msra.mxu1 %v93_v36 }
 0x2ce   : > { %v253_v40 = vmul.f32 %v756_v39, %v248_v37  ;;  %v92_v37 = vld [vmem:[%s1137_s2 + $0xd0] sm:$0xff]  ;;  %710 = vmatprep.subr.mxu1 %v844_v13  ;;  %v90_v39 = vld [vmem:[%s1137_s2 + $0xa0] sm:$0xff] }
 0x2cf   : > { %711 = vmatpush3.msra.mxu1 %v92_v37 }
 0x2d0   : > { %v261_v41 = vmul.f32 %v260_v38, %v253_v40  ;;  %v254_v42 = vmul.f32 %v253_v40, %v253_v40  ;;  %712 = vmatprep.subr.mxu1 %v844_v13 }
 0x2d2   : > { %262 = vadd.xlane.f32.xlu1 %v261_v41  ;;  %255 = vadd.xlane.f32.xlu0 %v254_v42  ;;  %v88_v41 = vld [vmem:[%s1137_s2 + $0x70] sm:$0xff]  ;;  %v87_v42 = vld [vmem:[%s1137_s2 + $0x58] sm:$0xff] }
 0x35b   : > { %v263_v44 = vpop.xlane.xlu1 %262  ;;  %v256_v45 = vpop.xlane.xlu0 %255 }
 0x35c   : > { %v264_v47 = vmul.f32 2.0, %v263_v44  ;;  %v275_v50 = vmul.f32 %v269_v43, %v256_v45  ;;  %v272_v53 = vsub.f32 1.0, %v256_v45  ;;  %v85_v44 = vld [vmem:[%s1137_s2 + $0x28] sm:$0xff]  ;;  %v84_v45 = vld [vmem:[%s1137_s2 + $0x10] sm:$0xff] }
 0x35e   : > { %v265_v49 = vadd.f32 1.0, %v264_v47  ;;  %v273_v55 = vmul.f32 %v272_v53, %v260_v38  ;;  %v91_v38 = vld [vmem:[%s1137_s2 + $0xb8] sm:$0xff] }
 0x35f   : > { %713 = vmatpush3.msra.mxu1 %v91_v38 }
 0x360   : > { %v276_v46 = vadd.f32 %v275_v50, %v265_v49  ;;  %v270_v52 = vadd.f32 %v269_v43, %v265_v49  ;;  %714 = vmatprep.subr.mxu1 %v844_v13  ;;  %v86_v43 = vld [vmem:[%s1137_s2 + $0x40] sm:$0xff] }
 0x361   : > { %715 = vmatpush3.msra.mxu1 %v90_v39 }
 0x362   : > { %v277_v51 = vmax.f32 %v276_v46, 1e-15  ;;  %v271_v54 = vmul.f32 %v270_v52, %v253_v40  ;;  %v89_v40 = vld [vmem:[%s1137_s2 + $0x88] sm:$0xff]  ;;  %716 = vmatprep.subr.mxu1 %v844_v13 }
 0x363   : > { %717 = vmatpush3.msra.mxu1 %v89_v40 }
 0x364   : > { %757 = vrcp.f32 %v277_v51  ;;  %v274_v56 = vadd.f32 %v273_v55, %v271_v54  ;;  %718 = vmatprep.subr.mxu1 %v844_v13 }
 0x365   : > { %719 = vmatpush3.msra.mxu1 %v88_v41 }
 0x366   : > { %720 = vmatprep.subr.mxu1 %v844_v13 }
 0x367   : > { %721 = vmatpush3.msra.mxu1 %v87_v42 }
 0x368   : > { %722 = vmatprep.subr.mxu1 %v844_v13 }
 0x369   : > { %723 = vmatpush3.msra.mxu1 %v86_v43 }
 0x36a   : > { %724 = vmatprep.subr.mxu1 %v844_v13 }
 0x36b   : > { %725 = vmatpush3.msra.mxu1 %v85_v44 }
 0x36c   : > { %726 = vmatprep.subr.mxu1 %v844_v13 }
 0x36d   : > { %727 = vmatpush3.msra.mxu1 %v84_v45 }
 0x371   : > { %v758_v57 = vpop.eup %757 }
 0x372   : > { %v279_v58 = vmul.f32 %v758_v57, %v274_v56 }
 0x374   : > { %v327_v59 = vmul.f32 %v279_v58, %v279_v58 }
 0x376   : > { %328 = vadd.xlane.f32.xlu1 %v327_v59 }
 0x3ff   : > { %v329_v60 = vpop.xlane.xlu1 %328 }
 0x400   : > { %759 = vrsqrt.f32 %v329_v60  ;;  %vm332_vm7 = vcmp.eq.f32.partialorder %v329_v60, inf  ;;  %v335_v63 = vand.u32 2147483648, %v329_v60  ;;  %vm334_vm8 = vcmp.eq.f32.partialorder %v329_v60, 0.0 }
 0x40d   : > { %v760_v61 = vpop.eup %759 }
 0x40e   : > { %v331_v62 = vmul.f32 %v760_v61, %v329_v60 }
 0x410   : > { %v333_v1 = vsel %vm332_vm7, %v329_v60, %v331_v62 }
 0x411   : > { %v336_v2 = vsel %vm334_vm8, %v335_v63, %v333_v1 }
 0x412   : > { %v337_v3 = vmax.f32 %v336_v2, 1e-15 }
 0x414   : > { %v669_v4 = vclamps-f32 %v337_v3, 0.9999999 }
 0x416   : > { %v343_v5 = vsub.f32 1.0, %v669_v4  ;;  %v342_v9 = vadd.f32 1.0, %v669_v4 }
 0x418   : > { %761 = vrcp.f32 %v343_v5 }
 0x419   : > { %763 = vrcp.f32 %v337_v3 }
 0x425   : > { %v762_v11 = vpop.eup %761 }
 0x426   : > { %v345_v12 = vmul.f32 %v762_v11, %v342_v9  ;;  %v764_v14 = vpop.eup %763 }
 0x427   : > { %v339_v17 = vmul.f32 %v764_v14, %v279_v58 }
 0x428   : > { %765 = vlog2.f32 %v345_v12  ;;  %v50_v12 = vld [vmem:[%s1004_s11 + $0x8] sm:$0xff] }
 0x435   : > { %v766_v15 = vpop.eup %765 }
 0x436   : > { %v347_v16 = vmul.f32 0.6931472, %v766_v15 }
 0x438   : > { %v348_v18 = vmul.f32 0.5, %v347_v16  ;;  %v283_v16 = vmul.f32 %v50_v12, %v50_v12 }
 0x43a   : > { %v349_v19 = vmul.f32 %v348_v18, %v339_v17 }
 0x43c   : > { %v670_v20 = vmul.f32 -1.442695, %v349_v19 }
 0x43e   : > { %767 = vpow2.f32 %v670_v20 }
 0x44b   : > { %v768_v21 = vpop.eup %767 }
 0x44c   : > { %v353_v22 = vadd.f32 1.0, %v768_v21 }
 0x44e   : > { %769 = vrcp.f32 %v353_v22 }
 0x45b   : > { %v770_v24 = vpop.eup %769 }
 0x45c   : > { %v1024_v25 = vmul.f32 %v770_v24, %v938_v23 }
 0x45e   : > { %v386_v26 = vmul.f32 %v1024_v25, %v1024_v25 }
 0x460   : > { %387 = vadd.xlane.f32.xlu0 %v386_v26 }
 0x464   : > { %214 = vadd.xlane.f32.xlu0 %v213_v28 }
 0x4e9   : > { %v388_v47 = vpop.xlane.xlu0 %387 }
 0x4ea   : > { %771 = vrsqrt.f32 %v388_v47  ;;  %vm391_vm10 = vcmp.eq.f32.partialorder %v388_v47, inf  ;;  %v394_v51 = vand.u32 2147483648, %v388_v47  ;;  %vm393_vm11 = vcmp.eq.f32.partialorder %v388_v47, 0.0 }
 0x4eb   : > { %vm674_vm14 = vmneg %vm393_vm11 }
 0x4ed   : > { %v215_v49 = vpop.xlane.xlu0 %214 }
 0x4ee   : > { %773 = vrsqrt.f32 %v215_v49  ;;  %vm218_vm12 = vcmp.eq.f32.partialorder %v215_v49, inf  ;;  %v221_v57 = vand.u32 2147483648, %v215_v49  ;;  %vm220_vm13 = vcmp.eq.f32.partialorder %v215_v49, 0.0 }
 0x4f7   : > { %v772_v50 = vpop.eup %771 }
 0x4f8   : > { %v390_v46 = vmul.f32 %v772_v50, %v388_v47 }
 0x4fa   : > { %v392_v52 = vsel %vm391_vm10, %v388_v47, %v390_v46 }
 0x4fb   : > { %v774_v53 = vpop.eup %773  ;;  %v395_v54 = vsel %vm393_vm11, %v394_v51, %v392_v52 }
 0x4fc   : > { %v217_v55 = vmul.f32 %v774_v53, %v215_v49  ;;  %v396_v56 = vmax.f32 %v395_v54, 1e-15 }
 0x4fe   : > { %v397_v13 = vmul.f32 %v396_v56, %v1015_v10  ;;  %v219_v58 = vsel %vm218_vm12, %v215_v49, %v217_v55 }
 0x4ff   : > { %v222_v59 = vsel %vm220_vm13, %v221_v57, %v219_v58 }
 0x500   : > { %775 = vtanh.f32 %v397_v13  ;;  %v223_v60 = vmax.f32 %v222_v59, 1e-15 }
 0x501   : > { %777 = vrcp.f32 %v396_v56 }
 0x502   : > { %v224_v61 = vmul.f32 %v223_v60, %v1015_v10 }
 0x504   : > { %779 = vtanh.f32 %v224_v61 }
 0x505   : > { %781 = vrcp.f32 %v223_v60 }
 0x50d   : > { %v776_v62 = vpop.eup %775 }
 0x50e   : > { %v399_v63 = vmul.f32 %v776_v62, %v1024_v25  ;;  %v778_v1 = vpop.eup %777 }
 0x510   : > { %v401_v2 = vmul.f32 %v778_v1, %v399_v63  ;;  %v306_v63 = vsub.s32 1, %v1018_v33 }
 0x511   : > { %v780_v3 = vpop.eup %779 }
 0x512   : > { %729 = vmatmul.mubr.msk.f32.vlgmr.msra.gmra.mxu1 %vm674_vm14, %v401_v2  ;;  %v405_v4 = vsel %vm393_vm11, 0.0, %v401_v2  ;;  %v226_v5 = vmul.f32 %v780_v3, %v1028_v27  ;;  %v782_v9 = vpop.eup %781  ;;  %v51_v3 = vld [vmem:[%s1004_s11 + $0x10] sm:$0xff]  ;;  %s677_s11 = sshll.u32 %s842_s3, 3  ;;  %s44_s3 = sadd.s32 1, %s842_s3  }
 0x513   : > { %v406_v11 = vmul.f32 %v405_v4, %v405_v4  ;;  %s646_s21 = scalar_lea.vmem %s1138_s4, %s677_s11  ;;  %p41_p0 = scmp.ge.s32.totalorder %s44_s3, 8  }
 0x514   : > { %v228_v14 = vmul.f32 %v782_v9, %v226_v5 }
 0x515   : > { %407 = vadd.xlane.f32.xlu1 %v406_v11 }
 0x516   : > { %v232_v10 = vsel %vm220_vm13, 0.0, %v228_v14 }
 0x517   : > { %v286_v15 = vmul.f32 %v232_v10, %v50_v12  ;;  %v280_v20 = vmul.f32 %v232_v10, %v232_v10 }
 0x519   : > { %287 = vadd.xlane.f32.xlu0 %v286_v15  ;;  %v307_v15 = vrot.slane %v879_v0, %v306_v63 }
 0x51d   : > { %284 = vadd.xlane.f32.xlu0 %v283_v16  ;;  %v521_v16 = vmul.f32 %v51_v3, %v51_v3 }
 0x59e   : > { %v408_v21 = vpop.xlane.xlu1 %407 }
 0x59f   : > { %783 = vrsqrt.f32 %v408_v21  ;;  %vm411_vm15 = vcmp.eq.f32.partialorder %v408_v21, inf  ;;  %v414_v26 = vand.u32 2147483648, %v408_v21  ;;  %vm413_vm0 = vcmp.eq.f32.partialorder %v408_v21, 0.0 }
 0x5a2   : > { %v288_v36 = vpop.xlane.xlu0 %287 }
 0x5a3   : > { %v289_v40 = vmul.f32 2.0, %v288_v36 }
 0x5a5   : > { %v290_v47 = vadd.f32 1.0, %v289_v40 }
 0x5a6   : > { %v285_v41 = vpop.xlane.xlu0 %284 }
 0x5a7   : > { %v291_v13 = vadd.f32 %v290_v47, %v285_v41 }
 0x5a9   : > { %v292_v62 = vmul.f32 %v291_v13, %v232_v10 }
 0x5ac   : > { %v784_v22 = vpop.eup %783 }
 0x5ad   : > { %v410_v24 = vmul.f32 %v784_v22, %v408_v21 }
 0x5af   : > { %v412_v25 = vsel %vm411_vm15, %v408_v21, %v410_v24 }
 0x5b0   : > { %v415_v27 = vsel %vm413_vm0, %v414_v26, %v412_v25  ;;  %v316_v25 = vrot.slane %v890_v8, %v306_v63 }
 0x5b1   : > { %v416_v28 = vmax.f32 %v415_v27, 1e-15 }
 0x5b3   : > { %v673_v29 = vclamps-f32 %v416_v28, 0.9999999 }
 0x5b5   : > { %v420_v30 = vsub.f32 1.0, %v673_v29  ;;  %v419_v32 = vadd.f32 1.0, %v673_v29 }
 0x5b7   : > { %785 = vrcp.f32 %v420_v30 }
 0x5c4   : > { %v786_v31 = vpop.eup %785 }
 0x5c5   : > { %v422_v34 = vmul.f32 %v786_v31, %v419_v32 }
 0x5c7   : > { %787 = vlog2.f32 %v422_v34 }
 0x5d2   : > { %v494_v17 = vpop.f32.mrf.mxu1 }
 0x5d3   : > { %v498_v18 = vmul.f32 %v494_v17, %v494_v17 }
 0x5d4   : > { %v730_v19 = vpop.f32.mrf.mxu1  ;;  %v788_v37 = vpop.eup %787 }
 0x5d5   : > { %499 = vadd.xlane.f32.xlu1 %v498_v18  ;;  %v424_v39 = vmul.f32 0.6931472, %v788_v37 }
 0x5d7   : > { %v425_v45 = vmul.f32 0.5, %v424_v39 }
 0x5d9   : > { %281 = vadd.xlane.f32.xlu1 %v280_v20 }
 0x65e   : > { %v500_v35 = vpop.xlane.xlu1 %499 }
 0x65f   : > { %789 = vrsqrt.f32 %v500_v35  ;;  %vm503_vm1 = vcmp.eq.f32.partialorder %v500_v35, inf  ;;  %v506_v49 = vand.u32 2147483648, %v500_v35  ;;  %vm505_vm2 = vcmp.eq.f32.partialorder %v500_v35, 0.0 }
 0x660   : > { %791 = vrcp.f32 %v416_v28 }
 0x662   : > { %v282_v38 = vpop.xlane.xlu1 %281 }
 0x663   : > { %v296_v43 = vmul.f32 %v285_v41, %v282_v38  ;;  %v293_v57 = vsub.f32 1.0, %v282_v38  ;;  %v544_v38 = vsub.s32 2, %v1018_v33 }
 0x665   : > { %v297_v51 = vadd.f32 %v296_v43, %v290_v47  ;;  %v294_v59 = vmul.f32 %v293_v57, %v50_v12  ;;  %v545_v43 = vrot.slane %v879_v0, %v544_v38  ;;  %v554_v33 = vrot.slane %v888_v7, %v544_v38 }
 0x667   : > { %v298_v56 = vmax.f32 %v297_v51, 1e-15  ;;  %v295_v4 = vadd.f32 %v294_v59, %v292_v62 }
 0x66c   : > { %v790_v42 = vpop.eup %789 }
 0x66d   : > { %v502_v44 = vmul.f32 %v790_v42, %v500_v35  ;;  %v792_v46 = vpop.eup %791 }
 0x66e   : > { %v427_v53 = vmul.f32 %v792_v46, %v425_v45 }
 0x66f   : > { %v504_v50 = vsel %vm503_vm1, %v500_v35, %v502_v44 }
 0x670   : > { %v507_v52 = vsel %vm505_vm2, %v506_v49, %v504_v50 }
 0x671   : > { %v508_v54 = vmax.f32 %v507_v52, 1e-15 }
 0x673   : > { %v509_v55 = vmul.f32 %v508_v54, %v427_v53 }
 0x675   : > { %793 = vtanh.f32 %v509_v55 }
 0x676   : > { %795 = vrcp.f32 %v508_v54 }
 0x677   : > { %797 = vrcp.f32 %v298_v56 }
 0x682   : > { %v794_v58 = vpop.eup %793 }
 0x683   : > { %v511_v60 = vmul.f32 %v794_v58, %v494_v17  ;;  %v796_v61 = vpop.eup %795 }
 0x684   : > { %v798_v1 = vpop.eup %797 }
 0x685   : > { %v513_v2 = vmul.f32 %v796_v61, %v511_v60  ;;  %v300_v14 = vmul.f32 %v798_v1, %v295_v4 }
 0x687   : > { %v517_v5 = vsel %vm505_vm2, 0.0, %v513_v2  ;;  %v308_v12 = vmul.f32 %v307_v15, %v300_v14  ;;  %v301_v10 = vmul.f32 %v300_v14, %v300_v14 }
 0x688   : > { %v518_v9 = vmul.f32 %v517_v5, %v517_v5  ;;  %v524_v11 = vmul.f32 %v517_v5, %v51_v3 }
 0x68a   : > { %519 = vadd.xlane.f32.xlu0 %v518_v9  ;;  %525 = vadd.xlane.f32.xlu1 %v524_v11 }
 0x68e   : > { %522 = vadd.xlane.f32.xlu1 %v521_v16  ;;  %309 = vadd.xlane.f32.xlu0 %v308_v12 }
 0x692   : > { %302 = vadd.xlane.f32.xlu1 %v301_v10 }
 0x713   : > { %v520_v17 = vpop.xlane.xlu0 %519  ;;  %v526_v18 = vpop.xlane.xlu1 %525 }
 0x714   : > { %v527_v19 = vmul.f32 2.0, %v526_v18  ;;  %v531_v36 = vsub.f32 1.0, %v520_v17 }
 0x716   : > { %v528_v22 = vadd.f32 1.0, %v527_v19  ;;  %v532_v41 = vmul.f32 %v531_v36, %v51_v3  ;;  %v565_v3 = vsub.f32 0.0, %v938_v23 }
 0x717   : > { %v310_v20 = vpop.xlane.xlu0 %309  ;;  %v523_v21 = vpop.xlane.xlu1 %522 }
 0x718   : > { %v534_v24 = vmul.f32 %v523_v21, %v520_v17  ;;  %v311_v26 = vmul.f32 2.0, %v310_v20  ;;  %v529_v35 = vadd.f32 %v528_v22, %v523_v21 }
 0x71a   : > { %v535_v27 = vadd.f32 %v534_v24, %v528_v22  ;;  %v312_v30 = vadd.f32 1.0, %v311_v26  ;;  %v530_v37 = vmul.f32 %v529_v35, %v517_v5 }
 0x71b   : > { %v303_v28 = vpop.xlane.xlu1 %302 }
 0x71c   : > { %v536_v29 = vmax.f32 %v535_v27, 1e-15  ;;  %v322_v31 = vmul.f32 %v316_v25, %v303_v28  ;;  %v317_v39 = vadd.f32 %v316_v25, %v312_v30  ;;  %v319_v40 = vsub.f32 1.0, %v303_v28 }
 0x71d   : > { %v533_v42 = vadd.f32 %v532_v41, %v530_v37 }
 0x71e   : > { %799 = vrcp.f32 %v536_v29  ;;  %v323_v32 = vadd.f32 %v322_v31, %v312_v30  ;;  %v318_v45 = vmul.f32 %v317_v39, %v300_v14  ;;  %v320_v47 = vmul.f32 %v319_v40, %v307_v15 }
 0x720   : > { %v324_v34 = vmax.f32 %v323_v32, 1e-15  ;;  %v321_v51 = vadd.f32 %v320_v47, %v318_v45 }
 0x722   : > { %801 = vrcp.f32 %v324_v34 }
 0x72b   : > { %v800_v44 = vpop.eup %799 }
 0x72c   : > { %v538_v49 = vmul.f32 %v800_v44, %v533_v42  ;;  %v576_v44 = vsub.f32 1.0, %v1007_v48 }
 0x72e   : > { %v546_v50 = vmul.f32 %v545_v43, %v538_v49  ;;  %v539_v46 = vmul.f32 %v538_v49, %v538_v49 }
 0x72f   : > { %v802_v52 = vpop.eup %801 }
 0x730   : > { %547 = vadd.xlane.f32.xlu0 %v546_v50  ;;  %540 = vadd.xlane.f32.xlu1 %v539_v46  ;;  %v326_v53 = vmul.f32 %v802_v52, %v321_v51 }
 0x732   : > { %v356_v54 = vmul.f32 %v326_v53, %v326_v53 }
 0x734   : > { %357 = vadd.xlane.f32.xlu0 %v356_v54 }
 0x7b9   : > { %v548_v55 = vpop.xlane.xlu0 %547  ;;  %v541_v56 = vpop.xlane.xlu1 %540 }
 0x7ba   : > { %v549_v57 = vmul.f32 2.0, %v548_v55  ;;  %v560_v58 = vmul.f32 %v554_v33, %v541_v56  ;;  %v557_v62 = vsub.f32 1.0, %v541_v56 }
 0x7bc   : > { %v550_v13 = vadd.f32 1.0, %v549_v57  ;;  %v558_v1 = vmul.f32 %v557_v62, %v545_v43 }
 0x7bd   : > { %v358_v14 = vpop.xlane.xlu0 %357 }
 0x7be   : > { %v561_v59 = vadd.f32 %v560_v58, %v550_v13  ;;  %v555_v61 = vadd.f32 %v554_v33, %v550_v13  ;;  %vm361_vm3 = vcmp.eq.f32.partialorder %v358_v14, inf  ;;  %v364_v10 = vand.u32 2147483648, %v358_v14 }
 0x7bf   : > { %vm363_vm4 = vcmp.eq.f32.partialorder %v358_v14, 0.0 }
 0x7c0   : > { %v562_v60 = vmax.f32 %v561_v59, 1e-15  ;;  %v556_v63 = vmul.f32 %v555_v61, %v538_v49 }
 0x7c2   : > { %803 = vrcp.f32 %v562_v60  ;;  %v559_v2 = vadd.f32 %v558_v1, %v556_v63 }
 0x7c3   : > { %805 = vrsqrt.f32 %v358_v14 }
 0x7cf   : > { %v804_v4 = vpop.eup %803 }
 0x7d0   : > { %v564_v5 = vmul.f32 %v804_v4, %v559_v2  ;;  %v806_v15 = vpop.eup %805 }
 0x7d1   : > { %v360_v16 = vmul.f32 %v806_v15, %v358_v14 }
 0x7d2   : > { %v569_v9 = vmul.f32 %v565_v3, %v564_v5  ;;  %v566_v11 = vmul.f32 %v564_v5, %v564_v5  ;;  %v577_v45 = vmul.f32 %v576_v44, %v564_v5 }
 0x7d3   : > { %v362_v12 = vsel %vm361_vm3, %v358_v14, %v360_v16 }
 0x7d4   : > { %570 = vadd.xlane.f32.xlu1 %v569_v9  ;;  %567 = vadd.xlane.f32.xlu0 %v566_v11  ;;  %v365_v17 = vsel %vm363_vm4, %v364_v10, %v362_v12 }
 0x7d5   : > { %v366_v18 = vmax.f32 %v365_v17, 1e-15 }
 0x7d7   : > { %v671_v19 = vclamps-f32 %v366_v18, 0.9999999 }
 0x7d9   : > { %v372_v20 = vsub.f32 1.0, %v671_v19  ;;  %v371_v22 = vadd.f32 1.0, %v671_v19 }
 0x7db   : > { %807 = vrcp.f32 %v372_v20 }
 0x7e8   : > { %v808_v21 = vpop.eup %807 }
 0x7e9   : > { %v374_v24 = vmul.f32 %v808_v21, %v371_v22 }
 0x7eb   : > { %809 = vlog2.f32 %v374_v24 }
 0x7ec   : > { %811 = vrcp.f32 %v366_v18 }
 0x7f8   : > { %v810_v25 = vpop.eup %809 }
 0x7f9   : > { %v376_v26 = vmul.f32 0.6931472, %v810_v25  ;;  %v812_v27 = vpop.eup %811 }
 0x7fa   : > { %v368_v29 = vmul.f32 %v812_v27, %v326_v53 }
 0x7fb   : > { %v377_v28 = vmul.f32 0.5, %v376_v26 }
 0x7fd   : > { %v378_v30 = vmul.f32 %v377_v28, %v368_v29 }
 0x7ff   : > { %v672_v31 = vmul.f32 -1.442695, %v378_v30 }
 0x801   : > { %813 = vpow2.f32 %v672_v31 }
 0x80e   : > { %v814_v38 = vpop.eup %813 }
 0x80f   : > { %v382_v41 = vadd.f32 1.0, %v814_v38 }
 0x85d   : > { %v571_v32 = vpop.xlane.xlu1 %570  ;;  %v568_v34 = vpop.xlane.xlu0 %567 }
 0x85e   : > { %v572_v35 = vmul.f32 2.0, %v571_v32  ;;  %v579_v37 = vmul.f32 %v568_v34, %v1007_v48 }
 0x860   : > { %v573_v36 = vadd.f32 1.0, %v572_v35  ;;  %v835_v35 = vld [vmem:[#allocation2] sm:$0xff] }
 0x862   : > { %v580_v39 = vadd.f32 %v579_v37, %v573_v36  ;;  %v574_v42 = vadd.f32 %v573_v36, %v568_v34 }
 0x864   : > { %v581_v40 = vmax.f32 %v580_v39, 1e-15  ;;  %v575_v43 = vmul.f32 %v574_v42, %v565_v3 }
 0x866   : > { %815 = vrcp.f32 %v581_v40  ;;  %v578_v47 = vadd.f32 %v577_v45, %v575_v43 }
 0x867   : > { %817 = vrcp.f32 %v382_v41 }
 0x873   : > { %v816_v49 = vpop.eup %815 }
 0x874   : > { %v583_v50 = vmul.f32 %v816_v49, %v578_v47  ;;  %v818_v46 = vpop.eup %817 }
 0x876   : > { %v584_v51 = vmul.f32 %v583_v50, %v583_v50  ;;  %v606_v52 = vmul.f32 %v818_v46, %v583_v50 }
 0x878   : > { %585 = vadd.xlane.f32.xlu1 %v584_v51  ;;  %v607_v53 = vmul.f32 %v606_v52, %v606_v52 }
 0x87a   : > { %608 = vadd.xlane.f32.xlu0 %v607_v53 }
 0x901   : > { %v586_v54 = vpop.xlane.xlu1 %585 }
 0x902   : > { %819 = vrsqrt.f32 %v586_v54  ;;  %vm589_vm5 = vcmp.eq.f32.partialorder %v586_v54, inf  ;;  %v592_v56 = vand.u32 2147483648, %v586_v54  ;;  %vm591_vm6 = vcmp.eq.f32.partialorder %v586_v54, 0.0 }
 0x903   : > { %v609_v61 = vpop.xlane.xlu0 %608 }
 0x904   : > { %vm612_vm7 = vcmp.eq.f32.partialorder %v609_v61, inf  ;;  %v615_v9 = vand.u32 2147483648, %v609_v61  ;;  %vm614_vm8 = vcmp.eq.f32.partialorder %v609_v61, 0.0 }
 0x90f   : > { %v820_v33 = vpop.eup %819 }
 0x910   : > { %v588_v55 = vmul.f32 %v820_v33, %v586_v54 }
 0x912   : > { %v590_v57 = vsel %vm589_vm5, %v586_v54, %v588_v55 }
 0x913   : > { %v593_v13 = vsel %vm591_vm6, %v592_v56, %v590_v57 }
 0x914   : > { %v594_v58 = vmax.f32 %v593_v13, 1e-15 }
 0x916   : > { %v676_v59 = vclamps-f32 %v594_v58, 0.9999999 }
 0x918   : > { %v598_v60 = vsub.f32 1.0, %v676_v59  ;;  %v597_v62 = vadd.f32 1.0, %v676_v59 }
 0x91a   : > { %821 = vrcp.f32 %v598_v60 }
 0x91b   : > { %823 = vrsqrt.f32 %v609_v61 }
 0x927   : > { %v822_v63 = vpop.eup %821 }
 0x928   : > { %v600_v1 = vmul.f32 %v822_v63, %v597_v62  ;;  %v824_v2 = vpop.eup %823 }
 0x929   : > { %v611_v3 = vmul.f32 %v824_v2, %v609_v61 }
 0x92a   : > { %825 = vlog2.f32 %v600_v1 }
 0x92b   : > { %827 = vrcp.f32 %v594_v58  ;;  %v613_v4 = vsel %vm612_vm7, %v609_v61, %v611_v3 }
 0x92c   : > { %v616_v14 = vsel %vm614_vm8, %v615_v9, %v613_v4 }
 0x92d   : > { %v617_v10 = vmax.f32 %v616_v14, 1e-15 }
 0x937   : > { %v826_v5 = vpop.eup %825 }
 0x938   : > { %v602_v11 = vmul.f32 0.6931472, %v826_v5  ;;  %v828_v16 = vpop.eup %827 }
 0x93a   : > { %v603_v15 = vmul.f32 0.5, %v602_v11 }
 0x93c   : > { %v605_v12 = vmul.f32 %v828_v16, %v603_v15 }
 0x93e   : > { %v618_v17 = vmul.f32 %v617_v10, %v605_v12 }
 0x940   : > { %829 = vtanh.f32 %v618_v17 }
 0x941   : > { %831 = vrcp.f32 %v617_v10 }
 0x94d   : > { %v830_v18 = vpop.eup %829 }
 0x94e   : > { %v620_v19 = vmul.f32 %v830_v18, %v606_v52  ;;  %v832_v20 = vpop.eup %831 }
 0x950   : > { %v622_v21 = vmul.f32 %v832_v20, %v620_v19 }
 0x952   : > { %v626_v22 = vsel %vm614_vm8, 0.0, %v622_v21 }
 0x953   : > { %v630_v24 = vmul.f32 %v626_v22, %v938_v23  ;;  %v627_v25 = vmul.f32 %v626_v22, %v626_v22  ;;  %v637_v37 = vmul.f32 %v626_v22, %v576_v44 }
 0x955   : > { %631 = vadd.xlane.f32.xlu1 %v630_v24  ;;  %628 = vadd.xlane.f32.xlu0 %v627_v25 }
 0x9de   : > { %v632_v26 = vpop.xlane.xlu1 %631  ;;  %v629_v27 = vpop.xlane.xlu0 %628 }
 0x9df   : > { %v633_v28 = vmul.f32 2.0, %v632_v26  ;;  %v639_v30 = vmul.f32 %v629_v27, %v1007_v48 }
 0x9e1   : > { %v634_v29 = vadd.f32 1.0, %v633_v28 }
 0x9e3   : > { %v640_v31 = vadd.f32 %v639_v30, %v634_v29  ;;  %v635_v34 = vadd.f32 %v634_v29, %v629_v27 }
 0x9e5   : > { %v641_v32 = vmax.f32 %v640_v31, 1e-15  ;;  %v636_v36 = vmul.f32 %v835_v35, %v635_v34 }
 0x9e7   : > { %833 = vrcp.f32 %v641_v32  ;;  %v638_v23 = vadd.f32 %v637_v37, %v636_v36 }
 0x9f3   :  { %43 = sbr.rel (!%p41_p0) target bundleno = 147 (0x93), region = 57 }
 0x9f4   : > { %v834_v38 = vpop.eup %833 }
 0x9f5   : > { %v643_v39 = vmul.f32 %v834_v38, %v638_v23 }
 0x9f7   : > { %644 = vst [vmem:[#allocation2] sm:$0xff] %v643_v39  ;;  %647 = vst [vmem:[%s646_s21] sm:$0xff] %v643_v39 }
 0x9fe   :  { %v648_v40 = vld [vmem:[#allocation2] sm:$0xff] }
 0x9ff   :  { %649 = vst [vmem:[%s1139_s5] sm:$0xff] %v648_v40 }

</bundles_post_ra>
